<compile_context>
chip_gen: v7x
topology: tpu7x:2x2x1
jax: 0.10.0
libtpu: 0.0.40
codegen_flags: <defaults>
</compile_context>

<pallas_src>
import jax
import jax.numpy as jnp
import numpy as np
from jax.experimental import pallas as pl
from jax.experimental.pallas import tpu as pltpu

# ---------------------------------------------------------------------------
# Model hyper-parameters (from the PyTorch module)
# ---------------------------------------------------------------------------
N_PARTICLE = 100
NUM_ACTIONS = 4            # BreakoutNoFrameskip-v4 action space (hard-coded)
DEPTHS = (32, 64, 64)
FINAL_LAYER = 512

# Small synthetic observation consistent with nature_cnn's conv stack:
# 36x36 input -> conv(8,s4)->8x8 -> conv(4,s2)->3x3 -> conv(3,s1)->1x1
IN_CHANNELS = 4
SPATIAL = 36
BATCH = 2

H1 = (SPATIAL - 8) // 4 + 1        # 8   conv1 output spatial
H2 = (H1 - 4) // 2 + 1             # 3   conv2 output spatial
H3 = (H2 - 3) // 1 + 1             # 1   conv3 output spatial
N_FLAT = DEPTHS[2] * H3 * H3       # 64
FC2_OUT = NUM_ACTIONS * N_PARTICLE  # 400
FC2_PAD = 512                       # lane-dense padded fc2 width (multiple of 128)


# ---------------------------------------------------------------------------
# Fused Pallas kernel: whole forward pass in one launch
# ---------------------------------------------------------------------------
def _taps_block(x_rows_bf16, s_ref, w_ref, b_ref):
    """relu( sum_t (S_t @ X) @ W_t + b ).

    Tap-decomposed convolution: S_t are constant 0/1 row-selection matrices
    (im2col expressed as matmul), W_t the (C_in, C_out) slice of the conv weight
    for kernel tap t. Everything runs on the MXU with f32 accumulation.
    """
    n_taps = s_ref.shape[0]
    out_rows = s_ref.shape[1]
    out_ch = w_ref.shape[2]
    acc = jnp.zeros((out_rows, out_ch), jnp.float32)
    for t in range(n_taps):
        sel = jnp.dot(s_ref[t], x_rows_bf16, preferred_element_type=jnp.float32)
        acc = acc + jnp.dot(sel.astype(jnp.bfloat16), w_ref[t],
                            preferred_element_type=jnp.float32)
    return jnp.maximum(acc + b_ref[...], 0.0)


def _fused_forward_kernel(p1_ref, s2_ref, s3_ref,
                          w1_ref, b1_ref, w2_ref, b2_ref, w3_ref, b3_ref,
                          wf1_ref, bf1_ref, wf2_ref, bf2_ref,
                          o_ref):
    # conv1 as one matmul on pre-extracted patches: (B*64, 256) @ (256, 32)
    y1 = jnp.dot(p1_ref[...], w1_ref[...], preferred_element_type=jnp.float32)
    y1 = jnp.maximum(y1 + b1_ref[...], 0.0).astype(jnp.bfloat16)        # (B*64, 32)

    # conv2: 16 taps, rows ordered (b, p, q)                             (B*9, 64)
    y2 = _taps_block(y1, s2_ref, w2_ref, b2_ref).astype(jnp.bfloat16)
    # conv3: 9 taps, output spatial 1x1 -> rows are just the batch       (B, 64)
    y3 = _taps_block(y2, s3_ref, w3_ref, b3_ref).astype(jnp.bfloat16)

    # fc1 + ReLU                                                         (B, 512)
    y4 = jnp.dot(y3, wf1_ref[...], preferred_element_type=jnp.float32)
    y4 = jnp.maximum(y4 + bf1_ref[...], 0.0).astype(jnp.bfloat16)

    # fc2, lane-dense padded to 512 columns                              (B, 512)
    y5 = jnp.dot(y4, wf2_ref[...], preferred_element_type=jnp.float32) + bf2_ref[...]
    o_ref[...] = y5.astype(o_ref.dtype)


# ---------------------------------------------------------------------------
# Wrapper-side glue (runs once per call inside jit; tiny XLA preprocessing)
# ---------------------------------------------------------------------------
def _im2col_conv1(x_nhwc):
    """(B, 36, 36, C) -> (B*8*8, 8*8*C) patches, column order (i, j, c)."""
    B = x_nhwc.shape[0]
    slabs = []
    for i in range(8):
        for j in range(8):
            slabs.append(x_nhwc[:, i:i + 4 * H1:4, j:j + 4 * H1:4, :])
    p = jnp.concatenate(slabs, axis=-1)                  # (B, 8, 8, 8*8*C)
    return p.reshape(B * H1 * H1, 8 * 8 * IN_CHANNELS)


def _conv_tap_select(batch, hin, k, stride):
    """Constant 0/1 selection matrices: per tap (i,j), maps flattened input rows
    (b*hin*hin + h*hin + w) to flattened output rows (b*ho*ho + p*ho + q)."""
    ho = (hin - k) // stride + 1
    S = np.zeros((k * k, batch * ho * ho, batch * hin * hin), np.float32)
    for i in range(k):
        for j in range(k):
            t = i * k + j
            for b in range(batch):
                for p in range(ho):
                    for q in range(ho):
                        r_out = (b * ho + p) * ho + q
                        r_in = (b * hin + stride * p + i) * hin + (stride * q + j)
                        S[t, r_out, r_in] = 1.0
    return S


def prepare_kernel_params(params, batch):
    """One-time (outside jit) weight re-layout: pre-transposed, bf16, padded."""
    f, bf = jnp.float32, jnp.bfloat16
    kp = {}
    # Conv weights (O, C, kh, kw) -> per-tap (kh*kw, C, O); conv1 fully flattened.
    kp["w1"] = jnp.transpose(params["conv1_w"], (2, 3, 1, 0)).reshape(
        8 * 8 * IN_CHANNELS, DEPTHS[0]).astype(bf)
    kp["b1"] = params["conv1_b"].reshape(1, -1).astype(f)
    kp["w2"] = jnp.transpose(params["conv2_w"], (2, 3, 1, 0)).reshape(
        4 * 4, DEPTHS[0], DEPTHS[1]).astype(bf)
    kp["b2"] = params["conv2_b"].reshape(1, -1).astype(f)
    kp["w3"] = jnp.transpose(params["conv3_w"], (2, 3, 1, 0)).reshape(
        3 * 3, DEPTHS[1], DEPTHS[2]).astype(bf)
    kp["b3"] = params["conv3_b"].reshape(1, -1).astype(f)
    # FC weights pre-transposed to (K, N); fc2 padded to lane-dense 512 columns.
    kp["wf1"] = jnp.transpose(params["fc1_w"]).astype(bf)                 # (64, 512)
    kp["bf1"] = params["fc1_b"].reshape(1, -1).astype(f)
    wf2 = jnp.transpose(params["fc2_w"])                                  # (512, 400)
    kp["wf2"] = jnp.pad(wf2, ((0, 0), (0, FC2_PAD - FC2_OUT))).astype(bf)
    kp["bf2"] = jnp.pad(params["fc2_b"], (0, FC2_PAD - FC2_OUT)).reshape(1, -1).astype(f)
    # Constant tap-selection matrices for in-kernel conv2 / conv3 im2col.
    kp["s2"] = jnp.asarray(_conv_tap_select(batch, H1, 4, 2), bf)   # (16, B*9,  B*64)
    kp["s3"] = jnp.asarray(_conv_tap_select(batch, H2, 3, 1), bf)   # (9,  B,    B*9)
    return kp


# ---------------------------------------------------------------------------
# Parameter initialization (deterministic, synthetic; PyTorch-style shapes)
# ---------------------------------------------------------------------------
def init_params(key):
    ks = jax.random.split(key, 10)
    p = {}
    p["conv1_w"] = 0.05 * jax.random.normal(ks[0], (DEPTHS[0], IN_CHANNELS, 8, 8), jnp.float32)
    p["conv1_b"] = 0.05 * jax.random.normal(ks[1], (DEPTHS[0],), jnp.float32)
    p["conv2_w"] = 0.05 * jax.random.normal(ks[2], (DEPTHS[1], DEPTHS[0], 4, 4), jnp.float32)
    p["conv2_b"] = 0.05 * jax.random.normal(ks[3], (DEPTHS[1],), jnp.float32)
    p["conv3_w"] = 0.05 * jax.random.normal(ks[4], (DEPTHS[2], DEPTHS[1], 3, 3), jnp.float32)
    p["conv3_b"] = 0.05 * jax.random.normal(ks[5], (DEPTHS[2],), jnp.float32)
    p["fc1_w"] = 0.05 * jax.random.normal(ks[6], (FINAL_LAYER, N_FLAT), jnp.float32)
    p["fc1_b"] = 0.05 * jax.random.normal(ks[7], (FINAL_LAYER,), jnp.float32)
    p["fc2_w"] = 0.05 * jax.random.normal(ks[8], (FC2_OUT, FINAL_LAYER), jnp.float32)
    p["fc2_b"] = 0.05 * jax.random.normal(ks[9], (FC2_OUT,), jnp.float32)
    return p


# ---------------------------------------------------------------------------
# Forward pass (matches Network.forward semantics)
# ---------------------------------------------------------------------------
@jax.jit
def network_forward(x_nchw, kp):
    """x_nchw: (B, 4, 36, 36) f32 -> (B, NUM_ACTIONS, N_PARTICLE) f32."""
    B = x_nchw.shape[0]
    x = jnp.transpose(x_nchw, (0, 2, 3, 1))                  # NCHW -> NHWC
    p1 = _im2col_conv1(x).astype(jnp.bfloat16)               # (B*64, 256)

    vmem = pl.BlockSpec(memory_space=pltpu.MemorySpace.VMEM)
    out = pl.pallas_call(
        _fused_forward_kernel,
        out_shape=jax.ShapeDtypeStruct((B, FC2_PAD), jnp.float32),
        in_specs=[vmem] * 13,
        out_specs=vmem,
    )(p1, kp["s2"], kp["s3"],
      kp["w1"], kp["b1"], kp["w2"], kp["b2"], kp["w3"], kp["b3"],
      kp["wf1"], kp["bf1"], kp["wf2"], kp["bf2"])

    return out[:, :FC2_OUT].reshape(B, NUM_ACTIONS, N_PARTICLE)


# ---------------------------------------------------------------------------
# Independent pure-JAX f32 reference (for self-check)
# ---------------------------------------------------------------------------
def reference_forward(x_nchw, params):
    dn = ("NHWC", "OIHW", "NHWC")
    hp = jax.lax.Precision.HIGHEST

    def conv(x, w, b, s):
        y = jax.lax.conv_general_dilated(x, w, (s, s), "VALID",
                                         dimension_numbers=dn, precision=hp)
        return jax.nn.relu(y + b.reshape(1, 1, 1, -1))

    x = jnp.transpose(x_nchw, (0, 2, 3, 1))
    x = conv(x, params["conv1_w"], params["conv1_b"], 4)
    x = conv(x, params["conv2_w"], params["conv2_b"], 2)
    x = conv(x, params["conv3_w"], params["conv3_b"], 1)
    x = x.reshape(x.shape[0], -1)        # 1x1 spatial: NHWC flatten == NCHW flatten
    x = jax.nn.relu(jnp.dot(x, params["fc1_w"].T, precision=hp) + params["fc1_b"])
    x = jnp.dot(x, params["fc2_w"].T, precision=hp) + params["fc2_b"]
    return x.reshape(x.shape[0], NUM_ACTIONS, N_PARTICLE)


if __name__ == "__main__":
    key = jax.random.PRNGKey(0)
    k_param, k_x = jax.random.split(key)
    params = init_params(k_param)
    kparams = prepare_kernel_params(params, BATCH)   # one-time re-layout, outside jit
    x = jax.random.uniform(k_x, (BATCH, IN_CHANNELS, SPATIAL, SPATIAL), jnp.float32)

    out = jax.block_until_ready(network_forward(x, kparams))
    assert out.shape == (BATCH, NUM_ACTIONS, N_PARTICLE), out.shape
    assert out.dtype == jnp.float32

    ref = jax.block_until_ready(reference_forward(x, params))
    err = float(jnp.max(jnp.abs(out - ref)))
    assert err < 5e-2, f"max abs error vs f32 reference: {err}"

    print("KERNEL_OK")
</pallas_src>

<mosaic_0001>
module attributes {stable_mosaic.version = 11 : i64} {
  func.func @_fused_forward_kernel(%arg0: memref<128x256xbf16, #tpu.memory_space<vmem>>, %arg1: memref<16x18x128xbf16, #tpu.memory_space<vmem>>, %arg2: memref<9x2x18xbf16, #tpu.memory_space<vmem>>, %arg3: memref<256x32xbf16, #tpu.memory_space<vmem>>, %arg4: memref<1x32xf32, #tpu.memory_space<vmem>>, %arg5: memref<16x32x64xbf16, #tpu.memory_space<vmem>>, %arg6: memref<1x64xf32, #tpu.memory_space<vmem>>, %arg7: memref<9x64x64xbf16, #tpu.memory_space<vmem>>, %arg8: memref<1x64xf32, #tpu.memory_space<vmem>>, %arg9: memref<64x512xbf16, #tpu.memory_space<vmem>>, %arg10: memref<1x512xf32, #tpu.memory_space<vmem>>, %arg11: memref<512x512xbf16, #tpu.memory_space<vmem>>, %arg12: memref<1x512xf32, #tpu.memory_space<vmem>>, %arg13: memref<2x512xf32, #tpu.memory_space<vmem>>) attributes {dimension_semantics = [], scalar_prefetch = 0 : i64, scratch_operands = 0 : i64, tpu.core_type = #tpu.core_type<tc>} {
    %c0 = arith.constant 0 : index
    %c0_0 = arith.constant 0 : index
    %0 = vector.load %arg0[%c0, %c0_0] : memref<128x256xbf16, #tpu.memory_space<vmem>>, vector<128x256xbf16>
    %c0_1 = arith.constant 0 : index
    %c0_2 = arith.constant 0 : index
    %1 = vector.load %arg3[%c0_1, %c0_2] : memref<256x32xbf16, #tpu.memory_space<vmem>>, vector<256x32xbf16>
    %cst = arith.constant dense<0.000000e+00> : vector<128x32xf32>
    %2 = tpu.matmul %0, %1, %cst {dimension_numbers = #tpu.dot_dimension_numbers<[1], [0], [0], [1], [0, 0, 1, 1], [], []>} : vector<128x256xbf16>, vector<256x32xbf16>, vector<128x32xf32> -> vector<128x32xf32>
    %c0_3 = arith.constant 0 : index
    %c0_4 = arith.constant 0 : index
    %3 = vector.load %arg4[%c0_3, %c0_4] : memref<1x32xf32, #tpu.memory_space<vmem>>, vector<1x32xf32>
    %4 = vector.broadcast %3 : vector<1x32xf32> to vector<128x32xf32>
    %5 = arith.addf %2, %4 : vector<128x32xf32>
    %cst_5 = arith.constant 0.000000e+00 : f32
    %6 = vector.broadcast %cst_5 : f32 to vector<128x32xf32>
    %7 = arith.maximumf %5, %6 : vector<128x32xf32>
    %8 = arith.truncf %7 : vector<128x32xf32> to vector<128x32xbf16>
    %cst_6 = arith.constant 0.000000e+00 : f32
    %9 = vector.broadcast %cst_6 : f32 to vector<18x64xf32>
    %c0_7 = arith.constant 0 : index
    %c0_8 = arith.constant 0 : index
    %c0_9 = arith.constant 0 : index
    %10 = vector.load %arg1[%c0_7, %c0_8, %c0_9] : memref<16x18x128xbf16, #tpu.memory_space<vmem>>, vector<1x18x128xbf16>
    %11 = vector.shape_cast %10 : vector<1x18x128xbf16> to vector<18x128xbf16>
    %cst_10 = arith.constant dense<0.000000e+00> : vector<18x32xf32>
    %12 = tpu.matmul %11, %8, %cst_10 {dimension_numbers = #tpu.dot_dimension_numbers<[1], [0], [0], [1], [0, 0, 1, 1], [], []>} : vector<18x128xbf16>, vector<128x32xbf16>, vector<18x32xf32> -> vector<18x32xf32>
    %13 = arith.truncf %12 : vector<18x32xf32> to vector<18x32xbf16>
    %c0_11 = arith.constant 0 : index
    %c0_12 = arith.constant 0 : index
    %c0_13 = arith.constant 0 : index
    %14 = vector.load %arg5[%c0_11, %c0_12, %c0_13] : memref<16x32x64xbf16, #tpu.memory_space<vmem>>, vector<1x32x64xbf16>
    %15 = vector.shape_cast %14 : vector<1x32x64xbf16> to vector<32x64xbf16>
    %cst_14 = arith.constant dense<0.000000e+00> : vector<18x64xf32>
    %16 = tpu.matmul %13, %15, %cst_14 {dimension_numbers = #tpu.dot_dimension_numbers<[1], [0], [0], [1], [0, 0, 1, 1], [], []>} : vector<18x32xbf16>, vector<32x64xbf16>, vector<18x64xf32> -> vector<18x64xf32>
    %17 = arith.addf %9, %16 : vector<18x64xf32>
    %c1 = arith.constant 1 : index
    %c0_15 = arith.constant 0 : index
    %c0_16 = arith.constant 0 : index
    %18 = vector.load %arg1[%c1, %c0_15, %c0_16] : memref<16x18x128xbf16, #tpu.memory_space<vmem>>, vector<1x18x128xbf16>
    %19 = vector.shape_cast %18 : vector<1x18x128xbf16> to vector<18x128xbf16>
    %cst_17 = arith.constant dense<0.000000e+00> : vector<18x32xf32>
    %20 = tpu.matmul %19, %8, %cst_17 {dimension_numbers = #tpu.dot_dimension_numbers<[1], [0], [0], [1], [0, 0, 1, 1], [], []>} : vector<18x128xbf16>, vector<128x32xbf16>, vector<18x32xf32> -> vector<18x32xf32>
    %21 = arith.truncf %20 : vector<18x32xf32> to vector<18x32xbf16>
    %c1_18 = arith.constant 1 : index
    %c0_19 = arith.constant 0 : index
    %c0_20 = arith.constant 0 : index
    %22 = vector.load %arg5[%c1_18, %c0_19, %c0_20] : memref<16x32x64xbf16, #tpu.memory_space<vmem>>, vector<1x32x64xbf16>
    %23 = vector.shape_cast %22 : vector<1x32x64xbf16> to vector<32x64xbf16>
    %cst_21 = arith.constant dense<0.000000e+00> : vector<18x64xf32>
    %24 = tpu.matmul %21, %23, %cst_21 {dimension_numbers = #tpu.dot_dimension_numbers<[1], [0], [0], [1], [0, 0, 1, 1], [], []>} : vector<18x32xbf16>, vector<32x64xbf16>, vector<18x64xf32> -> vector<18x64xf32>
    %25 = arith.addf %17, %24 : vector<18x64xf32>
    %c2 = arith.constant 2 : index
    %c0_22 = arith.constant 0 : index
    %c0_23 = arith.constant 0 : index
    %26 = vector.load %arg1[%c2, %c0_22, %c0_23] : memref<16x18x128xbf16, #tpu.memory_space<vmem>>, vector<1x18x128xbf16>
    %27 = vector.shape_cast %26 : vector<1x18x128xbf16> to vector<18x128xbf16>
    %cst_24 = arith.constant dense<0.000000e+00> : vector<18x32xf32>
    %28 = tpu.matmul %27, %8, %cst_24 {dimension_numbers = #tpu.dot_dimension_numbers<[1], [0], [0], [1], [0, 0, 1, 1], [], []>} : vector<18x128xbf16>, vector<128x32xbf16>, vector<18x32xf32> -> vector<18x32xf32>
    %29 = arith.truncf %28 : vector<18x32xf32> to vector<18x32xbf16>
    %c2_25 = arith.constant 2 : index
    %c0_26 = arith.constant 0 : index
    %c0_27 = arith.constant 0 : index
    %30 = vector.load %arg5[%c2_25, %c0_26, %c0_27] : memref<16x32x64xbf16, #tpu.memory_space<vmem>>, vector<1x32x64xbf16>
    %31 = vector.shape_cast %30 : vector<1x32x64xbf16> to vector<32x64xbf16>
    %cst_28 = arith.constant dense<0.000000e+00> : vector<18x64xf32>
    %32 = tpu.matmul %29, %31, %cst_28 {dimension_numbers = #tpu.dot_dimension_numbers<[1], [0], [0], [1], [0, 0, 1, 1], [], []>} : vector<18x32xbf16>, vector<32x64xbf16>, vector<18x64xf32> -> vector<18x64xf32>
    %33 = arith.addf %25, %32 : vector<18x64xf32>
    %c3 = arith.constant 3 : index
    %c0_29 = arith.constant 0 : index
    %c0_30 = arith.constant 0 : index
    %34 = vector.load %arg1[%c3, %c0_29, %c0_30] : memref<16x18x128xbf16, #tpu.memory_space<vmem>>, vector<1x18x128xbf16>
    %35 = vector.shape_cast %34 : vector<1x18x128xbf16> to vector<18x128xbf16>
    %cst_31 = arith.constant dense<0.000000e+00> : vector<18x32xf32>
    %36 = tpu.matmul %35, %8, %cst_31 {dimension_numbers = #tpu.dot_dimension_numbers<[1], [0], [0], [1], [0, 0, 1, 1], [], []>} : vector<18x128xbf16>, vector<128x32xbf16>, vector<18x32xf32> -> vector<18x32xf32>
    %37 = arith.truncf %36 : vector<18x32xf32> to vector<18x32xbf16>
    %c3_32 = arith.constant 3 : index
    %c0_33 = arith.constant 0 : index
    %c0_34 = arith.constant 0 : index
    %38 = vector.load %arg5[%c3_32, %c0_33, %c0_34] : memref<16x32x64xbf16, #tpu.memory_space<vmem>>, vector<1x32x64xbf16>
    %39 = vector.shape_cast %38 : vector<1x32x64xbf16> to vector<32x64xbf16>
    %cst_35 = arith.constant dense<0.000000e+00> : vector<18x64xf32>
    %40 = tpu.matmul %37, %39, %cst_35 {dimension_numbers = #tpu.dot_dimension_numbers<[1], [0], [0], [1], [0, 0, 1, 1], [], []>} : vector<18x32xbf16>, vector<32x64xbf16>, vector<18x64xf32> -> vector<18x64xf32>
    %41 = arith.addf %33, %40 : vector<18x64xf32>
    %c4 = arith.constant 4 : index
    %c0_36 = arith.constant 0 : index
    %c0_37 = arith.constant 0 : index
    %42 = vector.load %arg1[%c4, %c0_36, %c0_37] : memref<16x18x128xbf16, #tpu.memory_space<vmem>>, vector<1x18x128xbf16>
    %43 = vector.shape_cast %42 : vector<1x18x128xbf16> to vector<18x128xbf16>
    %cst_38 = arith.constant dense<0.000000e+00> : vector<18x32xf32>
    %44 = tpu.matmul %43, %8, %cst_38 {dimension_numbers = #tpu.dot_dimension_numbers<[1], [0], [0], [1], [0, 0, 1, 1], [], []>} : vector<18x128xbf16>, vector<128x32xbf16>, vector<18x32xf32> -> vector<18x32xf32>
    %45 = arith.truncf %44 : vector<18x32xf32> to vector<18x32xbf16>
    %c4_39 = arith.constant 4 : index
    %c0_40 = arith.constant 0 : index
    %c0_41 = arith.constant 0 : index
    %46 = vector.load %arg5[%c4_39, %c0_40, %c0_41] : memref<16x32x64xbf16, #tpu.memory_space<vmem>>, vector<1x32x64xbf16>
    %47 = vector.shape_cast %46 : vector<1x32x64xbf16> to vector<32x64xbf16>
    %cst_42 = arith.constant dense<0.000000e+00> : vector<18x64xf32>
    %48 = tpu.matmul %45, %47, %cst_42 {dimension_numbers = #tpu.dot_dimension_numbers<[1], [0], [0], [1], [0, 0, 1, 1], [], []>} : vector<18x32xbf16>, vector<32x64xbf16>, vector<18x64xf32> -> vector<18x64xf32>
    %49 = arith.addf %41, %48 : vector<18x64xf32>
    %c5 = arith.constant 5 : index
    %c0_43 = arith.constant 0 : index
    %c0_44 = arith.constant 0 : index
    %50 = vector.load %arg1[%c5, %c0_43, %c0_44] : memref<16x18x128xbf16, #tpu.memory_space<vmem>>, vector<1x18x128xbf16>
    %51 = vector.shape_cast %50 : vector<1x18x128xbf16> to vector<18x128xbf16>
    %cst_45 = arith.constant dense<0.000000e+00> : vector<18x32xf32>
    %52 = tpu.matmul %51, %8, %cst_45 {dimension_numbers = #tpu.dot_dimension_numbers<[1], [0], [0], [1], [0, 0, 1, 1], [], []>} : vector<18x128xbf16>, vector<128x32xbf16>, vector<18x32xf32> -> vector<18x32xf32>
    %53 = arith.truncf %52 : vector<18x32xf32> to vector<18x32xbf16>
    %c5_46 = arith.constant 5 : index
    %c0_47 = arith.constant 0 : index
    %c0_48 = arith.constant 0 : index
    %54 = vector.load %arg5[%c5_46, %c0_47, %c0_48] : memref<16x32x64xbf16, #tpu.memory_space<vmem>>, vector<1x32x64xbf16>
    %55 = vector.shape_cast %54 : vector<1x32x64xbf16> to vector<32x64xbf16>
    %cst_49 = arith.constant dense<0.000000e+00> : vector<18x64xf32>
    %56 = tpu.matmul %53, %55, %cst_49 {dimension_numbers = #tpu.dot_dimension_numbers<[1], [0], [0], [1], [0, 0, 1, 1], [], []>} : vector<18x32xbf16>, vector<32x64xbf16>, vector<18x64xf32> -> vector<18x64xf32>
    %57 = arith.addf %49, %56 : vector<18x64xf32>
    %c6 = arith.constant 6 : index
    %c0_50 = arith.constant 0 : index
    %c0_51 = arith.constant 0 : index
    %58 = vector.load %arg1[%c6, %c0_50, %c0_51] : memref<16x18x128xbf16, #tpu.memory_space<vmem>>, vector<1x18x128xbf16>
    %59 = vector.shape_cast %58 : vector<1x18x128xbf16> to vector<18x128xbf16>
    %cst_52 = arith.constant dense<0.000000e+00> : vector<18x32xf32>
    %60 = tpu.matmul %59, %8, %cst_52 {dimension_numbers = #tpu.dot_dimension_numbers<[1], [0], [0], [1], [0, 0, 1, 1], [], []>} : vector<18x128xbf16>, vector<128x32xbf16>, vector<18x32xf32> -> vector<18x32xf32>
    %61 = arith.truncf %60 : vector<18x32xf32> to vector<18x32xbf16>
    %c6_53 = arith.constant 6 : index
    %c0_54 = arith.constant 0 : index
    %c0_55 = arith.constant 0 : index
    %62 = vector.load %arg5[%c6_53, %c0_54, %c0_55] : memref<16x32x64xbf16, #tpu.memory_space<vmem>>, vector<1x32x64xbf16>
    %63 = vector.shape_cast %62 : vector<1x32x64xbf16> to vector<32x64xbf16>
    %cst_56 = arith.constant dense<0.000000e+00> : vector<18x64xf32>
    %64 = tpu.matmul %61, %63, %cst_56 {dimension_numbers = #tpu.dot_dimension_numbers<[1], [0], [0], [1], [0, 0, 1, 1], [], []>} : vector<18x32xbf16>, vector<32x64xbf16>, vector<18x64xf32> -> vector<18x64xf32>
    %65 = arith.addf %57, %64 : vector<18x64xf32>
    %c7 = arith.constant 7 : index
    %c0_57 = arith.constant 0 : index
    %c0_58 = arith.constant 0 : index
    %66 = vector.load %arg1[%c7, %c0_57, %c0_58] : memref<16x18x128xbf16, #tpu.memory_space<vmem>>, vector<1x18x128xbf16>
    %67 = vector.shape_cast %66 : vector<1x18x128xbf16> to vector<18x128xbf16>
    %cst_59 = arith.constant dense<0.000000e+00> : vector<18x32xf32>
    %68 = tpu.matmul %67, %8, %cst_59 {dimension_numbers = #tpu.dot_dimension_numbers<[1], [0], [0], [1], [0, 0, 1, 1], [], []>} : vector<18x128xbf16>, vector<128x32xbf16>, vector<18x32xf32> -> vector<18x32xf32>
    %69 = arith.truncf %68 : vector<18x32xf32> to vector<18x32xbf16>
    %c7_60 = arith.constant 7 : index
    %c0_61 = arith.constant 0 : index
    %c0_62 = arith.constant 0 : index
    %70 = vector.load %arg5[%c7_60, %c0_61, %c0_62] : memref<16x32x64xbf16, #tpu.memory_space<vmem>>, vector<1x32x64xbf16>
    %71 = vector.shape_cast %70 : vector<1x32x64xbf16> to vector<32x64xbf16>
    %cst_63 = arith.constant dense<0.000000e+00> : vector<18x64xf32>
    %72 = tpu.matmul %69, %71, %cst_63 {dimension_numbers = #tpu.dot_dimension_numbers<[1], [0], [0], [1], [0, 0, 1, 1], [], []>} : vector<18x32xbf16>, vector<32x64xbf16>, vector<18x64xf32> -> vector<18x64xf32>
    %73 = arith.addf %65, %72 : vector<18x64xf32>
    %c8 = arith.constant 8 : index
    %c0_64 = arith.constant 0 : index
    %c0_65 = arith.constant 0 : index
    %74 = vector.load %arg1[%c8, %c0_64, %c0_65] : memref<16x18x128xbf16, #tpu.memory_space<vmem>>, vector<1x18x128xbf16>
    %75 = vector.shape_cast %74 : vector<1x18x128xbf16> to vector<18x128xbf16>
    %cst_66 = arith.constant dense<0.000000e+00> : vector<18x32xf32>
    %76 = tpu.matmul %75, %8, %cst_66 {dimension_numbers = #tpu.dot_dimension_numbers<[1], [0], [0], [1], [0, 0, 1, 1], [], []>} : vector<18x128xbf16>, vector<128x32xbf16>, vector<18x32xf32> -> vector<18x32xf32>
    %77 = arith.truncf %76 : vector<18x32xf32> to vector<18x32xbf16>
    %c8_67 = arith.constant 8 : index
    %c0_68 = arith.constant 0 : index
    %c0_69 = arith.constant 0 : index
    %78 = vector.load %arg5[%c8_67, %c0_68, %c0_69] : memref<16x32x64xbf16, #tpu.memory_space<vmem>>, vector<1x32x64xbf16>
    %79 = vector.shape_cast %78 : vector<1x32x64xbf16> to vector<32x64xbf16>
    %cst_70 = arith.constant dense<0.000000e+00> : vector<18x64xf32>
    %80 = tpu.matmul %77, %79, %cst_70 {dimension_numbers = #tpu.dot_dimension_numbers<[1], [0], [0], [1], [0, 0, 1, 1], [], []>} : vector<18x32xbf16>, vector<32x64xbf16>, vector<18x64xf32> -> vector<18x64xf32>
    %81 = arith.addf %73, %80 : vector<18x64xf32>
    %c9 = arith.constant 9 : index
    %c0_71 = arith.constant 0 : index
    %c0_72 = arith.constant 0 : index
    %82 = vector.load %arg1[%c9, %c0_71, %c0_72] : memref<16x18x128xbf16, #tpu.memory_space<vmem>>, vector<1x18x128xbf16>
    %83 = vector.shape_cast %82 : vector<1x18x128xbf16> to vector<18x128xbf16>
    %cst_73 = arith.constant dense<0.000000e+00> : vector<18x32xf32>
    %84 = tpu.matmul %83, %8, %cst_73 {dimension_numbers = #tpu.dot_dimension_numbers<[1], [0], [0], [1], [0, 0, 1, 1], [], []>} : vector<18x128xbf16>, vector<128x32xbf16>, vector<18x32xf32> -> vector<18x32xf32>
    %85 = arith.truncf %84 : vector<18x32xf32> to vector<18x32xbf16>
    %c9_74 = arith.constant 9 : index
    %c0_75 = arith.constant 0 : index
    %c0_76 = arith.constant 0 : index
    %86 = vector.load %arg5[%c9_74, %c0_75, %c0_76] : memref<16x32x64xbf16, #tpu.memory_space<vmem>>, vector<1x32x64xbf16>
    %87 = vector.shape_cast %86 : vector<1x32x64xbf16> to vector<32x64xbf16>
    %cst_77 = arith.constant dense<0.000000e+00> : vector<18x64xf32>
    %88 = tpu.matmul %85, %87, %cst_77 {dimension_numbers = #tpu.dot_dimension_numbers<[1], [0], [0], [1], [0, 0, 1, 1], [], []>} : vector<18x32xbf16>, vector<32x64xbf16>, vector<18x64xf32> -> vector<18x64xf32>
    %89 = arith.addf %81, %88 : vector<18x64xf32>
    %c10 = arith.constant 10 : index
    %c0_78 = arith.constant 0 : index
    %c0_79 = arith.constant 0 : index
    %90 = vector.load %arg1[%c10, %c0_78, %c0_79] : memref<16x18x128xbf16, #tpu.memory_space<vmem>>, vector<1x18x128xbf16>
    %91 = vector.shape_cast %90 : vector<1x18x128xbf16> to vector<18x128xbf16>
    %cst_80 = arith.constant dense<0.000000e+00> : vector<18x32xf32>
    %92 = tpu.matmul %91, %8, %cst_80 {dimension_numbers = #tpu.dot_dimension_numbers<[1], [0], [0], [1], [0, 0, 1, 1], [], []>} : vector<18x128xbf16>, vector<128x32xbf16>, vector<18x32xf32> -> vector<18x32xf32>
    %93 = arith.truncf %92 : vector<18x32xf32> to vector<18x32xbf16>
    %c10_81 = arith.constant 10 : index
    %c0_82 = arith.constant 0 : index
    %c0_83 = arith.constant 0 : index
    %94 = vector.load %arg5[%c10_81, %c0_82, %c0_83] : memref<16x32x64xbf16, #tpu.memory_space<vmem>>, vector<1x32x64xbf16>
    %95 = vector.shape_cast %94 : vector<1x32x64xbf16> to vector<32x64xbf16>
    %cst_84 = arith.constant dense<0.000000e+00> : vector<18x64xf32>
    %96 = tpu.matmul %93, %95, %cst_84 {dimension_numbers = #tpu.dot_dimension_numbers<[1], [0], [0], [1], [0, 0, 1, 1], [], []>} : vector<18x32xbf16>, vector<32x64xbf16>, vector<18x64xf32> -> vector<18x64xf32>
    %97 = arith.addf %89, %96 : vector<18x64xf32>
    %c11 = arith.constant 11 : index
    %c0_85 = arith.constant 0 : index
    %c0_86 = arith.constant 0 : index
    %98 = vector.load %arg1[%c11, %c0_85, %c0_86] : memref<16x18x128xbf16, #tpu.memory_space<vmem>>, vector<1x18x128xbf16>
    %99 = vector.shape_cast %98 : vector<1x18x128xbf16> to vector<18x128xbf16>
    %cst_87 = arith.constant dense<0.000000e+00> : vector<18x32xf32>
    %100 = tpu.matmul %99, %8, %cst_87 {dimension_numbers = #tpu.dot_dimension_numbers<[1], [0], [0], [1], [0, 0, 1, 1], [], []>} : vector<18x128xbf16>, vector<128x32xbf16>, vector<18x32xf32> -> vector<18x32xf32>
    %101 = arith.truncf %100 : vector<18x32xf32> to vector<18x32xbf16>
    %c11_88 = arith.constant 11 : index
    %c0_89 = arith.constant 0 : index
    %c0_90 = arith.constant 0 : index
    %102 = vector.load %arg5[%c11_88, %c0_89, %c0_90] : memref<16x32x64xbf16, #tpu.memory_space<vmem>>, vector<1x32x64xbf16>
    %103 = vector.shape_cast %102 : vector<1x32x64xbf16> to vector<32x64xbf16>
    %cst_91 = arith.constant dense<0.000000e+00> : vector<18x64xf32>
    %104 = tpu.matmul %101, %103, %cst_91 {dimension_numbers = #tpu.dot_dimension_numbers<[1], [0], [0], [1], [0, 0, 1, 1], [], []>} : vector<18x32xbf16>, vector<32x64xbf16>, vector<18x64xf32> -> vector<18x64xf32>
    %105 = arith.addf %97, %104 : vector<18x64xf32>
    %c12 = arith.constant 12 : index
    %c0_92 = arith.constant 0 : index
    %c0_93 = arith.constant 0 : index
    %106 = vector.load %arg1[%c12, %c0_92, %c0_93] : memref<16x18x128xbf16, #tpu.memory_space<vmem>>, vector<1x18x128xbf16>
    %107 = vector.shape_cast %106 : vector<1x18x128xbf16> to vector<18x128xbf16>
    %cst_94 = arith.constant dense<0.000000e+00> : vector<18x32xf32>
    %108 = tpu.matmul %107, %8, %cst_94 {dimension_numbers = #tpu.dot_dimension_numbers<[1], [0], [0], [1], [0, 0, 1, 1], [], []>} : vector<18x128xbf16>, vector<128x32xbf16>, vector<18x32xf32> -> vector<18x32xf32>
    %109 = arith.truncf %108 : vector<18x32xf32> to vector<18x32xbf16>
    %c12_95 = arith.constant 12 : index
    %c0_96 = arith.constant 0 : index
    %c0_97 = arith.constant 0 : index
    %110 = vector.load %arg5[%c12_95, %c0_96, %c0_97] : memref<16x32x64xbf16, #tpu.memory_space<vmem>>, vector<1x32x64xbf16>
    %111 = vector.shape_cast %110 : vector<1x32x64xbf16> to vector<32x64xbf16>
    %cst_98 = arith.constant dense<0.000000e+00> : vector<18x64xf32>
    %112 = tpu.matmul %109, %111, %cst_98 {dimension_numbers = #tpu.dot_dimension_numbers<[1], [0], [0], [1], [0, 0, 1, 1], [], []>} : vector<18x32xbf16>, vector<32x64xbf16>, vector<18x64xf32> -> vector<18x64xf32>
    %113 = arith.addf %105, %112 : vector<18x64xf32>
    %c13 = arith.constant 13 : index
    %c0_99 = arith.constant 0 : index
    %c0_100 = arith.constant 0 : index
    %114 = vector.load %arg1[%c13, %c0_99, %c0_100] : memref<16x18x128xbf16, #tpu.memory_space<vmem>>, vector<1x18x128xbf16>
    %115 = vector.shape_cast %114 : vector<1x18x128xbf16> to vector<18x128xbf16>
    %cst_101 = arith.constant dense<0.000000e+00> : vector<18x32xf32>
    %116 = tpu.matmul %115, %8, %cst_101 {dimension_numbers = #tpu.dot_dimension_numbers<[1], [0], [0], [1], [0, 0, 1, 1], [], []>} : vector<18x128xbf16>, vector<128x32xbf16>, vector<18x32xf32> -> vector<18x32xf32>
    %117 = arith.truncf %116 : vector<18x32xf32> to vector<18x32xbf16>
    %c13_102 = arith.constant 13 : index
    %c0_103 = arith.constant 0 : index
    %c0_104 = arith.constant 0 : index
    %118 = vector.load %arg5[%c13_102, %c0_103, %c0_104] : memref<16x32x64xbf16, #tpu.memory_space<vmem>>, vector<1x32x64xbf16>
    %119 = vector.shape_cast %118 : vector<1x32x64xbf16> to vector<32x64xbf16>
    %cst_105 = arith.constant dense<0.000000e+00> : vector<18x64xf32>
    %120 = tpu.matmul %117, %119, %cst_105 {dimension_numbers = #tpu.dot_dimension_numbers<[1], [0], [0], [1], [0, 0, 1, 1], [], []>} : vector<18x32xbf16>, vector<32x64xbf16>, vector<18x64xf32> -> vector<18x64xf32>
    %121 = arith.addf %113, %120 : vector<18x64xf32>
    %c14 = arith.constant 14 : index
    %c0_106 = arith.constant 0 : index
    %c0_107 = arith.constant 0 : index
    %122 = vector.load %arg1[%c14, %c0_106, %c0_107] : memref<16x18x128xbf16, #tpu.memory_space<vmem>>, vector<1x18x128xbf16>
    %123 = vector.shape_cast %122 : vector<1x18x128xbf16> to vector<18x128xbf16>
    %cst_108 = arith.constant dense<0.000000e+00> : vector<18x32xf32>
    %124 = tpu.matmul %123, %8, %cst_108 {dimension_numbers = #tpu.dot_dimension_numbers<[1], [0], [0], [1], [0, 0, 1, 1], [], []>} : vector<18x128xbf16>, vector<128x32xbf16>, vector<18x32xf32> -> vector<18x32xf32>
    %125 = arith.truncf %124 : vector<18x32xf32> to vector<18x32xbf16>
    %c14_109 = arith.constant 14 : index
    %c0_110 = arith.constant 0 : index
    %c0_111 = arith.constant 0 : index
    %126 = vector.load %arg5[%c14_109, %c0_110, %c0_111] : memref<16x32x64xbf16, #tpu.memory_space<vmem>>, vector<1x32x64xbf16>
    %127 = vector.shape_cast %126 : vector<1x32x64xbf16> to vector<32x64xbf16>
    %cst_112 = arith.constant dense<0.000000e+00> : vector<18x64xf32>
    %128 = tpu.matmul %125, %127, %cst_112 {dimension_numbers = #tpu.dot_dimension_numbers<[1], [0], [0], [1], [0, 0, 1, 1], [], []>} : vector<18x32xbf16>, vector<32x64xbf16>, vector<18x64xf32> -> vector<18x64xf32>
    %129 = arith.addf %121, %128 : vector<18x64xf32>
    %c15 = arith.constant 15 : index
    %c0_113 = arith.constant 0 : index
    %c0_114 = arith.constant 0 : index
    %130 = vector.load %arg1[%c15, %c0_113, %c0_114] : memref<16x18x128xbf16, #tpu.memory_space<vmem>>, vector<1x18x128xbf16>
    %131 = vector.shape_cast %130 : vector<1x18x128xbf16> to vector<18x128xbf16>
    %cst_115 = arith.constant dense<0.000000e+00> : vector<18x32xf32>
    %132 = tpu.matmul %131, %8, %cst_115 {dimension_numbers = #tpu.dot_dimension_numbers<[1], [0], [0], [1], [0, 0, 1, 1], [], []>} : vector<18x128xbf16>, vector<128x32xbf16>, vector<18x32xf32> -> vector<18x32xf32>
    %133 = arith.truncf %132 : vector<18x32xf32> to vector<18x32xbf16>
    %c15_116 = arith.constant 15 : index
    %c0_117 = arith.constant 0 : index
    %c0_118 = arith.constant 0 : index
    %134 = vector.load %arg5[%c15_116, %c0_117, %c0_118] : memref<16x32x64xbf16, #tpu.memory_space<vmem>>, vector<1x32x64xbf16>
    %135 = vector.shape_cast %134 : vector<1x32x64xbf16> to vector<32x64xbf16>
    %cst_119 = arith.constant dense<0.000000e+00> : vector<18x64xf32>
    %136 = tpu.matmul %133, %135, %cst_119 {dimension_numbers = #tpu.dot_dimension_numbers<[1], [0], [0], [1], [0, 0, 1, 1], [], []>} : vector<18x32xbf16>, vector<32x64xbf16>, vector<18x64xf32> -> vector<18x64xf32>
    %137 = arith.addf %129, %136 : vector<18x64xf32>
    %c0_120 = arith.constant 0 : index
    %c0_121 = arith.constant 0 : index
    %138 = vector.load %arg6[%c0_120, %c0_121] : memref<1x64xf32, #tpu.memory_space<vmem>>, vector<1x64xf32>
    %139 = vector.broadcast %138 : vector<1x64xf32> to vector<18x64xf32>
    %140 = arith.addf %137, %139 : vector<18x64xf32>
    %cst_122 = arith.constant 0.000000e+00 : f32
    %141 = vector.broadcast %cst_122 : f32 to vector<18x64xf32>
    %142 = arith.maximumf %140, %141 : vector<18x64xf32>
    %143 = arith.truncf %142 : vector<18x64xf32> to vector<18x64xbf16>
    %cst_123 = arith.constant 0.000000e+00 : f32
    %144 = vector.broadcast %cst_123 : f32 to vector<2x64xf32>
    %c0_124 = arith.constant 0 : index
    %c0_125 = arith.constant 0 : index
    %c0_126 = arith.constant 0 : index
    %145 = vector.load %arg2[%c0_124, %c0_125, %c0_126] : memref<9x2x18xbf16, #tpu.memory_space<vmem>>, vector<1x2x18xbf16>
    %146 = vector.shape_cast %145 : vector<1x2x18xbf16> to vector<2x18xbf16>
    %cst_127 = arith.constant dense<0.000000e+00> : vector<2x64xf32>
    %147 = tpu.matmul %146, %143, %cst_127 {dimension_numbers = #tpu.dot_dimension_numbers<[1], [0], [0], [1], [0, 0, 1, 1], [], []>} : vector<2x18xbf16>, vector<18x64xbf16>, vector<2x64xf32> -> vector<2x64xf32>
    %148 = arith.truncf %147 : vector<2x64xf32> to vector<2x64xbf16>
    %c0_128 = arith.constant 0 : index
    %c0_129 = arith.constant 0 : index
    %c0_130 = arith.constant 0 : index
    %149 = vector.load %arg7[%c0_128, %c0_129, %c0_130] : memref<9x64x64xbf16, #tpu.memory_space<vmem>>, vector<1x64x64xbf16>
    %150 = vector.shape_cast %149 : vector<1x64x64xbf16> to vector<64x64xbf16>
    %cst_131 = arith.constant dense<0.000000e+00> : vector<2x64xf32>
    %151 = tpu.matmul %148, %150, %cst_131 {dimension_numbers = #tpu.dot_dimension_numbers<[1], [0], [0], [1], [0, 0, 1, 1], [], []>} : vector<2x64xbf16>, vector<64x64xbf16>, vector<2x64xf32> -> vector<2x64xf32>
    %152 = arith.addf %144, %151 : vector<2x64xf32>
    %c1_132 = arith.constant 1 : index
    %c0_133 = arith.constant 0 : index
    %c0_134 = arith.constant 0 : index
    %153 = vector.load %arg2[%c1_132, %c0_133, %c0_134] : memref<9x2x18xbf16, #tpu.memory_space<vmem>>, vector<1x2x18xbf16>
    %154 = vector.shape_cast %153 : vector<1x2x18xbf16> to vector<2x18xbf16>
    %cst_135 = arith.constant dense<0.000000e+00> : vector<2x64xf32>
    %155 = tpu.matmul %154, %143, %cst_135 {dimension_numbers = #tpu.dot_dimension_numbers<[1], [0], [0], [1], [0, 0, 1, 1], [], []>} : vector<2x18xbf16>, vector<18x64xbf16>, vector<2x64xf32> -> vector<2x64xf32>
    %156 = arith.truncf %155 : vector<2x64xf32> to vector<2x64xbf16>
    %c1_136 = arith.constant 1 : index
    %c0_137 = arith.constant 0 : index
    %c0_138 = arith.constant 0 : index
    %157 = vector.load %arg7[%c1_136, %c0_137, %c0_138] : memref<9x64x64xbf16, #tpu.memory_space<vmem>>, vector<1x64x64xbf16>
    %158 = vector.shape_cast %157 : vector<1x64x64xbf16> to vector<64x64xbf16>
    %cst_139 = arith.constant dense<0.000000e+00> : vector<2x64xf32>
    %159 = tpu.matmul %156, %158, %cst_139 {dimension_numbers = #tpu.dot_dimension_numbers<[1], [0], [0], [1], [0, 0, 1, 1], [], []>} : vector<2x64xbf16>, vector<64x64xbf16>, vector<2x64xf32> -> vector<2x64xf32>
    %160 = arith.addf %152, %159 : vector<2x64xf32>
    %c2_140 = arith.constant 2 : index
    %c0_141 = arith.constant 0 : index
    %c0_142 = arith.constant 0 : index
    %161 = vector.load %arg2[%c2_140, %c0_141, %c0_142] : memref<9x2x18xbf16, #tpu.memory_space<vmem>>, vector<1x2x18xbf16>
    %162 = vector.shape_cast %161 : vector<1x2x18xbf16> to vector<2x18xbf16>
    %cst_143 = arith.constant dense<0.000000e+00> : vector<2x64xf32>
    %163 = tpu.matmul %162, %143, %cst_143 {dimension_numbers = #tpu.dot_dimension_numbers<[1], [0], [0], [1], [0, 0, 1, 1], [], []>} : vector<2x18xbf16>, vector<18x64xbf16>, vector<2x64xf32> -> vector<2x64xf32>
    %164 = arith.truncf %163 : vector<2x64xf32> to vector<2x64xbf16>
    %c2_144 = arith.constant 2 : index
    %c0_145 = arith.constant 0 : index
    %c0_146 = arith.constant 0 : index
    %165 = vector.load %arg7[%c2_144, %c0_145, %c0_146] : memref<9x64x64xbf16, #tpu.memory_space<vmem>>, vector<1x64x64xbf16>
    %166 = vector.shape_cast %165 : vector<1x64x64xbf16> to vector<64x64xbf16>
    %cst_147 = arith.constant dense<0.000000e+00> : vector<2x64xf32>
    %167 = tpu.matmul %164, %166, %cst_147 {dimension_numbers = #tpu.dot_dimension_numbers<[1], [0], [0], [1], [0, 0, 1, 1], [], []>} : vector<2x64xbf16>, vector<64x64xbf16>, vector<2x64xf32> -> vector<2x64xf32>
    %168 = arith.addf %160, %167 : vector<2x64xf32>
    %c3_148 = arith.constant 3 : index
    %c0_149 = arith.constant 0 : index
    %c0_150 = arith.constant 0 : index
    %169 = vector.load %arg2[%c3_148, %c0_149, %c0_150] : memref<9x2x18xbf16, #tpu.memory_space<vmem>>, vector<1x2x18xbf16>
    %170 = vector.shape_cast %169 : vector<1x2x18xbf16> to vector<2x18xbf16>
    %cst_151 = arith.constant dense<0.000000e+00> : vector<2x64xf32>
    %171 = tpu.matmul %170, %143, %cst_151 {dimension_numbers = #tpu.dot_dimension_numbers<[1], [0], [0], [1], [0, 0, 1, 1], [], []>} : vector<2x18xbf16>, vector<18x64xbf16>, vector<2x64xf32> -> vector<2x64xf32>
    %172 = arith.truncf %171 : vector<2x64xf32> to vector<2x64xbf16>
    %c3_152 = arith.constant 3 : index
    %c0_153 = arith.constant 0 : index
    %c0_154 = arith.constant 0 : index
    %173 = vector.load %arg7[%c3_152, %c0_153, %c0_154] : memref<9x64x64xbf16, #tpu.memory_space<vmem>>, vector<1x64x64xbf16>
    %174 = vector.shape_cast %173 : vector<1x64x64xbf16> to vector<64x64xbf16>
    %cst_155 = arith.constant dense<0.000000e+00> : vector<2x64xf32>
    %175 = tpu.matmul %172, %174, %cst_155 {dimension_numbers = #tpu.dot_dimension_numbers<[1], [0], [0], [1], [0, 0, 1, 1], [], []>} : vector<2x64xbf16>, vector<64x64xbf16>, vector<2x64xf32> -> vector<2x64xf32>
    %176 = arith.addf %168, %175 : vector<2x64xf32>
    %c4_156 = arith.constant 4 : index
    %c0_157 = arith.constant 0 : index
    %c0_158 = arith.constant 0 : index
    %177 = vector.load %arg2[%c4_156, %c0_157, %c0_158] : memref<9x2x18xbf16, #tpu.memory_space<vmem>>, vector<1x2x18xbf16>
    %178 = vector.shape_cast %177 : vector<1x2x18xbf16> to vector<2x18xbf16>
    %cst_159 = arith.constant dense<0.000000e+00> : vector<2x64xf32>
    %179 = tpu.matmul %178, %143, %cst_159 {dimension_numbers = #tpu.dot_dimension_numbers<[1], [0], [0], [1], [0, 0, 1, 1], [], []>} : vector<2x18xbf16>, vector<18x64xbf16>, vector<2x64xf32> -> vector<2x64xf32>
    %180 = arith.truncf %179 : vector<2x64xf32> to vector<2x64xbf16>
    %c4_160 = arith.constant 4 : index
    %c0_161 = arith.constant 0 : index
    %c0_162 = arith.constant 0 : index
    %181 = vector.load %arg7[%c4_160, %c0_161, %c0_162] : memref<9x64x64xbf16, #tpu.memory_space<vmem>>, vector<1x64x64xbf16>
    %182 = vector.shape_cast %181 : vector<1x64x64xbf16> to vector<64x64xbf16>
    %cst_163 = arith.constant dense<0.000000e+00> : vector<2x64xf32>
    %183 = tpu.matmul %180, %182, %cst_163 {dimension_numbers = #tpu.dot_dimension_numbers<[1], [0], [0], [1], [0, 0, 1, 1], [], []>} : vector<2x64xbf16>, vector<64x64xbf16>, vector<2x64xf32> -> vector<2x64xf32>
    %184 = arith.addf %176, %183 : vector<2x64xf32>
    %c5_164 = arith.constant 5 : index
    %c0_165 = arith.constant 0 : index
    %c0_166 = arith.constant 0 : index
    %185 = vector.load %arg2[%c5_164, %c0_165, %c0_166] : memref<9x2x18xbf16, #tpu.memory_space<vmem>>, vector<1x2x18xbf16>
    %186 = vector.shape_cast %185 : vector<1x2x18xbf16> to vector<2x18xbf16>
    %cst_167 = arith.constant dense<0.000000e+00> : vector<2x64xf32>
    %187 = tpu.matmul %186, %143, %cst_167 {dimension_numbers = #tpu.dot_dimension_numbers<[1], [0], [0], [1], [0, 0, 1, 1], [], []>} : vector<2x18xbf16>, vector<18x64xbf16>, vector<2x64xf32> -> vector<2x64xf32>
    %188 = arith.truncf %187 : vector<2x64xf32> to vector<2x64xbf16>
    %c5_168 = arith.constant 5 : index
    %c0_169 = arith.constant 0 : index
    %c0_170 = arith.constant 0 : index
    %189 = vector.load %arg7[%c5_168, %c0_169, %c0_170] : memref<9x64x64xbf16, #tpu.memory_space<vmem>>, vector<1x64x64xbf16>
    %190 = vector.shape_cast %189 : vector<1x64x64xbf16> to vector<64x64xbf16>
    %cst_171 = arith.constant dense<0.000000e+00> : vector<2x64xf32>
    %191 = tpu.matmul %188, %190, %cst_171 {dimension_numbers = #tpu.dot_dimension_numbers<[1], [0], [0], [1], [0, 0, 1, 1], [], []>} : vector<2x64xbf16>, vector<64x64xbf16>, vector<2x64xf32> -> vector<2x64xf32>
    %192 = arith.addf %184, %191 : vector<2x64xf32>
    %c6_172 = arith.constant 6 : index
    %c0_173 = arith.constant 0 : index
    %c0_174 = arith.constant 0 : index
    %193 = vector.load %arg2[%c6_172, %c0_173, %c0_174] : memref<9x2x18xbf16, #tpu.memory_space<vmem>>, vector<1x2x18xbf16>
    %194 = vector.shape_cast %193 : vector<1x2x18xbf16> to vector<2x18xbf16>
    %cst_175 = arith.constant dense<0.000000e+00> : vector<2x64xf32>
    %195 = tpu.matmul %194, %143, %cst_175 {dimension_numbers = #tpu.dot_dimension_numbers<[1], [0], [0], [1], [0, 0, 1, 1], [], []>} : vector<2x18xbf16>, vector<18x64xbf16>, vector<2x64xf32> -> vector<2x64xf32>
    %196 = arith.truncf %195 : vector<2x64xf32> to vector<2x64xbf16>
    %c6_176 = arith.constant 6 : index
    %c0_177 = arith.constant 0 : index
    %c0_178 = arith.constant 0 : index
    %197 = vector.load %arg7[%c6_176, %c0_177, %c0_178] : memref<9x64x64xbf16, #tpu.memory_space<vmem>>, vector<1x64x64xbf16>
    %198 = vector.shape_cast %197 : vector<1x64x64xbf16> to vector<64x64xbf16>
    %cst_179 = arith.constant dense<0.000000e+00> : vector<2x64xf32>
    %199 = tpu.matmul %196, %198, %cst_179 {dimension_numbers = #tpu.dot_dimension_numbers<[1], [0], [0], [1], [0, 0, 1, 1], [], []>} : vector<2x64xbf16>, vector<64x64xbf16>, vector<2x64xf32> -> vector<2x64xf32>
    %200 = arith.addf %192, %199 : vector<2x64xf32>
    %c7_180 = arith.constant 7 : index
    %c0_181 = arith.constant 0 : index
    %c0_182 = arith.constant 0 : index
    %201 = vector.load %arg2[%c7_180, %c0_181, %c0_182] : memref<9x2x18xbf16, #tpu.memory_space<vmem>>, vector<1x2x18xbf16>
    %202 = vector.shape_cast %201 : vector<1x2x18xbf16> to vector<2x18xbf16>
    %cst_183 = arith.constant dense<0.000000e+00> : vector<2x64xf32>
    %203 = tpu.matmul %202, %143, %cst_183 {dimension_numbers = #tpu.dot_dimension_numbers<[1], [0], [0], [1], [0, 0, 1, 1], [], []>} : vector<2x18xbf16>, vector<18x64xbf16>, vector<2x64xf32> -> vector<2x64xf32>
    %204 = arith.truncf %203 : vector<2x64xf32> to vector<2x64xbf16>
    %c7_184 = arith.constant 7 : index
    %c0_185 = arith.constant 0 : index
    %c0_186 = arith.constant 0 : index
    %205 = vector.load %arg7[%c7_184, %c0_185, %c0_186] : memref<9x64x64xbf16, #tpu.memory_space<vmem>>, vector<1x64x64xbf16>
    %206 = vector.shape_cast %205 : vector<1x64x64xbf16> to vector<64x64xbf16>
    %cst_187 = arith.constant dense<0.000000e+00> : vector<2x64xf32>
    %207 = tpu.matmul %204, %206, %cst_187 {dimension_numbers = #tpu.dot_dimension_numbers<[1], [0], [0], [1], [0, 0, 1, 1], [], []>} : vector<2x64xbf16>, vector<64x64xbf16>, vector<2x64xf32> -> vector<2x64xf32>
    %208 = arith.addf %200, %207 : vector<2x64xf32>
    %c8_188 = arith.constant 8 : index
    %c0_189 = arith.constant 0 : index
    %c0_190 = arith.constant 0 : index
    %209 = vector.load %arg2[%c8_188, %c0_189, %c0_190] : memref<9x2x18xbf16, #tpu.memory_space<vmem>>, vector<1x2x18xbf16>
    %210 = vector.shape_cast %209 : vector<1x2x18xbf16> to vector<2x18xbf16>
    %cst_191 = arith.constant dense<0.000000e+00> : vector<2x64xf32>
    %211 = tpu.matmul %210, %143, %cst_191 {dimension_numbers = #tpu.dot_dimension_numbers<[1], [0], [0], [1], [0, 0, 1, 1], [], []>} : vector<2x18xbf16>, vector<18x64xbf16>, vector<2x64xf32> -> vector<2x64xf32>
    %212 = arith.truncf %211 : vector<2x64xf32> to vector<2x64xbf16>
    %c8_192 = arith.constant 8 : index
    %c0_193 = arith.constant 0 : index
    %c0_194 = arith.constant 0 : index
    %213 = vector.load %arg7[%c8_192, %c0_193, %c0_194] : memref<9x64x64xbf16, #tpu.memory_space<vmem>>, vector<1x64x64xbf16>
    %214 = vector.shape_cast %213 : vector<1x64x64xbf16> to vector<64x64xbf16>
    %cst_195 = arith.constant dense<0.000000e+00> : vector<2x64xf32>
    %215 = tpu.matmul %212, %214, %cst_195 {dimension_numbers = #tpu.dot_dimension_numbers<[1], [0], [0], [1], [0, 0, 1, 1], [], []>} : vector<2x64xbf16>, vector<64x64xbf16>, vector<2x64xf32> -> vector<2x64xf32>
    %216 = arith.addf %208, %215 : vector<2x64xf32>
    %c0_196 = arith.constant 0 : index
    %c0_197 = arith.constant 0 : index
    %217 = vector.load %arg8[%c0_196, %c0_197] : memref<1x64xf32, #tpu.memory_space<vmem>>, vector<1x64xf32>
    %218 = vector.broadcast %217 : vector<1x64xf32> to vector<2x64xf32>
    %219 = arith.addf %216, %218 : vector<2x64xf32>
    %cst_198 = arith.constant 0.000000e+00 : f32
    %220 = vector.broadcast %cst_198 : f32 to vector<2x64xf32>
    %221 = arith.maximumf %219, %220 : vector<2x64xf32>
    %222 = arith.truncf %221 : vector<2x64xf32> to vector<2x64xbf16>
    %c0_199 = arith.constant 0 : index
    %c0_200 = arith.constant 0 : index
    %223 = vector.load %arg9[%c0_199, %c0_200] : memref<64x512xbf16, #tpu.memory_space<vmem>>, vector<64x512xbf16>
    %cst_201 = arith.constant dense<0.000000e+00> : vector<2x512xf32>
    %224 = tpu.matmul %222, %223, %cst_201 {dimension_numbers = #tpu.dot_dimension_numbers<[1], [0], [0], [1], [0, 0, 1, 1], [], []>} : vector<2x64xbf16>, vector<64x512xbf16>, vector<2x512xf32> -> vector<2x512xf32>
    %c0_202 = arith.constant 0 : index
    %c0_203 = arith.constant 0 : index
    %225 = vector.load %arg10[%c0_202, %c0_203] : memref<1x512xf32, #tpu.memory_space<vmem>>, vector<1x512xf32>
    %226 = vector.broadcast %225 : vector<1x512xf32> to vector<2x512xf32>
    %227 = arith.addf %224, %226 : vector<2x512xf32>
    %cst_204 = arith.constant 0.000000e+00 : f32
    %228 = vector.broadcast %cst_204 : f32 to vector<2x512xf32>
    %229 = arith.maximumf %227, %228 : vector<2x512xf32>
    %230 = arith.truncf %229 : vector<2x512xf32> to vector<2x512xbf16>
    %c0_205 = arith.constant 0 : index
    %c0_206 = arith.constant 0 : index
    %231 = vector.load %arg11[%c0_205, %c0_206] : memref<512x512xbf16, #tpu.memory_space<vmem>>, vector<512x512xbf16>
    %cst_207 = arith.constant dense<0.000000e+00> : vector<2x512xf32>
    %232 = tpu.matmul %230, %231, %cst_207 {dimension_numbers = #tpu.dot_dimension_numbers<[1], [0], [0], [1], [0, 0, 1, 1], [], []>} : vector<2x512xbf16>, vector<512x512xbf16>, vector<2x512xf32> -> vector<2x512xf32>
    %c0_208 = arith.constant 0 : index
    %c0_209 = arith.constant 0 : index
    %233 = vector.load %arg12[%c0_208, %c0_209] : memref<1x512xf32, #tpu.memory_space<vmem>>, vector<1x512xf32>
    %234 = vector.broadcast %233 : vector<1x512xf32> to vector<2x512xf32>
    %235 = arith.addf %232, %234 : vector<2x512xf32>
    %c0_210 = arith.constant 0 : index
    %c0_211 = arith.constant 0 : index
    %236 = vector.load %arg13[%c0_210, %c0_211] : memref<2x512xf32, #tpu.memory_space<vmem>>, vector<2x512xf32>
    tpu.vector_store %arg13[%c0_210, %c0_211], %235 {strides = array<i32>} : memref<2x512xf32, #tpu.memory_space<vmem>>, vector<2x512xf32>,
    return
  }
}

</mosaic_0001>

<bundles_post_ra>
// kernel: network_forward.1
= control target key start
LH: loop header
LB: loop body
LE: loop exit
PB: predicated region body
PF: predicated region fallthrough
CT: control target
= control target key end

     0   :  { %vm545_vm0 = vcmask 261120   ;;  %vm6793_vm1 = vmmov 0   ;;  %vm2618_vm2 = vcmask 1040384   ;;  %vm2614_vm3 = vcmask 146432   ;;  %s8221_s3 = inlined_call_operand.vmem [shape: bf16[256,32], index: 3, kind: input, shape index: {}]   ;;  %s8222_s0 = inlined_call_operand.vmem [shape: bf16[128,256], index: 0, kind: input, shape index: {}]   ;;  %s8223_s1 = inlined_call_operand.vmem [shape: bf16[16,18,128], index: 1, kind: input, shape index: {}]   ;;  %s8224_s5 = inlined_call_operand.vmem [shape: bf16[16,32,64], index: 5, kind: input, shape index: {}]   ;;  %s8225_s4 = inlined_call_operand.vmem [shape: f32[1,32], index: 4, kind: input, shape index: {}]   ;;  %s8226_s7 = inlined_call_operand.vmem [shape: bf16[9,64,64], index: 7, kind: input, shape index: {}]   ;;  %s8227_s6 = inlined_call_operand.vmem [shape: f32[1,64], index: 6, kind: input, shape index: {}]   ;;  %s8228_s2 = inlined_call_operand.vmem [shape: bf16[9,2,18], index: 2, kind: input, shape index: {}]   ;;  %s8229_s9 = inlined_call_operand.vmem [shape: bf16[64,512], index: 9, kind: input, shape index: {}]   ;;  %s8230_s11 = inlined_call_operand.vmem [shape: bf16[512,512], index: 11, kind: input, shape index: {}]   ;;  %s8231_s8 = inlined_call_operand.vmem [shape: f32[1,64], index: 8, kind: input, shape index: {}]   ;;  %s8232_s10 = inlined_call_operand.vmem [shape: f32[1,512], index: 10, kind: input, shape index: {}]   ;;  %s8233_s12 = inlined_call_operand.vmem [shape: f32[1,512], index: 12, kind: input, shape index: {}]   ;;  %s8234_s13 = inlined_call_operand.vmem [shape: f32[2,512], index: 13, kind: output, shape index: {}]  }
   0x1   :  { %v6436_v0 = vld [vmem:[%s8221_s3 + $0x40] sm:$0xff]   ;;  %v6438_v2 = vld [vmem:[%s8221_s3 + $0x48] sm:$0xff]   ;;  %v6440_v4 = vld [vmem:[%s8221_s3 + $0x50] sm:$0xff]   ;;  %vm2750_vm4 = vcmask 523264  }
   0x2   :  { %v6437_v1 = vld [vmem:[%s8221_s3] sm:$0xff]   ;;  %5432 = vmatprep.subr.bf16.mxu0 %v6436_v0  ;;  %v6439_v3 = vld [vmem:[%s8221_s3 + $0x8] sm:$0xff]   ;;  %v6441_v5 = vld [vmem:[%s8221_s3 + $0x10] sm:$0xff]  }
   0x3   :  { %5433 = vmatpush3.bf16.msra.mxu0 %v6437_v1  ;;  %v6442_v6 = vld [vmem:[%s8221_s3 + $0x58] sm:$0xff]   ;;  %v6444_v8 = vld [vmem:[%s8221_s3 + $0x60] sm:$0xff]   ;;  %v6446_v10 = vld [vmem:[%s8221_s3 + $0x68] sm:$0xff]  }
   0x4   :  { %5434 = vmatprep.subr.bf16.mxu0 %v6438_v2  ;;  %v6443_v7 = vld [vmem:[%s8221_s3 + $0x18] sm:$0xff]   ;;  %v6445_v9 = vld [vmem:[%s8221_s3 + $0x20] sm:$0xff]   ;;  %v6447_v12 = vld [vmem:[%s8221_s3 + $0x28] sm:$0xff]  }
   0x5   :  { %v6454_v11 = vld [vmem:[%s8222_s0 + $0x4] ss:$8 sps:$4 sm:$0xff]   ;;  %v6448_v13 = vld [vmem:[%s8221_s3 + $0x70] sm:$0xff]   ;;  %v6450_v15 = vld [vmem:[%s8221_s3 + $0x78] sm:$0xff]  }
   0x6   :  { %308 = vmatprep.mubr.bf16.mxu0 %v6454_v11  ;;  %v6449_v14 = vld [vmem:[%s8221_s3 + $0x30] sm:$0xff]   ;;  %v6451_v16 = vld [vmem:[%s8221_s3 + $0x38] sm:$0xff]   ;;  %v6452_v17 = vld [vmem:[%s8222_s0] ss:$8 sps:$4 sm:$0xff]  }
   0x7   :  { %5435 = vmatpush3.bf16.msra.mxu0 %v6439_v3  ;;  %v6455_v18 = vld [vmem:[%s8222_s0 + $0x14] ss:$8 sps:$4 sm:$0xff]   ;;  %v6457_v19 = vld [vmem:[%s8222_s0 + $0x10] ss:$8 sps:$4 sm:$0xff]   ;;  %v6458_v20 = vld [vmem:[%s8222_s0 + $0x24] ss:$8 sps:$4 sm:$0xff]  }
   0x8   :  { %5436 = vmatprep.subr.bf16.mxu0 %v6440_v4  ;;  %v6460_v21 = vld [vmem:[%s8222_s0 + $0x20] ss:$8 sps:$4 sm:$0xff]   ;;  %v6461_v22 = vld [vmem:[%s8222_s0 + $0x34] ss:$8 sps:$4 sm:$0xff]   ;;  %v6463_v23 = vld [vmem:[%s8222_s0 + $0x30] ss:$8 sps:$4 sm:$0xff]  }
   0x9   :  { %v6464_v24 = vld [vmem:[%s8222_s0 + $0x44] ss:$8 sps:$4 sm:$0xff]   ;;  %v6466_v25 = vld [vmem:[%s8222_s0 + $0x40] ss:$8 sps:$4 sm:$0xff]   ;;  %v6467_v26 = vld [vmem:[%s8222_s0 + $0x54] ss:$8 sps:$4 sm:$0xff]  }
   0xa   :  { %v6469_v27 = vld [vmem:[%s8222_s0 + $0x50] ss:$8 sps:$4 sm:$0xff]   ;;  %v6470_v28 = vld [vmem:[%s8222_s0 + $0x64] ss:$8 sps:$4 sm:$0xff]   ;;  %v6472_v29 = vld [vmem:[%s8222_s0 + $0x60] ss:$8 sps:$4 sm:$0xff]  }
   0xb   :  { %5437 = vmatpush3.bf16.msra.mxu0 %v6441_v5  ;;  %v6473_v30 = vld [vmem:[%s8222_s0 + $0x74] ss:$8 sps:$4 sm:$0xff]   ;;  %v6475_v31 = vld [vmem:[%s8222_s0 + $0x70] ss:$8 sps:$4 sm:$0xff]   ;;  %v6476_v32 = vld [vmem:[%s8223_s1] sm:$0xff]  }
   0xc   :  { %5438 = vmatprep.subr.bf16.mxu0 %v6442_v6  ;;  %v6478_v33 = vld [vmem:[%s8223_s1 + $0x18] sm:$0xff]   ;;  %5808 = vmatprep.mubr.bf16.mxu1 %v6476_v32  ;;  %v6971_v35 = vld [vmem:[%s8225_s4] ss:$0 sm:$0xff] }
   0xf   :  { %5439 = vmatpush3.bf16.msra.mxu0 %v6443_v7 }
  0x10   :  { %5440 = vmatprep.subr.bf16.mxu0 %v6444_v8 }
  0x13   :  { %5441 = vmatpush3.bf16.msra.mxu0 %v6445_v9 }
  0x14   :  { %5442 = vmatprep.subr.bf16.mxu0 %v6446_v10 }
  0x17   :  { %5443 = vmatpush3.bf16.msra.mxu0 %v6447_v12 }
  0x18   :  { %5444 = vmatprep.subr.bf16.mxu0 %v6448_v13 }
  0x1b   :  { %5445 = vmatpush3.bf16.msra.mxu0 %v6449_v14 }
  0x1c   :  { %5446 = vmatprep.subr.bf16.mxu0 %v6450_v15 }
  0x1f   :  { %5447 = vmatpush3.bf16.msra.mxu0 %v6451_v16 }
  0x22   :  { %309 = vmatmul.mubr.bf16.vlgmr.msra.gmra.mrb[0].mxu0 %v6452_v17 }
  0x23   :  { %316 = vmatprep.mubr.bf16.mxu0 %v6455_v18 }
  0x2a   :  { %317 = vmatmul.mubr.bf16.gmra.mrb[4].mxu0 %v6457_v19 }
  0x2b   :  { %324 = vmatprep.mubr.bf16.mxu0 %v6458_v20 }
  0x32   :  { %325 = vmatmul.mubr.bf16.gmra.mrb[8].mxu0 %v6460_v21 }
  0x33   :  { %332 = vmatprep.mubr.bf16.mxu0 %v6461_v22 }
  0x3a   :  { %333 = vmatmul.mubr.bf16.gmra.mrb[12].mxu0 %v6463_v23 }
  0x3b   :  { %340 = vmatprep.mubr.bf16.mxu0 %v6464_v24 }
  0x42   :  { %341 = vmatmul.mubr.bf16.gmra.mrb[16].mxu0 %v6466_v25 }
  0x43   :  { %348 = vmatprep.mubr.bf16.mxu0 %v6467_v26 }
  0x4a   :  { %349 = vmatmul.mubr.bf16.gmra.mrb[20].mxu0 %v6469_v27 }
  0x4b   :  { %356 = vmatprep.mubr.bf16.mxu0 %v6470_v28 }
  0x52   :  { %357 = vmatmul.mubr.bf16.gmra.mrb[24].mxu0 %v6472_v29 }
  0x53   :  { %364 = vmatprep.mubr.bf16.mxu0 %v6473_v30 }
  0x5a   :  { %365 = vmatmul.mubr.bf16.gmra.mrb[28].mxu0 %v6475_v31 }
  0x5b   :  { %5864 = vmatprep.mubr.bf16.mxu0 %v6478_v33 }
  0xf5   :  { %v5448_v34 = vpop.f32.mrb[0].mxu0 }
  0xf6   :  { %v5449_v36 = vpop.f32.mrb[1].mxu0 }
  0xf7   :  { %v5450_v37 = vadd.f32 %v5449_v36, %v5448_v34  ;;  %v5451_v38 = vpop.f32.mrb[2].mxu0 }
  0xf8   :  { %v5452_v39 = vpop.f32.mrb[3].mxu0 }
  0xf9   :  { %v311_v40 = vadd.f32 %v5450_v37, %v6971_v35  ;;  %v5453_v41 = vadd.f32 %v5452_v39, %v5451_v38 }
  0xfb   :  { %v314_v42 = vadd.f32 %v5453_v41, %v6971_v35  ;;  %v373_v43 = vmax.f32 %v311_v40, 0.0 }
  0xfd   :  { %v374_v44 = vmax.f32 %v314_v42, 0.0  ;;  %v5454_v45 = vpop.f32.mrb[4].mxu0 }
  0xfe   :  { %v5455_v46 = vpop.f32.mrb[5].mxu0 }
  0xff   :  { %v6975_v47 = vpack.c.bf16 %v374_v44, %v373_v43  ;;  %v5456_v48 = vadd.f32 %v5455_v46, %v5454_v45  ;;  %v5457_v49 = vpop.f32.mrb[6].mxu0 }
 0x100   :  { %v5458_v50 = vpop.f32.mrb[7].mxu0 }
 0x101   :  { %v319_v51 = vadd.f32 %v5456_v48, %v6971_v35  ;;  %v5459_v52 = vadd.f32 %v5458_v50, %v5457_v49  ;;  %5792 = vmatprep.subr.bf16.mxu1 %v6975_v47  ;;  %5848 = vmatprep.subr.bf16.mxu0 %v6975_v47 }
 0x102   :  { %5793 = vmatpush3.bf16.msra.mxu1 %v6975_v47  ;;  %5849 = vmatpush3.bf16.msra.mxu0 %v6975_v47 }
 0x103   :  { %v322_v53 = vadd.f32 %v5459_v52, %v6971_v35  ;;  %v375_v54 = vmax.f32 %v319_v51, 0.0 }
 0x105   :  { %v376_v55 = vmax.f32 %v322_v53, 0.0  ;;  %v5460_v56 = vpop.f32.mrb[8].mxu0 }
 0x106   :  { %v5461_v57 = vpop.f32.mrb[9].mxu0 }
 0x107   :  { %v6983_v58 = vpack.c.bf16 %v376_v55, %v375_v54  ;;  %v5462_v59 = vadd.f32 %v5461_v57, %v5460_v56  ;;  %v5463_v60 = vpop.f32.mrb[10].mxu0 }
 0x108   :  { %v5464_v61 = vpop.f32.mrb[11].mxu0 }
 0x109   :  { %v327_v62 = vadd.f32 %v5462_v59, %v6971_v35  ;;  %v5465_v63 = vadd.f32 %v5464_v61, %v5463_v60  ;;  %5794 = vmatprep.subr.bf16.mxu1 %v6983_v58  ;;  %5850 = vmatprep.subr.bf16.mxu0 %v6983_v58 }
 0x10a   :  { %5795 = vmatpush3.bf16.msra.mxu1 %v6983_v58  ;;  %5851 = vmatpush3.bf16.msra.mxu0 %v6983_v58 }
 0x10b   :  { %v330_v0 = vadd.f32 %v5465_v63, %v6971_v35  ;;  %v377_v1 = vmax.f32 %v327_v62, 0.0  ;;  %v6479_v62 = vld [vmem:[%s8224_s5 + $0x30] sm:$0xff]   ;;  %v6477_v63 = vld [vmem:[%s8223_s1 + $0x8] ss:$0 sps:$4 sm:$0x11]  }
 0x10d   :  { %v378_v2 = vmax.f32 %v330_v0, 0.0  ;;  %v5466_v3 = vpop.f32.mrb[12].mxu0  ;;  %v6481_v0 = vld [vmem:[%s8224_s5 + $0x38] sm:$0xff]  }
 0x10e   :  { %v5467_v4 = vpop.f32.mrb[13].mxu0 }
 0x10f   :  { %v6991_v5 = vpack.c.bf16 %v378_v2, %v377_v1  ;;  %v5468_v6 = vadd.f32 %v5467_v4, %v5466_v3  ;;  %v5469_v7 = vpop.f32.mrb[14].mxu0  ;;  %v6482_v1 = vld [vmem:[%s8223_s1 + $0xc] sm:$0xff]   ;;  %v6483_v2 = vld [vmem:[%s8223_s1 + $0x14] ss:$0 sps:$4 sm:$0x11]   ;;  %v6485_v4 = vld [vmem:[%s8224_s5 + $0x18] sm:$0xff]  }
 0x110   :  { %v5470_v8 = vpop.f32.mrb[15].mxu0  ;;  %v6484_v3 = vld [vmem:[%s8224_s5 + $0x10] sm:$0xff]  }
 0x111   :  { %v335_v9 = vadd.f32 %v5468_v6, %v6971_v35  ;;  %v5471_v10 = vadd.f32 %v5470_v8, %v5469_v7  ;;  %5796 = vmatprep.subr.bf16.mxu1 %v6991_v5  ;;  %5852 = vmatprep.subr.bf16.mxu0 %v6991_v5  ;;  %v6486_v6 = vld [vmem:[%s8224_s5] sm:$0xff]  }
 0x112   :  { %5797 = vmatpush3.bf16.msra.mxu1 %v6991_v5  ;;  %5853 = vmatpush3.bf16.msra.mxu0 %v6991_v5 }
 0x113   :  { %v338_v11 = vadd.f32 %v5471_v10, %v6971_v35  ;;  %v379_v12 = vmax.f32 %v335_v9, 0.0 }
 0x115   :  { %v380_v13 = vmax.f32 %v338_v11, 0.0  ;;  %v5472_v14 = vpop.f32.mrb[16].mxu0 }
 0x116   :  { %v5473_v15 = vpop.f32.mrb[17].mxu0 }
 0x117   :  { %v6999_v16 = vpack.c.bf16 %v380_v13, %v379_v12  ;;  %v5474_v17 = vadd.f32 %v5473_v15, %v5472_v14  ;;  %v5475_v18 = vpop.f32.mrb[18].mxu0 }
 0x118   :  { %v5476_v19 = vpop.f32.mrb[19].mxu0 }
 0x119   :  { %v343_v20 = vadd.f32 %v5474_v17, %v6971_v35  ;;  %v5477_v21 = vadd.f32 %v5476_v19, %v5475_v18  ;;  %5798 = vmatprep.subr.bf16.mxu1 %v6999_v16  ;;  %5854 = vmatprep.subr.bf16.mxu0 %v6999_v16 }
 0x11a   :  { %5799 = vmatpush3.bf16.msra.mxu1 %v6999_v16  ;;  %5855 = vmatpush3.bf16.msra.mxu0 %v6999_v16 }
 0x11b   :  { %v346_v22 = vadd.f32 %v5477_v21, %v6971_v35  ;;  %v381_v23 = vmax.f32 %v343_v20, 0.0 }
 0x11d   :  { %v382_v24 = vmax.f32 %v346_v22, 0.0  ;;  %v5478_v25 = vpop.f32.mrb[20].mxu0 }
 0x11e   :  { %v5479_v26 = vpop.f32.mrb[21].mxu0 }
 0x11f   :  { %v7007_v27 = vpack.c.bf16 %v382_v24, %v381_v23  ;;  %v5480_v28 = vadd.f32 %v5479_v26, %v5478_v25  ;;  %v5481_v29 = vpop.f32.mrb[22].mxu0  ;;  %v6487_v24 = vld [vmem:[%s8224_s5 + $0x8] sm:$0xff]   ;;  %v6488_v25 = vld [vmem:[%s8224_s5 + $0x20] sm:$0xff]  }
 0x120   :  { %v5482_v30 = vpop.f32.mrb[23].mxu0 }
 0x121   :  { %v351_v31 = vadd.f32 %v5480_v28, %v6971_v35  ;;  %v5483_v32 = vadd.f32 %v5482_v30, %v5481_v29  ;;  %5800 = vmatprep.subr.bf16.mxu1 %v7007_v27  ;;  %5856 = vmatprep.subr.bf16.mxu0 %v7007_v27  ;;  %v6489_v28 = vld [vmem:[%s8224_s5 + $0x28] sm:$0xff]  }
 0x122   :  { %5801 = vmatpush3.bf16.msra.mxu1 %v7007_v27  ;;  %5857 = vmatpush3.bf16.msra.mxu0 %v7007_v27  ;;  %v6490_v29 = vld [vmem:[%s8223_s1 + $0x24] sm:$0xff]  }
 0x123   :  { %v354_v33 = vadd.f32 %v5483_v32, %v6971_v35  ;;  %v383_v34 = vmax.f32 %v351_v31, 0.0  ;;  %v6492_v31 = vld [vmem:[%s8224_s5 + $0x40] sm:$0xff]   ;;  %v6491_v32 = vld [vmem:[%s8223_s1 + $0x2c] ss:$0 sps:$4 sm:$0x11]  }
 0x125   :  { %v384_v36 = vmax.f32 %v354_v33, 0.0  ;;  %v5484_v37 = vpop.f32.mrb[24].mxu0  ;;  %v6493_v33 = vld [vmem:[%s8224_s5 + $0x48] sm:$0xff]  }
 0x126   :  { %v5485_v38 = vpop.f32.mrb[25].mxu0 }
 0x127   :  { %v7015_v39 = vpack.c.bf16 %v384_v36, %v383_v34  ;;  %v5486_v40 = vadd.f32 %v5485_v38, %v5484_v37  ;;  %v5487_v41 = vpop.f32.mrb[26].mxu0 }
 0x128   :  { %v5488_v42 = vpop.f32.mrb[27].mxu0 }
 0x129   :  { %v359_v43 = vadd.f32 %v5486_v40, %v6971_v35  ;;  %v5489_v44 = vadd.f32 %v5488_v42, %v5487_v41  ;;  %5802 = vmatprep.subr.bf16.mxu1 %v7015_v39  ;;  %5858 = vmatprep.subr.bf16.mxu0 %v7015_v39 }
 0x12a   :  { %5803 = vmatpush3.bf16.msra.mxu1 %v7015_v39  ;;  %5859 = vmatpush3.bf16.msra.mxu0 %v7015_v39 }
 0x12b   :  { %v362_v45 = vadd.f32 %v5489_v44, %v6971_v35  ;;  %v385_v46 = vmax.f32 %v359_v43, 0.0 }
 0x12d   :  { %v386_v48 = vmax.f32 %v362_v45, 0.0  ;;  %v5490_v49 = vpop.f32.mrb[28].mxu0 }
 0x12e   :  { %v5491_v50 = vpop.f32.mrb[29].mxu0 }
 0x12f   :  { %v7023_v51 = vpack.c.bf16 %v386_v48, %v385_v46  ;;  %v5492_v52 = vadd.f32 %v5491_v50, %v5490_v49  ;;  %v5493_v53 = vpop.f32.mrb[30].mxu0 }
 0x130   :  { %v5494_v54 = vpop.f32.mrb[31].mxu0 }
 0x131   :  { %v367_v55 = vadd.f32 %v5492_v52, %v6971_v35  ;;  %v5495_v56 = vadd.f32 %v5494_v54, %v5493_v53  ;;  %5804 = vmatprep.subr.bf16.mxu1 %v7023_v51  ;;  %5860 = vmatprep.subr.bf16.mxu0 %v7023_v51 }
 0x132   :  { %5805 = vmatpush3.bf16.msra.mxu1 %v7023_v51  ;;  %5861 = vmatpush3.bf16.msra.mxu0 %v7023_v51 }
 0x133   :  { %v370_v57 = vadd.f32 %v5495_v56, %v6971_v35  ;;  %v387_v59 = vmax.f32 %v367_v55, 0.0  ;;  %v6480_v35 = vld [vmem:[%s8223_s1 + $0x20] ss:$0 sps:$4 sm:$0x11]  }
 0x135   :  { %v388_v60 = vmax.f32 %v370_v57, 0.0 }
 0x137   :  { %v7031_v61 = vpack.c.bf16 %v388_v60, %v387_v59 }
 0x139   :  { %5806 = vmatprep.subr.bf16.mxu1 %v7031_v61  ;;  %5862 = vmatprep.subr.bf16.mxu0 %v7031_v61 }
 0x13a   :  { %5807 = vmatpush3.bf16.msra.mxu1 %v7031_v61  ;;  %5863 = vmatpush3.bf16.msra.mxu0 %v7031_v61 }
 0x13b   :  { %5812 = vmatprep.subr.bf16.mxu1 %v6975_v47  ;;  %5896 = vmatprep.subr.bf16.mxu0 %v6479_v62 }
 0x13d   :  { %5809 = vmatmul.mubr.bf16.vlgmr.msra.gmra.mrb[0].mxu1 %v6477_v63  ;;  %5865 = vmatmul.mubr.bf16.vlgmr.msra.gmra.mrb[32].mxu0 %v6480_v35  ;;  %v6494_v63 = vld [vmem:[%s8223_s1 + $0x30] sm:$0xff]  }
 0x13e   :  { %5813 = vmatpush3.bf16.msra.mxu1 %v6975_v47  ;;  %5897 = vmatpush3.bf16.msra.mxu0 %v6479_v62 }
 0x13f   :  { %5814 = vmatprep.subr.bf16.mxu1 %v6983_v58  ;;  %5898 = vmatprep.subr.bf16.mxu0 %v6481_v0 }
 0x140   :  { %5828 = vmatprep.mubr.bf16.mxu1 %v6482_v1  ;;  %v6495_v1 = vld [vmem:[%s8223_s1 + $0x38] ss:$0 sps:$4 sm:$0x11]  }
 0x142   :  { %5815 = vmatpush3.bf16.msra.mxu1 %v6983_v58  ;;  %5899 = vmatpush3.bf16.msra.mxu0 %v6481_v0  ;;  %v6496_v0 = vld [vmem:[%s8224_s5 + $0x50] sm:$0xff]  }
 0x143   :  { %5816 = vmatprep.subr.bf16.mxu1 %v6991_v5  ;;  %5904 = vmatprep.subr.bf16.mxu0 %v6975_v47 }
 0x146   :  { %5817 = vmatpush3.bf16.msra.mxu1 %v6991_v5 }
 0x147   :  { %5818 = vmatprep.subr.bf16.mxu1 %v6999_v16 }
 0x14a   :  { %5819 = vmatpush3.bf16.msra.mxu1 %v6999_v16 }
 0x14b   :  { %5820 = vmatprep.subr.bf16.mxu1 %v7007_v27 }
 0x14e   :  { %5821 = vmatpush3.bf16.msra.mxu1 %v7007_v27 }
 0x14f   :  { %5822 = vmatprep.subr.bf16.mxu1 %v7015_v39 }
 0x152   :  { %5823 = vmatpush3.bf16.msra.mxu1 %v7015_v39 }
 0x153   :  { %5824 = vmatprep.subr.bf16.mxu1 %v7023_v51 }
 0x156   :  { %5825 = vmatpush3.bf16.msra.mxu1 %v7023_v51 }
 0x157   :  { %5826 = vmatprep.subr.bf16.mxu1 %v7031_v61 }
 0x15a   :  { %5827 = vmatpush3.bf16.msra.mxu1 %v7031_v61 }
 0x15b   :  { %5832 = vmatprep.subr.bf16.mxu1 %v6484_v3 }
 0x15d   :  { %5829 = vmatmul.mubr.bf16.vlgmr.msra.gmra.mrb[4].mxu1 %v6483_v2  ;;  %v6497_v2 = vld [vmem:[%s8224_s5 + $0x58] sm:$0xff]  }
 0x15e   :  { %5833 = vmatpush3.bf16.msra.mxu1 %v6484_v3 }
 0x15f   :  { %5834 = vmatprep.subr.bf16.mxu1 %v6485_v4 }
 0x162   :  { %5835 = vmatpush3.bf16.msra.mxu1 %v6485_v4 }
 0x163   :  { %5840 = vmatprep.subr.bf16.mxu1 %v6486_v6 }
 0x210   :  { %v5810_v7 = vpop.f32.mrb[0].mxu1  ;;  %v5866_v8 = vpop.f32.mrb[32].mxu0 }
 0x211   :  { %v444_v9 = vpop.f32.mrb[1].mxu1  ;;  %v714_v10 = vpop.f32.mrb[33].mxu0  ;;  %v459_v26 = vpack.c.bf16 %v5810_v7, %v5810_v7  ;;  %v729_v30 = vpack.c.bf16 %v5866_v8, %v5866_v8 }
 0x212   :  { %v5811_v11 = vpop.f32.mrb[2].mxu1  ;;  %v5867_v12 = vpop.f32.mrb[34].mxu0 }
 0x213   :  { %v447_v13 = vpop.f32.mrb[3].mxu1  ;;  %v717_v14 = vpop.f32.mrb[35].mxu0 }
 0x214   :  { %v458_v15 = vpack.c.bf16 %v447_v13, %v444_v9  ;;  %v728_v17 = vpack.c.bf16 %v717_v14, %v714_v10 }
 0x230   :  { %v5830_v18 = vpop.f32.mrb[4].mxu1 }
 0x231   :  { %v512_v19 = vpop.f32.mrb[5].mxu1  ;;  %v527_v23 = vpack.c.bf16 %v5830_v18, %v5830_v18 }
 0x232   :  { %v5831_v20 = vpop.f32.mrb[6].mxu1 }
 0x233   :  { %v515_v21 = vpop.f32.mrb[7].mxu1  ;;  %v6499_v20 = vld [vmem:[%s8223_s1 + $0x44] ss:$0 sps:$4 sm:$0x11]  }
 0x234   :  { %v526_v22 = vpack.c.bf16 %v515_v21, %v512_v19  ;;  %v6500_v19 = vld [vmem:[%s8224_s5 + $0x60] sm:$0xff]   ;;  %v6501_v21 = vld [vmem:[%s8224_s5 + $0x68] sm:$0xff]  }
 0x236   :  { %5836 = vmatprep.mubr.msk.bf16.mxu1 %vm545_vm0, %v526_v22 }
 0x237   :  { %5837 = vmatmul.mubr.msk.bf16.vlgmr.msra.gmra.mrb[8].mxu1 %vm545_vm0, %v527_v23 }
 0x238   :  { %5841 = vmatpush3.bf16.msra.mxu1 %v6486_v6  ;;  %5844 = vmatprep.mubr.msk.bf16.mxu1 %vm545_vm0, %v458_v15 }
 0x239   :  { %5842 = vmatprep.subr.bf16.mxu1 %v6487_v24 }
 0x23c   :  { %5843 = vmatpush3.bf16.msra.mxu1 %v6487_v24 }
 0x23d   :  { %5868 = vmatprep.subr.bf16.mxu1 %v6488_v25 }
 0x23f   :  { %5845 = vmatmul.mubr.msk.bf16.vlgmr.msra.gmra.mrb[12].mxu1 %vm545_vm0, %v459_v26 }
 0x240   :  { %5869 = vmatpush3.bf16.msra.mxu1 %v6488_v25  ;;  %5872 = vmatprep.mubr.msk.bf16.mxu1 %vm545_vm0, %v728_v17  ;;  %v6498_v17 = vld [vmem:[%s8223_s1 + $0x3c] sm:$0xff]  }
 0x241   :  { %5870 = vmatprep.subr.bf16.mxu1 %v6489_v28 }
 0x244   :  { %5871 = vmatpush3.bf16.msra.mxu1 %v6489_v28 }
 0x245   :  { %5876 = vmatprep.subr.bf16.mxu1 %v6975_v47 }
 0x247   :  { %5873 = vmatmul.mubr.msk.bf16.vlgmr.msra.gmra.mrb[16].mxu1 %vm545_vm0, %v729_v30 }
 0x248   :  { %5877 = vmatpush3.bf16.msra.mxu1 %v6975_v47  ;;  %5892 = vmatprep.mubr.bf16.mxu1 %v6490_v29 }
 0x249   :  { %5878 = vmatprep.subr.bf16.mxu1 %v6983_v58 }
 0x24c   :  { %5879 = vmatpush3.bf16.msra.mxu1 %v6983_v58 }
 0x24d   :  { %5880 = vmatprep.subr.bf16.mxu1 %v6991_v5 }
 0x250   :  { %5881 = vmatpush3.bf16.msra.mxu1 %v6991_v5 }
 0x251   :  { %5882 = vmatprep.subr.bf16.mxu1 %v6999_v16 }
 0x254   :  { %5883 = vmatpush3.bf16.msra.mxu1 %v6999_v16 }
 0x255   :  { %5884 = vmatprep.subr.bf16.mxu1 %v7007_v27 }
 0x258   :  { %5885 = vmatpush3.bf16.msra.mxu1 %v7007_v27 }
 0x259   :  { %5886 = vmatprep.subr.bf16.mxu1 %v7015_v39 }
 0x25c   :  { %5887 = vmatpush3.bf16.msra.mxu1 %v7015_v39 }
 0x25d   :  { %5888 = vmatprep.subr.bf16.mxu1 %v7023_v51 }
 0x260   :  { %5889 = vmatpush3.bf16.msra.mxu1 %v7023_v51 }
 0x261   :  { %5890 = vmatprep.subr.bf16.mxu1 %v7031_v61 }
 0x264   :  { %5891 = vmatpush3.bf16.msra.mxu1 %v7031_v61 }
 0x265   :  { %5924 = vmatprep.subr.bf16.mxu1 %v6492_v31 }
 0x267   :  { %5893 = vmatmul.mubr.bf16.vlgmr.msra.gmra.mrb[20].mxu1 %v6491_v32 }
 0x268   :  { %5925 = vmatpush3.bf16.msra.mxu1 %v6492_v31 }
 0x269   :  { %5926 = vmatprep.subr.bf16.mxu1 %v6493_v33 }
 0x26c   :  { %5927 = vmatpush3.bf16.msra.mxu1 %v6493_v33 }
 0x26d   :  { %5932 = vmatprep.subr.bf16.mxu1 %v6975_v47 }
 0x30a   :  { %v5838_v34 = vpop.f32.mrb[8].mxu1 }
 0x30b   :  { %v586_v36 = vpop.f32.mrb[9].mxu1 }
 0x30c   :  { %v5839_v37 = vpop.f32.mrb[10].mxu1 }
 0x30d   :  { %v589_v38 = vpop.f32.mrb[11].mxu1 }
 0x312   :  { %v5846_v40 = vpop.f32.mrb[12].mxu1 }
 0x313   :  { %v661_v41 = vadd.f32 %v5846_v40, %v5838_v34  ;;  %v652_v42 = vpop.f32.mrb[13].mxu1  ;;  %v6503_v40 = vld [vmem:[%s8223_s1 + $0x50] ss:$0 sps:$4 sm:$0x11]  }
 0x314   :  { %v653_v43 = vadd.f32 %v652_v42, %v586_v36  ;;  %v5847_v44 = vpop.f32.mrb[14].mxu1  ;;  %v6502_v36 = vld [vmem:[%s8223_s1 + $0x48] sm:$0xff]  }
 0x315   :  { %v655_v45 = vpop.f32.mrb[15].mxu1 }
 0x316   :  { %v656_v46 = vadd.f32 %v655_v45, %v589_v38  ;;  %v6504_v38 = vld [vmem:[%s8224_s5 + $0x70] sm:$0xff]  }
 0x31a   :  { %v5874_v48 = vpop.f32.mrb[16].mxu1 }
 0x31b   :  { %v803_v49 = vadd.f32 %v5874_v48, %v661_v41  ;;  %v787_v50 = vpop.f32.mrb[17].mxu1  ;;  %v6505_v41 = vld [vmem:[%s8224_s5 + $0x78] sm:$0xff]  }
 0x31c   :  { %v801_v52 = vadd.f32 %v787_v50, %v653_v43  ;;  %v5875_v53 = vpop.f32.mrb[18].mxu1 }
 0x31d   :  { %v790_v54 = vpop.f32.mrb[19].mxu1 }
 0x31e   :  { %v802_v55 = vadd.f32 %v790_v54, %v656_v46 }
 0x33a   :  { %v5894_v56 = vpop.f32.mrb[20].mxu1 }
 0x33b   :  { %v852_v57 = vpop.f32.mrb[21].mxu1  ;;  %v867_v35 = vpack.c.bf16 %v5894_v56, %v5894_v56  ;;  %v6506_v56 = vld [vmem:[%s8223_s1 + $0x54] sm:$0xff]  }
 0x33c   :  { %v5895_v59 = vpop.f32.mrb[22].mxu1 }
 0x33d   :  { %v855_v60 = vpop.f32.mrb[23].mxu1  ;;  %v6508_v59 = vld [vmem:[%s8224_s5 + $0x80] sm:$0xff]  }
 0x33e   :  { %v866_v62 = vpack.c.bf16 %v855_v60, %v852_v57  ;;  %v6507_v60 = vld [vmem:[%s8223_s1 + $0x5c] ss:$0 sps:$4 sm:$0x11]  }
 0x340   :  { %5900 = vmatprep.mubr.msk.bf16.mxu0 %vm545_vm0, %v866_v62  ;;  %v6509_v62 = vld [vmem:[%s8224_s5 + $0x88] sm:$0xff]  }
 0x341   :  { %5901 = vmatmul.mubr.msk.bf16.vlgmr.msra.gmra.mrb[36].mxu0 %vm545_vm0, %v867_v35 }
 0x342   :  { %5905 = vmatpush3.bf16.msra.mxu0 %v6975_v47  ;;  %5920 = vmatprep.mubr.bf16.mxu0 %v6494_v63 }
 0x343   :  { %5906 = vmatprep.subr.bf16.mxu0 %v6983_v58 }
 0x346   :  { %5907 = vmatpush3.bf16.msra.mxu0 %v6983_v58 }
 0x347   :  { %5908 = vmatprep.subr.bf16.mxu0 %v6991_v5 }
 0x34a   :  { %5909 = vmatpush3.bf16.msra.mxu0 %v6991_v5 }
 0x34b   :  { %5910 = vmatprep.subr.bf16.mxu0 %v6999_v16 }
 0x34e   :  { %5911 = vmatpush3.bf16.msra.mxu0 %v6999_v16 }
 0x34f   :  { %5912 = vmatprep.subr.bf16.mxu0 %v7007_v27 }
 0x352   :  { %5913 = vmatpush3.bf16.msra.mxu0 %v7007_v27 }
 0x353   :  { %5914 = vmatprep.subr.bf16.mxu0 %v7015_v39 }
 0x356   :  { %5915 = vmatpush3.bf16.msra.mxu0 %v7015_v39 }
 0x357   :  { %5916 = vmatprep.subr.bf16.mxu0 %v7023_v51 }
 0x35a   :  { %5917 = vmatpush3.bf16.msra.mxu0 %v7023_v51 }
 0x35b   :  { %5918 = vmatprep.subr.bf16.mxu0 %v7031_v61 }
 0x35e   :  { %5919 = vmatpush3.bf16.msra.mxu0 %v7031_v61 }
 0x35f   :  { %5952 = vmatprep.subr.bf16.mxu0 %v6496_v0 }
 0x361   :  { %5921 = vmatmul.mubr.bf16.vlgmr.msra.gmra.mrb[40].mxu0 %v6495_v1 }
 0x362   :  { %5953 = vmatpush3.bf16.msra.mxu0 %v6496_v0 }
 0x363   :  { %5954 = vmatprep.subr.bf16.mxu0 %v6497_v2 }
 0x366   :  { %5955 = vmatpush3.bf16.msra.mxu0 %v6497_v2 }
 0x367   :  { %5960 = vmatprep.subr.bf16.mxu0 %v6975_v47 }
 0x414   :  { %v5902_v3 = vpop.f32.mrb[36].mxu0 }
 0x415   :  { %v941_v4 = vadd.f32 %v5902_v3, %v803_v49  ;;  %v925_v6 = vpop.f32.mrb[37].mxu0 }
 0x416   :  { %v939_v7 = vadd.f32 %v925_v6, %v801_v52  ;;  %v5903_v8 = vpop.f32.mrb[38].mxu0 }
 0x417   :  { %v928_v9 = vpop.f32.mrb[39].mxu0 }
 0x418   :  { %v940_v10 = vadd.f32 %v928_v9, %v802_v55 }
 0x434   :  { %v5922_v11 = vpop.f32.mrb[40].mxu0 }
 0x435   :  { %v990_v12 = vpop.f32.mrb[41].mxu0  ;;  %v1005_v18 = vpack.c.bf16 %v5922_v11, %v5922_v11  ;;  %v6510_v11 = vld [vmem:[%s8223_s1 + $0x60] sm:$0xff]  }
 0x436   :  { %v5923_v13 = vpop.f32.mrb[42].mxu0 }
 0x437   :  { %v993_v14 = vpop.f32.mrb[43].mxu0  ;;  %v6512_v13 = vld [vmem:[%s8224_s5 + $0x90] sm:$0xff]  }
 0x438   :  { %v1004_v15 = vpack.c.bf16 %v993_v14, %v990_v12  ;;  %v6511_v14 = vld [vmem:[%s8223_s1 + $0x68] ss:$0 sps:$4 sm:$0x11]  }
 0x43a   :  { %5928 = vmatprep.mubr.msk.bf16.mxu1 %vm545_vm0, %v1004_v15  ;;  %v6513_v15 = vld [vmem:[%s8224_s5 + $0x98] sm:$0xff]  }
 0x43b   :  { %5929 = vmatmul.mubr.msk.bf16.vlgmr.msra.gmra.mrb[24].mxu1 %vm545_vm0, %v1005_v18 }
 0x43c   :  { %5933 = vmatpush3.bf16.msra.mxu1 %v6975_v47  ;;  %5948 = vmatprep.mubr.bf16.mxu1 %v6498_v17 }
 0x43d   :  { %5934 = vmatprep.subr.bf16.mxu1 %v6983_v58 }
 0x440   :  { %5935 = vmatpush3.bf16.msra.mxu1 %v6983_v58 }
 0x441   :  { %5936 = vmatprep.subr.bf16.mxu1 %v6991_v5 }
 0x444   :  { %5937 = vmatpush3.bf16.msra.mxu1 %v6991_v5 }
 0x445   :  { %5938 = vmatprep.subr.bf16.mxu1 %v6999_v16 }
 0x448   :  { %5939 = vmatpush3.bf16.msra.mxu1 %v6999_v16 }
 0x449   :  { %5940 = vmatprep.subr.bf16.mxu1 %v7007_v27 }
 0x44c   :  { %5941 = vmatpush3.bf16.msra.mxu1 %v7007_v27 }
 0x44d   :  { %5942 = vmatprep.subr.bf16.mxu1 %v7015_v39 }
 0x450   :  { %5943 = vmatpush3.bf16.msra.mxu1 %v7015_v39 }
 0x451   :  { %5944 = vmatprep.subr.bf16.mxu1 %v7023_v51 }
 0x454   :  { %5945 = vmatpush3.bf16.msra.mxu1 %v7023_v51 }
 0x455   :  { %5946 = vmatprep.subr.bf16.mxu1 %v7031_v61 }
 0x458   :  { %5947 = vmatpush3.bf16.msra.mxu1 %v7031_v61 }
 0x459   :  { %5980 = vmatprep.subr.bf16.mxu1 %v6500_v19 }
 0x45b   :  { %5949 = vmatmul.mubr.bf16.vlgmr.msra.gmra.mrb[28].mxu1 %v6499_v20 }
 0x45c   :  { %5981 = vmatpush3.bf16.msra.mxu1 %v6500_v19 }
 0x45d   :  { %5982 = vmatprep.subr.bf16.mxu1 %v6501_v21 }
 0x460   :  { %5983 = vmatpush3.bf16.msra.mxu1 %v6501_v21 }
 0x461   :  { %5988 = vmatprep.subr.bf16.mxu1 %v6975_v47 }
 0x50e   :  { %v5930_v22 = vpop.f32.mrb[24].mxu1 }
 0x50f   :  { %v1079_v23 = vadd.f32 %v5930_v22, %v941_v4  ;;  %v1063_v24 = vpop.f32.mrb[25].mxu1 }
 0x510   :  { %v1077_v25 = vadd.f32 %v1063_v24, %v939_v7  ;;  %v5931_v26 = vpop.f32.mrb[26].mxu1 }
 0x511   :  { %v1066_v28 = vpop.f32.mrb[27].mxu1 }
 0x512   :  { %v1078_v29 = vadd.f32 %v1066_v28, %v940_v10 }
 0x52e   :  { %v5950_v30 = vpop.f32.mrb[28].mxu1 }
 0x52f   :  { %v1128_v31 = vpop.f32.mrb[29].mxu1  ;;  %v1143_v37 = vpack.c.bf16 %v5950_v30, %v5950_v30  ;;  %v6514_v30 = vld [vmem:[%s8223_s1 + $0x6c] sm:$0xff]  }
 0x530   :  { %v5951_v32 = vpop.f32.mrb[30].mxu1 }
 0x531   :  { %v1131_v33 = vpop.f32.mrb[31].mxu1  ;;  %v6516_v32 = vld [vmem:[%s8224_s5 + $0xa0] sm:$0xff]  }
 0x532   :  { %v1142_v34 = vpack.c.bf16 %v1131_v33, %v1128_v31  ;;  %v6515_v33 = vld [vmem:[%s8223_s1 + $0x74] ss:$0 sps:$4 sm:$0x11]  }
 0x534   :  { %5956 = vmatprep.mubr.msk.bf16.mxu0 %vm545_vm0, %v1142_v34  ;;  %v6517_v34 = vld [vmem:[%s8224_s5 + $0xa8] sm:$0xff]  }
 0x535   :  { %5957 = vmatmul.mubr.msk.bf16.vlgmr.msra.gmra.mrb[44].mxu0 %vm545_vm0, %v1143_v37 }
 0x536   :  { %5961 = vmatpush3.bf16.msra.mxu0 %v6975_v47  ;;  %5976 = vmatprep.mubr.bf16.mxu0 %v6502_v36 }
 0x537   :  { %5962 = vmatprep.subr.bf16.mxu0 %v6983_v58 }
 0x53a   :  { %5963 = vmatpush3.bf16.msra.mxu0 %v6983_v58 }
 0x53b   :  { %5964 = vmatprep.subr.bf16.mxu0 %v6991_v5 }
 0x53e   :  { %5965 = vmatpush3.bf16.msra.mxu0 %v6991_v5 }
 0x53f   :  { %5966 = vmatprep.subr.bf16.mxu0 %v6999_v16 }
 0x542   :  { %5967 = vmatpush3.bf16.msra.mxu0 %v6999_v16 }
 0x543   :  { %5968 = vmatprep.subr.bf16.mxu0 %v7007_v27 }
 0x546   :  { %5969 = vmatpush3.bf16.msra.mxu0 %v7007_v27 }
 0x547   :  { %5970 = vmatprep.subr.bf16.mxu0 %v7015_v39 }
 0x54a   :  { %5971 = vmatpush3.bf16.msra.mxu0 %v7015_v39 }
 0x54b   :  { %5972 = vmatprep.subr.bf16.mxu0 %v7023_v51 }
 0x54e   :  { %5973 = vmatpush3.bf16.msra.mxu0 %v7023_v51 }
 0x54f   :  { %5974 = vmatprep.subr.bf16.mxu0 %v7031_v61 }
 0x552   :  { %5975 = vmatpush3.bf16.msra.mxu0 %v7031_v61 }
 0x553   :  { %6008 = vmatprep.subr.bf16.mxu0 %v6504_v38 }
 0x555   :  { %5977 = vmatmul.mubr.bf16.vlgmr.msra.gmra.mrb[48].mxu0 %v6503_v40 }
 0x556   :  { %6009 = vmatpush3.bf16.msra.mxu0 %v6504_v38 }
 0x557   :  { %6010 = vmatprep.subr.bf16.mxu0 %v6505_v41 }
 0x55a   :  { %6011 = vmatpush3.bf16.msra.mxu0 %v6505_v41 }
 0x55b   :  { %6016 = vmatprep.subr.bf16.mxu0 %v6975_v47 }
 0x608   :  { %v5958_v42 = vpop.f32.mrb[44].mxu0 }
 0x609   :  { %v1217_v43 = vadd.f32 %v5958_v42, %v1079_v23  ;;  %v1201_v44 = vpop.f32.mrb[45].mxu0 }
 0x60a   :  { %v1215_v45 = vadd.f32 %v1201_v44, %v1077_v25  ;;  %v5959_v46 = vpop.f32.mrb[46].mxu0 }
 0x60b   :  { %v1204_v48 = vpop.f32.mrb[47].mxu0 }
 0x60c   :  { %v1216_v49 = vadd.f32 %v1204_v48, %v1078_v29 }
 0x628   :  { %v5978_v50 = vpop.f32.mrb[48].mxu0 }
 0x629   :  { %v1266_v52 = vpop.f32.mrb[49].mxu0  ;;  %v1281_v57 = vpack.c.bf16 %v5978_v50, %v5978_v50  ;;  %v6518_v50 = vld [vmem:[%s8223_s1 + $0x78] sm:$0xff]  }
 0x62a   :  { %v5979_v53 = vpop.f32.mrb[50].mxu0 }
 0x62b   :  { %v1269_v54 = vpop.f32.mrb[51].mxu0  ;;  %v6520_v53 = vld [vmem:[%s8224_s5 + $0xb0] sm:$0xff]  }
 0x62c   :  { %v1280_v55 = vpack.c.bf16 %v1269_v54, %v1266_v52  ;;  %v6519_v54 = vld [vmem:[%s8223_s1 + $0x80] ss:$0 sps:$4 sm:$0x11]  }
 0x62e   :  { %5984 = vmatprep.mubr.msk.bf16.mxu1 %vm545_vm0, %v1280_v55  ;;  %v6521_v55 = vld [vmem:[%s8224_s5 + $0xb8] sm:$0xff]  }
 0x62f   :  { %5985 = vmatmul.mubr.msk.bf16.vlgmr.msra.gmra.mrb[32].mxu1 %vm545_vm0, %v1281_v57 }
 0x630   :  { %5989 = vmatpush3.bf16.msra.mxu1 %v6975_v47  ;;  %6004 = vmatprep.mubr.bf16.mxu1 %v6506_v56 }
 0x631   :  { %5990 = vmatprep.subr.bf16.mxu1 %v6983_v58 }
 0x634   :  { %5991 = vmatpush3.bf16.msra.mxu1 %v6983_v58 }
 0x635   :  { %5992 = vmatprep.subr.bf16.mxu1 %v6991_v5 }
 0x638   :  { %5993 = vmatpush3.bf16.msra.mxu1 %v6991_v5 }
 0x639   :  { %5994 = vmatprep.subr.bf16.mxu1 %v6999_v16 }
 0x63c   :  { %5995 = vmatpush3.bf16.msra.mxu1 %v6999_v16 }
 0x63d   :  { %5996 = vmatprep.subr.bf16.mxu1 %v7007_v27 }
 0x640   :  { %5997 = vmatpush3.bf16.msra.mxu1 %v7007_v27 }
 0x641   :  { %5998 = vmatprep.subr.bf16.mxu1 %v7015_v39 }
 0x644   :  { %5999 = vmatpush3.bf16.msra.mxu1 %v7015_v39 }
 0x645   :  { %6000 = vmatprep.subr.bf16.mxu1 %v7023_v51 }
 0x648   :  { %6001 = vmatpush3.bf16.msra.mxu1 %v7023_v51 }
 0x649   :  { %6002 = vmatprep.subr.bf16.mxu1 %v7031_v61 }
 0x64c   :  { %6003 = vmatpush3.bf16.msra.mxu1 %v7031_v61 }
 0x64d   :  { %6036 = vmatprep.subr.bf16.mxu1 %v6508_v59 }
 0x64f   :  { %6005 = vmatmul.mubr.bf16.vlgmr.msra.gmra.mrb[36].mxu1 %v6507_v60 }
 0x650   :  { %6037 = vmatpush3.bf16.msra.mxu1 %v6508_v59 }
 0x651   :  { %6038 = vmatprep.subr.bf16.mxu1 %v6509_v62 }
 0x654   :  { %6039 = vmatpush3.bf16.msra.mxu1 %v6509_v62 }
 0x655   :  { %6044 = vmatprep.subr.bf16.mxu1 %v6975_v47 }
 0x702   :  { %v5986_v63 = vpop.f32.mrb[32].mxu1 }
 0x703   :  { %v1355_v35 = vadd.f32 %v5986_v63, %v1217_v43  ;;  %v1339_v0 = vpop.f32.mrb[33].mxu1 }
 0x704   :  { %v1353_v1 = vadd.f32 %v1339_v0, %v1215_v45  ;;  %v5987_v2 = vpop.f32.mrb[34].mxu1 }
 0x705   :  { %v1342_v3 = vpop.f32.mrb[35].mxu1 }
 0x706   :  { %v1354_v4 = vadd.f32 %v1342_v3, %v1216_v49 }
 0x722   :  { %v6006_v6 = vpop.f32.mrb[36].mxu1 }
 0x723   :  { %v1404_v7 = vpop.f32.mrb[37].mxu1  ;;  %v1419_v12 = vpack.c.bf16 %v6006_v6, %v6006_v6  ;;  %v6522_v6 = vld [vmem:[%s8223_s1 + $0x84] sm:$0xff]  }
 0x724   :  { %v6007_v8 = vpop.f32.mrb[38].mxu1 }
 0x725   :  { %v1407_v9 = vpop.f32.mrb[39].mxu1  ;;  %v6524_v8 = vld [vmem:[%s8224_s5 + $0xc0] sm:$0xff]  }
 0x726   :  { %v1418_v10 = vpack.c.bf16 %v1407_v9, %v1404_v7  ;;  %v6523_v9 = vld [vmem:[%s8223_s1 + $0x8c] ss:$0 sps:$4 sm:$0x11]  }
 0x728   :  { %6012 = vmatprep.mubr.msk.bf16.mxu0 %vm545_vm0, %v1418_v10  ;;  %v6525_v10 = vld [vmem:[%s8224_s5 + $0xc8] sm:$0xff]  }
 0x729   :  { %6013 = vmatmul.mubr.msk.bf16.vlgmr.msra.gmra.mrb[52].mxu0 %vm545_vm0, %v1419_v12 }
 0x72a   :  { %6017 = vmatpush3.bf16.msra.mxu0 %v6975_v47  ;;  %6032 = vmatprep.mubr.bf16.mxu0 %v6510_v11 }
 0x72b   :  { %6018 = vmatprep.subr.bf16.mxu0 %v6983_v58 }
 0x72e   :  { %6019 = vmatpush3.bf16.msra.mxu0 %v6983_v58 }
 0x72f   :  { %6020 = vmatprep.subr.bf16.mxu0 %v6991_v5 }
 0x732   :  { %6021 = vmatpush3.bf16.msra.mxu0 %v6991_v5 }
 0x733   :  { %6022 = vmatprep.subr.bf16.mxu0 %v6999_v16 }
 0x736   :  { %6023 = vmatpush3.bf16.msra.mxu0 %v6999_v16 }
 0x737   :  { %6024 = vmatprep.subr.bf16.mxu0 %v7007_v27 }
 0x73a   :  { %6025 = vmatpush3.bf16.msra.mxu0 %v7007_v27 }
 0x73b   :  { %6026 = vmatprep.subr.bf16.mxu0 %v7015_v39 }
 0x73e   :  { %6027 = vmatpush3.bf16.msra.mxu0 %v7015_v39 }
 0x73f   :  { %6028 = vmatprep.subr.bf16.mxu0 %v7023_v51 }
 0x742   :  { %6029 = vmatpush3.bf16.msra.mxu0 %v7023_v51 }
 0x743   :  { %6030 = vmatprep.subr.bf16.mxu0 %v7031_v61 }
 0x746   :  { %6031 = vmatpush3.bf16.msra.mxu0 %v7031_v61 }
 0x747   :  { %6064 = vmatprep.subr.bf16.mxu0 %v6512_v13 }
 0x749   :  { %6033 = vmatmul.mubr.bf16.vlgmr.msra.gmra.mrb[56].mxu0 %v6511_v14 }
 0x74a   :  { %6065 = vmatpush3.bf16.msra.mxu0 %v6512_v13 }
 0x74b   :  { %6066 = vmatprep.subr.bf16.mxu0 %v6513_v15 }
 0x74e   :  { %6067 = vmatpush3.bf16.msra.mxu0 %v6513_v15 }
 0x74f   :  { %6072 = vmatprep.subr.bf16.mxu0 %v6975_v47 }
 0x7fc   :  { %v6014_v17 = vpop.f32.mrb[52].mxu0 }
 0x7fd   :  { %v1493_v18 = vadd.f32 %v6014_v17, %v1355_v35  ;;  %v1477_v19 = vpop.f32.mrb[53].mxu0 }
 0x7fe   :  { %v1491_v20 = vadd.f32 %v1477_v19, %v1353_v1  ;;  %v6015_v21 = vpop.f32.mrb[54].mxu0 }
 0x7ff   :  { %v1480_v22 = vpop.f32.mrb[55].mxu0 }
 0x800   :  { %v1492_v23 = vadd.f32 %v1480_v22, %v1354_v4 }
 0x81c   :  { %v6034_v24 = vpop.f32.mrb[56].mxu0 }
 0x81d   :  { %v1542_v25 = vpop.f32.mrb[57].mxu0  ;;  %v1557_v31 = vpack.c.bf16 %v6034_v24, %v6034_v24  ;;  %v6526_v24 = vld [vmem:[%s8223_s1 + $0x90] sm:$0xff]  }
 0x81e   :  { %v6035_v26 = vpop.f32.mrb[58].mxu0 }
 0x81f   :  { %v1545_v28 = vpop.f32.mrb[59].mxu0  ;;  %v6528_v26 = vld [vmem:[%s8224_s5 + $0xd0] sm:$0xff]  }
 0x820   :  { %v1556_v29 = vpack.c.bf16 %v1545_v28, %v1542_v25  ;;  %v6527_v28 = vld [vmem:[%s8223_s1 + $0x98] ss:$0 sps:$4 sm:$0x11]  }
 0x822   :  { %6040 = vmatprep.mubr.msk.bf16.mxu1 %vm545_vm0, %v1556_v29  ;;  %v6529_v29 = vld [vmem:[%s8224_s5 + $0xd8] sm:$0xff]  }
 0x823   :  { %6041 = vmatmul.mubr.msk.bf16.vlgmr.msra.gmra.mrb[40].mxu1 %vm545_vm0, %v1557_v31 }
 0x824   :  { %6045 = vmatpush3.bf16.msra.mxu1 %v6975_v47  ;;  %6060 = vmatprep.mubr.bf16.mxu1 %v6514_v30 }
 0x825   :  { %6046 = vmatprep.subr.bf16.mxu1 %v6983_v58 }
 0x828   :  { %6047 = vmatpush3.bf16.msra.mxu1 %v6983_v58 }
 0x829   :  { %6048 = vmatprep.subr.bf16.mxu1 %v6991_v5 }
 0x82c   :  { %6049 = vmatpush3.bf16.msra.mxu1 %v6991_v5 }
 0x82d   :  { %6050 = vmatprep.subr.bf16.mxu1 %v6999_v16 }
 0x830   :  { %6051 = vmatpush3.bf16.msra.mxu1 %v6999_v16 }
 0x831   :  { %6052 = vmatprep.subr.bf16.mxu1 %v7007_v27 }
 0x834   :  { %6053 = vmatpush3.bf16.msra.mxu1 %v7007_v27 }
 0x835   :  { %6054 = vmatprep.subr.bf16.mxu1 %v7015_v39 }
 0x838   :  { %6055 = vmatpush3.bf16.msra.mxu1 %v7015_v39 }
 0x839   :  { %6056 = vmatprep.subr.bf16.mxu1 %v7023_v51 }
 0x83c   :  { %6057 = vmatpush3.bf16.msra.mxu1 %v7023_v51 }
 0x83d   :  { %6058 = vmatprep.subr.bf16.mxu1 %v7031_v61 }
 0x840   :  { %6059 = vmatpush3.bf16.msra.mxu1 %v7031_v61 }
 0x841   :  { %6092 = vmatprep.subr.bf16.mxu1 %v6516_v32 }
 0x843   :  { %6061 = vmatmul.mubr.bf16.vlgmr.msra.gmra.mrb[44].mxu1 %v6515_v33 }
 0x844   :  { %6093 = vmatpush3.bf16.msra.mxu1 %v6516_v32 }
 0x845   :  { %6094 = vmatprep.subr.bf16.mxu1 %v6517_v34 }
 0x848   :  { %6095 = vmatpush3.bf16.msra.mxu1 %v6517_v34 }
 0x849   :  { %6100 = vmatprep.subr.bf16.mxu1 %v6975_v47 }
 0x8f6   :  { %v6042_v36 = vpop.f32.mrb[40].mxu1 }
 0x8f7   :  { %v1631_v37 = vadd.f32 %v6042_v36, %v1493_v18  ;;  %v1615_v38 = vpop.f32.mrb[41].mxu1 }
 0x8f8   :  { %v1629_v40 = vadd.f32 %v1615_v38, %v1491_v20  ;;  %v6043_v41 = vpop.f32.mrb[42].mxu1 }
 0x8f9   :  { %v1618_v42 = vpop.f32.mrb[43].mxu1 }
 0x8fa   :  { %v1630_v43 = vadd.f32 %v1618_v42, %v1492_v23 }
 0x916   :  { %v6062_v44 = vpop.f32.mrb[44].mxu1 }
 0x917   :  { %v1680_v45 = vpop.f32.mrb[45].mxu1  ;;  %v1695_v52 = vpack.c.bf16 %v6062_v44, %v6062_v44  ;;  %v6530_v44 = vld [vmem:[%s8223_s1 + $0x9c] sm:$0xff]  }
 0x918   :  { %v6063_v46 = vpop.f32.mrb[46].mxu1 }
 0x919   :  { %v1683_v48 = vpop.f32.mrb[47].mxu1  ;;  %v6532_v46 = vld [vmem:[%s8224_s5 + $0xe0] sm:$0xff]  }
 0x91a   :  { %v1694_v49 = vpack.c.bf16 %v1683_v48, %v1680_v45  ;;  %v6531_v48 = vld [vmem:[%s8223_s1 + $0xa4] ss:$0 sps:$4 sm:$0x11]  }
 0x91c   :  { %6068 = vmatprep.mubr.msk.bf16.mxu0 %vm545_vm0, %v1694_v49  ;;  %v6533_v49 = vld [vmem:[%s8224_s5 + $0xe8] sm:$0xff]  }
 0x91d   :  { %6069 = vmatmul.mubr.msk.bf16.vlgmr.msra.gmra.mrb[60].mxu0 %vm545_vm0, %v1695_v52 }
 0x91e   :  { %6073 = vmatpush3.bf16.msra.mxu0 %v6975_v47  ;;  %6088 = vmatprep.mubr.bf16.mxu0 %v6518_v50 }
 0x91f   :  { %6074 = vmatprep.subr.bf16.mxu0 %v6983_v58 }
 0x922   :  { %6075 = vmatpush3.bf16.msra.mxu0 %v6983_v58 }
 0x923   :  { %6076 = vmatprep.subr.bf16.mxu0 %v6991_v5 }
 0x926   :  { %6077 = vmatpush3.bf16.msra.mxu0 %v6991_v5 }
 0x927   :  { %6078 = vmatprep.subr.bf16.mxu0 %v6999_v16 }
 0x92a   :  { %6079 = vmatpush3.bf16.msra.mxu0 %v6999_v16 }
 0x92b   :  { %6080 = vmatprep.subr.bf16.mxu0 %v7007_v27 }
 0x92e   :  { %6081 = vmatpush3.bf16.msra.mxu0 %v7007_v27 }
 0x92f   :  { %6082 = vmatprep.subr.bf16.mxu0 %v7015_v39 }
 0x932   :  { %6083 = vmatpush3.bf16.msra.mxu0 %v7015_v39 }
 0x933   :  { %6084 = vmatprep.subr.bf16.mxu0 %v7023_v51 }
 0x936   :  { %6085 = vmatpush3.bf16.msra.mxu0 %v7023_v51 }
 0x937   :  { %6086 = vmatprep.subr.bf16.mxu0 %v7031_v61 }
 0x93a   :  { %6087 = vmatpush3.bf16.msra.mxu0 %v7031_v61 }
 0x93b   :  { %6120 = vmatprep.subr.bf16.mxu0 %v6520_v53 }
 0x93d   :  { %6089 = vmatmul.mubr.bf16.vlgmr.msra.gmra.mrb[64].mxu0 %v6519_v54 }
 0x93e   :  { %6121 = vmatpush3.bf16.msra.mxu0 %v6520_v53 }
 0x93f   :  { %6122 = vmatprep.subr.bf16.mxu0 %v6521_v55 }
 0x942   :  { %6123 = vmatpush3.bf16.msra.mxu0 %v6521_v55 }
 0x943   :  { %6128 = vmatprep.subr.bf16.mxu0 %v6975_v47 }
 0x9f0   :  { %v6070_v56 = vpop.f32.mrb[60].mxu0 }
 0x9f1   :  { %v1769_v57 = vadd.f32 %v6070_v56, %v1631_v37  ;;  %v1753_v59 = vpop.f32.mrb[61].mxu0 }
 0x9f2   :  { %v1767_v60 = vadd.f32 %v1753_v59, %v1629_v40  ;;  %v6071_v62 = vpop.f32.mrb[62].mxu0 }
 0x9f3   :  { %v1756_v63 = vpop.f32.mrb[63].mxu0 }
 0x9f4   :  { %v1768_v35 = vadd.f32 %v1756_v63, %v1630_v43 }
 0xa10   :  { %v6090_v0 = vpop.f32.mrb[64].mxu0 }
 0xa11   :  { %v1818_v1 = vpop.f32.mrb[65].mxu0  ;;  %v1833_v7 = vpack.c.bf16 %v6090_v0, %v6090_v0  ;;  %v6534_v0 = vld [vmem:[%s8223_s1 + $0xa8] sm:$0xff]  }
 0xa12   :  { %v6091_v2 = vpop.f32.mrb[66].mxu0 }
 0xa13   :  { %v1821_v3 = vpop.f32.mrb[67].mxu0  ;;  %v6535_v2 = vld [vmem:[%s8223_s1 + $0xb0] ss:$0 sps:$4 sm:$0x11]  }
 0xa14   :  { %v1832_v4 = vpack.c.bf16 %v1821_v3, %v1818_v1 }
 0xa16   :  { %6096 = vmatprep.mubr.msk.bf16.mxu1 %vm545_vm0, %v1832_v4 }
 0xa17   :  { %6097 = vmatmul.mubr.msk.bf16.vlgmr.msra.gmra.mrb[48].mxu1 %vm545_vm0, %v1833_v7 }
 0xa18   :  { %6101 = vmatpush3.bf16.msra.mxu1 %v6975_v47  ;;  %6116 = vmatprep.mubr.bf16.mxu1 %v6522_v6 }
 0xa19   :  { %6102 = vmatprep.subr.bf16.mxu1 %v6983_v58 }
 0xa1c   :  { %6103 = vmatpush3.bf16.msra.mxu1 %v6983_v58 }
 0xa1d   :  { %6104 = vmatprep.subr.bf16.mxu1 %v6991_v5 }
 0xa20   :  { %6105 = vmatpush3.bf16.msra.mxu1 %v6991_v5 }
 0xa21   :  { %6106 = vmatprep.subr.bf16.mxu1 %v6999_v16 }
 0xa24   :  { %6107 = vmatpush3.bf16.msra.mxu1 %v6999_v16 }
 0xa25   :  { %6108 = vmatprep.subr.bf16.mxu1 %v7007_v27 }
 0xa28   :  { %6109 = vmatpush3.bf16.msra.mxu1 %v7007_v27 }
 0xa29   :  { %6110 = vmatprep.subr.bf16.mxu1 %v7015_v39 }
 0xa2c   :  { %6111 = vmatpush3.bf16.msra.mxu1 %v7015_v39 }
 0xa2d   :  { %6112 = vmatprep.subr.bf16.mxu1 %v7023_v51 }
 0xa30   :  { %6113 = vmatpush3.bf16.msra.mxu1 %v7023_v51 }
 0xa31   :  { %6114 = vmatprep.subr.bf16.mxu1 %v7031_v61 }
 0xa34   :  { %6115 = vmatpush3.bf16.msra.mxu1 %v7031_v61 }
 0xa35   :  { %6148 = vmatprep.subr.bf16.mxu1 %v6524_v8 }
 0xa37   :  { %6117 = vmatmul.mubr.bf16.vlgmr.msra.gmra.mrb[52].mxu1 %v6523_v9 }
 0xa38   :  { %6149 = vmatpush3.bf16.msra.mxu1 %v6524_v8 }
 0xa39   :  { %6150 = vmatprep.subr.bf16.mxu1 %v6525_v10 }
 0xa3c   :  { %6151 = vmatpush3.bf16.msra.mxu1 %v6525_v10 }
 0xa3d   :  { %6156 = vmatprep.subr.bf16.mxu1 %v6975_v47 }
 0xaea   :  { %v6098_v11 = vpop.f32.mrb[48].mxu1 }
 0xaeb   :  { %v1907_v12 = vadd.f32 %v6098_v11, %v1769_v57  ;;  %v1891_v13 = vpop.f32.mrb[49].mxu1 }
 0xaec   :  { %v1905_v14 = vadd.f32 %v1891_v13, %v1767_v60  ;;  %v6099_v15 = vpop.f32.mrb[50].mxu1 }
 0xaed   :  { %v1894_v17 = vpop.f32.mrb[51].mxu1 }
 0xaee   :  { %v1906_v18 = vadd.f32 %v1894_v17, %v1768_v35  ;;  %v6536_v17 = vld [vmem:[%s8223_s1 + $0xb4] sm:$0xff]  }
 0xb0a   :  { %v6118_v19 = vpop.f32.mrb[52].mxu1 }
 0xb0b   :  { %v1956_v20 = vpop.f32.mrb[53].mxu1  ;;  %v1971_v25 = vpack.c.bf16 %v6118_v19, %v6118_v19 }
 0xb0c   :  { %v6119_v21 = vpop.f32.mrb[54].mxu1 }
 0xb0d   :  { %v1959_v22 = vpop.f32.mrb[55].mxu1 }
 0xb0e   :  { %v1970_v23 = vpack.c.bf16 %v1959_v22, %v1956_v20 }
 0xb10   :  { %6124 = vmatprep.mubr.msk.bf16.mxu0 %vm545_vm0, %v1970_v23 }
 0xb11   :  { %6125 = vmatmul.mubr.msk.bf16.vlgmr.msra.gmra.mrb[68].mxu0 %vm545_vm0, %v1971_v25 }
 0xb12   :  { %6129 = vmatpush3.bf16.msra.mxu0 %v6975_v47  ;;  %6144 = vmatprep.mubr.bf16.mxu0 %v6526_v24 }
 0xb13   :  { %6130 = vmatprep.subr.bf16.mxu0 %v6983_v58 }
 0xb16   :  { %6131 = vmatpush3.bf16.msra.mxu0 %v6983_v58 }
 0xb17   :  { %6132 = vmatprep.subr.bf16.mxu0 %v6991_v5 }
 0xb1a   :  { %6133 = vmatpush3.bf16.msra.mxu0 %v6991_v5 }
 0xb1b   :  { %6134 = vmatprep.subr.bf16.mxu0 %v6999_v16 }
 0xb1e   :  { %6135 = vmatpush3.bf16.msra.mxu0 %v6999_v16 }
 0xb1f   :  { %6136 = vmatprep.subr.bf16.mxu0 %v7007_v27 }
 0xb22   :  { %6137 = vmatpush3.bf16.msra.mxu0 %v7007_v27 }
 0xb23   :  { %6138 = vmatprep.subr.bf16.mxu0 %v7015_v39 }
 0xb26   :  { %6139 = vmatpush3.bf16.msra.mxu0 %v7015_v39 }
 0xb27   :  { %6140 = vmatprep.subr.bf16.mxu0 %v7023_v51 }
 0xb2a   :  { %6141 = vmatpush3.bf16.msra.mxu0 %v7023_v51 }
 0xb2b   :  { %6142 = vmatprep.subr.bf16.mxu0 %v7031_v61 }
 0xb2e   :  { %6143 = vmatpush3.bf16.msra.mxu0 %v7031_v61 }
 0xb2f   :  { %6176 = vmatprep.subr.bf16.mxu0 %v6528_v26 }
 0xb31   :  { %6145 = vmatmul.mubr.bf16.vlgmr.msra.gmra.mrb[72].mxu0 %v6527_v28  ;;  %v6792_v28 = vmov 0.0  }
 0xb32   :  { %6177 = vmatpush3.bf16.msra.mxu0 %v6528_v26 }
 0xb33   :  { %6178 = vmatprep.subr.bf16.mxu0 %v6529_v29 }
 0xb36   :  { %6179 = vmatpush3.bf16.msra.mxu0 %v6529_v29  ;;  %v6540_v29 = vld [vmem:[%s8226_s7] sm:$0xff]  }
 0xb37   :  { %6184 = vmatprep.subr.bf16.mxu0 %v6975_v47 }
 0xbe4   :  { %v6126_v30 = vpop.f32.mrb[68].mxu0 }
 0xbe5   :  { %v2045_v31 = vadd.f32 %v6126_v30, %v1907_v12  ;;  %v2029_v32 = vpop.f32.mrb[69].mxu0  ;;  %v6541_v30 = vld [vmem:[%s8226_s7 + $0x8] sm:$0xff]  }
 0xbe6   :  { %v2043_v33 = vadd.f32 %v2029_v32, %v1905_v14  ;;  %v6127_v34 = vpop.f32.mrb[70].mxu0 }
 0xbe7   :  { %v2032_v36 = vpop.f32.mrb[71].mxu0 }
 0xbe8   :  { %v2044_v37 = vadd.f32 %v2032_v36, %v1906_v18 }
 0xc04   :  { %v6146_v38 = vpop.f32.mrb[72].mxu0 }
 0xc05   :  { %v2094_v40 = vpop.f32.mrb[73].mxu0  ;;  %v2109_v45 = vpack.c.bf16 %v6146_v38, %v6146_v38 }
 0xc06   :  { %v6147_v41 = vpop.f32.mrb[74].mxu0 }
 0xc07   :  { %v2097_v42 = vpop.f32.mrb[75].mxu0 }
 0xc08   :  { %v2108_v43 = vpack.c.bf16 %v2097_v42, %v2094_v40 }
 0xc0a   :  { %6152 = vmatprep.mubr.msk.bf16.mxu1 %vm545_vm0, %v2108_v43 }
 0xc0b   :  { %6153 = vmatmul.mubr.msk.bf16.vlgmr.msra.gmra.mrb[56].mxu1 %vm545_vm0, %v2109_v45 }
 0xc0c   :  { %6157 = vmatpush3.bf16.msra.mxu1 %v6975_v47  ;;  %6172 = vmatprep.mubr.bf16.mxu1 %v6530_v44 }
 0xc0d   :  { %6158 = vmatprep.subr.bf16.mxu1 %v6983_v58 }
 0xc10   :  { %6159 = vmatpush3.bf16.msra.mxu1 %v6983_v58 }
 0xc11   :  { %6160 = vmatprep.subr.bf16.mxu1 %v6991_v5 }
 0xc14   :  { %6161 = vmatpush3.bf16.msra.mxu1 %v6991_v5 }
 0xc15   :  { %6162 = vmatprep.subr.bf16.mxu1 %v6999_v16 }
 0xc18   :  { %6163 = vmatpush3.bf16.msra.mxu1 %v6999_v16 }
 0xc19   :  { %6164 = vmatprep.subr.bf16.mxu1 %v7007_v27 }
 0xc1c   :  { %6165 = vmatpush3.bf16.msra.mxu1 %v7007_v27 }
 0xc1d   :  { %6166 = vmatprep.subr.bf16.mxu1 %v7015_v39 }
 0xc20   :  { %6167 = vmatpush3.bf16.msra.mxu1 %v7015_v39 }
 0xc21   :  { %6168 = vmatprep.subr.bf16.mxu1 %v7023_v51 }
 0xc24   :  { %6169 = vmatpush3.bf16.msra.mxu1 %v7023_v51 }
 0xc25   :  { %6170 = vmatprep.subr.bf16.mxu1 %v7031_v61 }
 0xc28   :  { %6171 = vmatpush3.bf16.msra.mxu1 %v7031_v61 }
 0xc29   :  { %6204 = vmatprep.subr.bf16.mxu1 %v6532_v46 }
 0xc2b   :  { %6173 = vmatmul.mubr.bf16.vlgmr.msra.gmra.mrb[60].mxu1 %v6531_v48 }
 0xc2c   :  { %6205 = vmatpush3.bf16.msra.mxu1 %v6532_v46 }
 0xc2d   :  { %6206 = vmatprep.subr.bf16.mxu1 %v6533_v49 }
 0xc30   :  { %6207 = vmatpush3.bf16.msra.mxu1 %v6533_v49 }
 0xc31   :  { %6212 = vmatprep.subr.bf16.mxu1 %v6975_v47 }
 0xcde   :  { %v6154_v50 = vpop.f32.mrb[56].mxu1 }
 0xcdf   :  { %v2183_v52 = vadd.f32 %v6154_v50, %v2045_v31  ;;  %v2167_v53 = vpop.f32.mrb[57].mxu1  ;;  %v6543_v31 = vld [vmem:[%s8226_s7 + $0x10] sm:$0xff]  }
 0xce0   :  { %v2181_v54 = vadd.f32 %v2167_v53, %v2043_v33  ;;  %v6155_v55 = vpop.f32.mrb[58].mxu1  ;;  %v5158_v33 = vld [vmem:[%s8227_s6] ss:$0 sm:$0xff] }
 0xce1   :  { %v2170_v56 = vpop.f32.mrb[59].mxu1  ;;  %v2613_v53 = vld [vmem:[%s8228_s2] sm:$0x1] }
 0xce2   :  { %v2182_v57 = vadd.f32 %v2170_v56, %v2044_v37  ;;  %v6542_v55 = vld [vmem:[%s8226_s7 + $0x20] sm:$0xff]   ;;  %v6544_v56 = vld [vmem:[%s8226_s7 + $0x28] sm:$0xff]  }
 0xcfe   :  { %v6174_v59 = vpop.f32.mrb[60].mxu1 }
 0xcff   :  { %v2232_v60 = vpop.f32.mrb[61].mxu1  ;;  %v2247_v1 = vpack.c.bf16 %v6174_v59, %v6174_v59  ;;  %v6546_v59 = vld [vmem:[%s8226_s7 + $0x30] sm:$0xff]  }
 0xd00   :  { %v6175_v62 = vpop.f32.mrb[62].mxu1 }
 0xd01   :  { %v2235_v63 = vpop.f32.mrb[63].mxu1 }
 0xd02   :  { %v2246_v35 = vpack.c.bf16 %v2235_v63, %v2232_v60  ;;  %v6547_v60 = vld [vmem:[%s8226_s7 + $0x38] sm:$0xff]  }
 0xd04   :  { %6180 = vmatprep.mubr.msk.bf16.mxu0 %vm545_vm0, %v2246_v35 }
 0xd05   :  { %6181 = vmatmul.mubr.msk.bf16.vlgmr.msra.gmra.mrb[76].mxu0 %vm545_vm0, %v2247_v1 }
 0xd06   :  { %6185 = vmatpush3.bf16.msra.mxu0 %v6975_v47  ;;  %6200 = vmatprep.mubr.bf16.mxu0 %v6534_v0 }
 0xd07   :  { %6186 = vmatprep.subr.bf16.mxu0 %v6983_v58 }
 0xd0a   :  { %6187 = vmatpush3.bf16.msra.mxu0 %v6983_v58 }
 0xd0b   :  { %6188 = vmatprep.subr.bf16.mxu0 %v6991_v5 }
 0xd0e   :  { %6189 = vmatpush3.bf16.msra.mxu0 %v6991_v5 }
 0xd0f   :  { %6190 = vmatprep.subr.bf16.mxu0 %v6999_v16 }
 0xd12   :  { %6191 = vmatpush3.bf16.msra.mxu0 %v6999_v16 }
 0xd13   :  { %6192 = vmatprep.subr.bf16.mxu0 %v7007_v27 }
 0xd16   :  { %6193 = vmatpush3.bf16.msra.mxu0 %v7007_v27 }
 0xd17   :  { %6194 = vmatprep.subr.bf16.mxu0 %v7015_v39 }
 0xd1a   :  { %6195 = vmatpush3.bf16.msra.mxu0 %v7015_v39 }
 0xd1b   :  { %6196 = vmatprep.subr.bf16.mxu0 %v7023_v51 }
 0xd1e   :  { %6197 = vmatpush3.bf16.msra.mxu0 %v7023_v51 }
 0xd1f   :  { %6198 = vmatprep.subr.bf16.mxu0 %v7031_v61 }
 0xd22   :  { %6199 = vmatpush3.bf16.msra.mxu0 %v7031_v61 }
 0xd25   :  { %6201 = vmatmul.mubr.bf16.vlgmr.msra.gmra.mrb[80].mxu0 %v6535_v2 }
 0xdd8   :  { %v6182_v3 = vpop.f32.mrb[76].mxu0 }
 0xdd9   :  { %v2321_v4 = vadd.f32 %v6182_v3, %v2183_v52  ;;  %v2305_v6 = vpop.f32.mrb[77].mxu0 }
 0xdda   :  { %v2319_v7 = vadd.f32 %v2305_v6, %v2181_v54  ;;  %v6183_v8 = vpop.f32.mrb[78].mxu0  ;;  %v5160_v54 = vld [vmem:[%s8228_s2 + $0x1] sm:$0x1] }
 0xddb   :  { %v2308_v9 = vpop.f32.mrb[79].mxu0  ;;  %v5180_v8 = vld [vmem:[%s8228_s2 + $0x2] sm:$0x1] }
 0xddc   :  { %v2320_v10 = vadd.f32 %v2308_v9, %v2182_v57  ;;  %v6545_v57 = vld [vmem:[%s8226_s7 + $0x18] sm:$0xff]   ;;  %v5195_v9 = vld [vmem:[%s8228_s2 + $0x3] sm:$0x1] }
 0xdf8   :  { %v6202_v11 = vpop.f32.mrb[80].mxu0 }
 0xdf9   :  { %v2370_v12 = vpop.f32.mrb[81].mxu0  ;;  %v2385_v18 = vpack.c.bf16 %v6202_v11, %v6202_v11  ;;  %v6549_v11 = vld [vmem:[%s8226_s7 + $0x48] sm:$0xff]  }
 0xdfa   :  { %v6203_v13 = vpop.f32.mrb[82].mxu0 }
 0xdfb   :  { %v2373_v14 = vpop.f32.mrb[83].mxu0  ;;  %v6551_v13 = vld [vmem:[%s8226_s7 + $0x60] sm:$0xff]  }
 0xdfc   :  { %v2384_v15 = vpack.c.bf16 %v2373_v14, %v2370_v12  ;;  %v6550_v12 = vld [vmem:[%s8226_s7 + $0x50] sm:$0xff]   ;;  %v6552_v14 = vld [vmem:[%s8226_s7 + $0x58] sm:$0xff]  }
 0xdfe   :  { %6208 = vmatprep.mubr.msk.bf16.mxu1 %vm545_vm0, %v2384_v15  ;;  %v6553_v15 = vld [vmem:[%s8226_s7 + $0x68] sm:$0xff]  }
 0xdff   :  { %6209 = vmatmul.mubr.msk.bf16.vlgmr.msra.gmra.mrb[64].mxu1 %vm545_vm0, %v2385_v18  ;;  %v6555_v18 = vld [vmem:[%s8226_s7 + $0x78] sm:$0xff]  }
 0xe00   :  { %6213 = vmatpush3.bf16.msra.mxu1 %v6975_v47  ;;  %6228 = vmatprep.mubr.bf16.mxu1 %v6536_v17  ;;  %v6537_v47 = vld [vmem:[%s8223_s1 + $0xbc] ss:$0 sps:$4 sm:$0x11]   ;;  %v6554_v17 = vld [vmem:[%s8226_s7 + $0x70] sm:$0xff]  }
 0xe01   :  { %6214 = vmatprep.subr.bf16.mxu1 %v6983_v58 }
 0xe04   :  { %6215 = vmatpush3.bf16.msra.mxu1 %v6983_v58  ;;  %v6538_v58 = vld [vmem:[%s8224_s5 + $0xf0] sm:$0xff]  }
 0xe05   :  { %6216 = vmatprep.subr.bf16.mxu1 %v6991_v5  ;;  %6232 = vmatprep.subr.bf16.mxu0 %v6538_v58 }
 0xe06   :  { %6233 = vmatpush3.bf16.msra.mxu0 %v6538_v58 }
 0xe08   :  { %6217 = vmatpush3.bf16.msra.mxu1 %v6991_v5  ;;  %v6539_v5 = vld [vmem:[%s8224_s5 + $0xf8] sm:$0xff]  }
 0xe09   :  { %6218 = vmatprep.subr.bf16.mxu1 %v6999_v16  ;;  %6234 = vmatprep.subr.bf16.mxu0 %v6539_v5 }
 0xe0a   :  { %6235 = vmatpush3.bf16.msra.mxu0 %v6539_v5 }
 0xe0b   :  { %6240 = vmatprep.subr.bf16.mxu0 %v6792_v28 }
 0xe0c   :  { %6219 = vmatpush3.bf16.msra.mxu1 %v6999_v16 }
 0xe0d   :  { %6220 = vmatprep.subr.bf16.mxu1 %v7007_v27 }
 0xe10   :  { %6221 = vmatpush3.bf16.msra.mxu1 %v7007_v27 }
 0xe11   :  { %6222 = vmatprep.subr.bf16.mxu1 %v7015_v39 }
 0xe14   :  { %6223 = vmatpush3.bf16.msra.mxu1 %v7015_v39 }
 0xe15   :  { %6224 = vmatprep.subr.bf16.mxu1 %v7023_v51 }
 0xe18   :  { %6225 = vmatpush3.bf16.msra.mxu1 %v7023_v51 }
 0xe19   :  { %6226 = vmatprep.subr.bf16.mxu1 %v7031_v61 }
 0xe1c   :  { %6227 = vmatpush3.bf16.msra.mxu1 %v7031_v61 }
 0xe1d   :  { %6268 = vmatprep.subr.bf16.mxu1 %v6792_v28 }
 0xe1f   :  { %6229 = vmatmul.mubr.bf16.vlgmr.msra.gmra.mrb[68].mxu1 %v6537_v47 }
 0xe20   :  { %6276 = vmatprep.mubr.msk.bf16.mxu1 %vm6793_vm1, %v6792_v28  ;;  %6269 = vmatpush3.bf16.msra.mxu1 %v6540_v29 }
 0xe21   :  { %6270 = vmatprep.subr.bf16.mxu1 %v6792_v28 }
 0xe24   :  { %6271 = vmatpush3.bf16.msra.mxu1 %v6541_v30  ;;  %v6556_v30 = vld [vmem:[%s8226_s7 + $0x80] sm:$0xff]  }
 0xe25   :  { %6272 = vmatprep.subr.bf16.mxu1 %v6792_v28 }
 0xe28   :  { %6273 = vmatpush3.bf16.msra.mxu1 %v6543_v31 }
 0xe29   :  { %6274 = vmatprep.subr.bf16.mxu1 %v6792_v28 }
 0xe2c   :  { %6275 = vmatpush3.bf16.msra.mxu1 %v6545_v57 }
 0xe2d   :  { %6288 = vmatprep.subr.bf16.mxu1 %v6792_v28 }
 0xed2   :  { %v6210_v16 = vpop.f32.mrb[64].mxu1 }
 0xed3   :  { %v2459_v27 = vadd.f32 %v6210_v16, %v2321_v4  ;;  %v2443_v39 = vpop.f32.mrb[65].mxu1 }
 0xed4   :  { %v2457_v51 = vadd.f32 %v2443_v39, %v2319_v7  ;;  %v6211_v19 = vpop.f32.mrb[66].mxu1 }
 0xed5   :  { %v2446_v20 = vpop.f32.mrb[67].mxu1 }
 0xed6   :  { %v2458_v61 = vadd.f32 %v2446_v20, %v2320_v10  ;;  %v6548_v10 = vld [vmem:[%s8226_s7 + $0x40] sm:$0xff]  }
 0xef2   :  { %v6230_v21 = vpop.f32.mrb[68].mxu1 }
 0xef3   :  { %v2508_v22 = vpop.f32.mrb[69].mxu1  ;;  %v2523_v26 = vpack.c.bf16 %v6230_v21, %v6230_v21 }
 0xef4   :  { %v6231_v23 = vpop.f32.mrb[70].mxu1 }
 0xef5   :  { %v2511_v24 = vpop.f32.mrb[71].mxu1 }
 0xef6   :  { %v2522_v25 = vpack.c.bf16 %v2511_v24, %v2508_v22 }
 0xef8   :  { %6236 = vmatprep.mubr.msk.bf16.mxu0 %vm545_vm0, %v2522_v25 }
 0xef9   :  { %6237 = vmatmul.mubr.msk.bf16.vlgmr.msra.gmra.mrb[84].mxu0 %vm545_vm0, %v2523_v26  ;;  %v5210_v26 = vld [vmem:[%s8228_s2 + $0x4] sm:$0x1] }
 0xefa   :  { %6244 = vmatprep.mubr.msk.bf16.mxu0 %vm6793_vm1, %v6792_v28 }
 0xfcc   :  { %v6238_v32 = vpop.f32.mrb[84].mxu0 }
 0xfcd   :  { %v2597_v34 = vadd.f32 %v6238_v32, %v2459_v27  ;;  %v2581_v36 = vpop.f32.mrb[85].mxu0 }
 0xfce   :  { %v2595_v37 = vadd.f32 %v2581_v36, %v2457_v51  ;;  %v6239_v38 = vpop.f32.mrb[86].mxu0  ;;  %v5225_v36 = vld [vmem:[%s8228_s2 + $0x5] sm:$0x1] }
 0xfcf   :  { %v2607_v40 = vadd.f32 %v5158_v33, %v2597_v34  ;;  %v2584_v41 = vpop.f32.mrb[87].mxu0  ;;  %v6557_v34 = vld [vmem:[%s8226_s7 + $0x88] sm:$0xff]   ;;  %v6559_v38 = vld [vmem:[%s8226_s7 + $0xa0] sm:$0xff]  }
 0xfd0   :  { %v2605_v42 = vadd.f32 %v5158_v33, %v2595_v37  ;;  %v2596_v43 = vadd.f32 %v2584_v41, %v2458_v61  ;;  %v6558_v37 = vld [vmem:[%s8226_s7 + $0x90] sm:$0xff]   ;;  %v6561_v41 = vld [vmem:[%s8226_s7 + $0xa8] sm:$0xff]  }
 0xfd1   :  { %v2610_v45 = vmax.f32 %v2607_v40, 0.0  ;;  %v6560_v40 = vld [vmem:[%s8226_s7 + $0x98] sm:$0xff]  }
 0xfd2   :  { %v2606_v44 = vadd.f32 %v5158_v33, %v2596_v43  ;;  %v2608_v46 = vmax.f32 %v2605_v42, 0.0  ;;  %v6562_v42 = vld [vmem:[%s8226_s7 + $0xb0] sm:$0xff]   ;;  %v6563_v43 = vld [vmem:[%s8226_s7 + $0xb8] sm:$0xff]  }
 0xfd3   :  { %v2612_v50 = vpack.c.bf16 %v2610_v45, %v2610_v45 }
 0xfd4   :  { %v2609_v48 = vmax.f32 %v2606_v44, 0.0 }
 0xfd5   :  { %v7504_v52 = vsel %vm2618_vm2, %v2612_v50, 0 }
 0xfd6   :  { %v7500_v49 = vpack.c.bf16 %v2609_v48, %v2608_v46 }
 0xfd8   :  { %6241 = vmatpush3.bf16.msra.mxu0 %v7500_v49 }
 0xfd9   :  { %6242 = vmatprep.subr.bf16.mxu0 %v6792_v28 }
 0xfdc   :  { %6243 = vmatpush3.bf16.msra.mxu0 %v7504_v52 }
 0xfdd   :  { %6248 = vmatprep.subr.bf16.mxu0 %v6792_v28 }
 0xfdf   :  { %6245 = vmatmul.mubr.msk.bf16.vlgmr.msra.gmra.mrb[88].mxu0 %vm2614_vm3, %v2613_v53 }
 0xfe0   :  { %6249 = vmatpush3.bf16.msra.mxu0 %v7500_v49  ;;  %6252 = vmatprep.mubr.msk.bf16.mxu0 %vm6793_vm1, %v6792_v28 }
 0xfe1   :  { %6250 = vmatprep.subr.bf16.mxu0 %v6792_v28 }
 0xfe4   :  { %6251 = vmatpush3.bf16.msra.mxu0 %v7504_v52 }
 0xfe5   :  { %6256 = vmatprep.subr.bf16.mxu0 %v6792_v28 }
 0xfe7   :  { %6253 = vmatmul.mubr.msk.bf16.vlgmr.msra.gmra.mrb[92].mxu0 %vm2614_vm3, %v5160_v54 }
 0xfe8   :  { %6257 = vmatpush3.bf16.msra.mxu0 %v6542_v55  ;;  %6264 = vmatprep.mubr.msk.bf16.mxu0 %vm6793_vm1, %v6792_v28 }
 0xfe9   :  { %6258 = vmatprep.subr.bf16.mxu0 %v6792_v28 }
 0xfec   :  { %6259 = vmatpush3.bf16.msra.mxu0 %v6544_v56 }
 0xfed   :  { %6260 = vmatprep.subr.bf16.mxu0 %v6792_v28 }
 0xff0   :  { %6261 = vmatpush3.bf16.msra.mxu0 %v6546_v59 }
 0xff1   :  { %6262 = vmatprep.subr.bf16.mxu0 %v6792_v28 }
 0xff4   :  { %6263 = vmatpush3.bf16.msra.mxu0 %v6547_v60 }
 0xff5   :  { %6280 = vmatprep.subr.bf16.mxu0 %v6792_v28 }
0x10b2   :  { %v2656_v62 = vpop.f32.mrb[88].mxu0 }
0x10b3   :  { %v2662_v63 = vpack.c.bf16 %v2656_v62, %v2656_v62  ;;  %v6246_v35 = vpop.f32.mrb[89].mxu0 }
0x10b4   :  { %v2659_v0 = vpop.f32.mrb[90].mxu0 }
0x10b5   :  { %v6247_v1 = vpop.f32.mrb[91].mxu0  ;;  %6277 = vmatmul.mubr.msk.bf16.vlgmr.msra.gmra.mrb[72].mxu1 %vm2750_vm4, %v2662_v63 }
0x10b6   :  { %6296 = vmatprep.mubr.msk.bf16.mxu1 %vm6793_vm1, %v6792_v28  ;;  %6289 = vmatpush3.bf16.msra.mxu1 %v6548_v10  ;;  %v5240_v1 = vld [vmem:[%s8228_s2 + $0x6] sm:$0x1]  ;;  %v6566_v10 = vld [vmem:[%s8226_s7 + $0xd0] sm:$0xff]  }
0x10b7   :  { %6290 = vmatprep.subr.bf16.mxu1 %v6792_v28 }
0x10ba   :  { %v2710_v2 = vpop.f32.mrb[92].mxu0  ;;  %6291 = vmatpush3.bf16.msra.mxu1 %v6549_v11  ;;  %v6567_v11 = vld [vmem:[%s8226_s7 + $0xe0] sm:$0xff]  }
0x10bb   :  { %v2716_v3 = vpack.c.bf16 %v2710_v2, %v2710_v2  ;;  %v6254_v4 = vpop.f32.mrb[93].mxu0  ;;  %6292 = vmatprep.subr.bf16.mxu1 %v6792_v28 }
0x10bc   :  { %v2713_v6 = vpop.f32.mrb[94].mxu0 }
0x10bd   :  { %v6255_v7 = vpop.f32.mrb[95].mxu0  ;;  %6265 = vmatmul.mubr.msk.bf16.vlgmr.msra.gmra.mrb[96].mxu0 %vm2750_vm4, %v2716_v3  ;;  %v6564_v3 = vld [vmem:[%s8226_s7 + $0xc0] sm:$0xff]  }
0x10be   :  { %6281 = vmatpush3.bf16.msra.mxu0 %v7500_v49  ;;  %6284 = vmatprep.mubr.msk.bf16.mxu0 %vm6793_vm1, %v6792_v28 }
0x10bf   :  { %6282 = vmatprep.subr.bf16.mxu0 %v6792_v28  ;;  %6293 = vmatpush3.bf16.msra.mxu1 %v6550_v12  ;;  %v6568_v12 = vld [vmem:[%s8226_s7 + $0xd8] sm:$0xff]  }
0x10c0   :  { %6294 = vmatprep.subr.bf16.mxu1 %v6792_v28 }
0x10c2   :  { %6283 = vmatpush3.bf16.msra.mxu0 %v7504_v52 }
0x10c3   :  { %6300 = vmatprep.subr.bf16.mxu0 %v6792_v28  ;;  %6295 = vmatpush3.bf16.msra.mxu1 %v6552_v14  ;;  %v6570_v14 = vld [vmem:[%s8226_s7 + $0xf0] sm:$0xff]  }
0x10c4   :  { %6320 = vmatprep.subr.bf16.mxu1 %v6792_v28 }
0x10c5   :  { %6285 = vmatmul.mubr.msk.bf16.vlgmr.msra.gmra.mrb[100].mxu0 %vm2614_vm3, %v5180_v8  ;;  %v6565_v8 = vld [vmem:[%s8226_s7 + $0xc8] sm:$0xff]  }
0x10c6   :  { %6301 = vmatpush3.bf16.msra.mxu0 %v7500_v49  ;;  %6304 = vmatprep.mubr.msk.bf16.mxu0 %vm6793_vm1, %v6792_v28 }
0x10c7   :  { %6302 = vmatprep.subr.bf16.mxu0 %v6792_v28 }
0x10ca   :  { %6303 = vmatpush3.bf16.msra.mxu0 %v7504_v52 }
0x10cb   :  { %6308 = vmatprep.subr.bf16.mxu0 %v6792_v28 }
0x10cd   :  { %6305 = vmatmul.mubr.msk.bf16.vlgmr.msra.gmra.mrb[104].mxu0 %vm2614_vm3, %v5195_v9  ;;  %v5255_v9 = vld [vmem:[%s8228_s2 + $0x7] sm:$0x1] }
0x10ce   :  { %6316 = vmatprep.mubr.msk.bf16.mxu0 %vm6793_vm1, %v6792_v28  ;;  %6309 = vmatpush3.bf16.msra.mxu0 %v6551_v13  ;;  %v6569_v13 = vld [vmem:[%s8226_s7 + $0xe8] sm:$0xff]  }
0x10cf   :  { %6310 = vmatprep.subr.bf16.mxu0 %v6792_v28 }
0x10d2   :  { %6311 = vmatpush3.bf16.msra.mxu0 %v6553_v15  ;;  %v6571_v15 = vld [vmem:[%s8226_s7 + $0xf8] sm:$0xff]  }
0x10d3   :  { %6312 = vmatprep.subr.bf16.mxu0 %v6792_v28 }
0x10d6   :  { %6313 = vmatpush3.bf16.msra.mxu0 %v6554_v17 }
0x10d7   :  { %6314 = vmatprep.subr.bf16.mxu0 %v6792_v28 }
0x10da   :  { %6315 = vmatpush3.bf16.msra.mxu0 %v6555_v18 }
0x10db   :  { %6340 = vmatprep.subr.bf16.mxu0 %v6792_v28 }
0x1188   :  { %v2855_v47 = vpop.f32.mrb[72].mxu1 }
0x1189   :  { %v6278_v58 = vpop.f32.mrb[73].mxu1 }
0x118a   :  { %v2858_v5 = vpop.f32.mrb[74].mxu1 }
0x118b   :  { %v6279_v16 = vpop.f32.mrb[75].mxu1 }
0x1190   :  { %v2788_v27 = vpop.f32.mrb[96].mxu0 }
0x1191   :  { %v2856_v39 = vadd.f32 %v2855_v47, %v2788_v27  ;;  %v6266_v51 = vpop.f32.mrb[97].mxu0 }
0x1192   :  { %v2791_v19 = vpop.f32.mrb[98].mxu0 }
0x1193   :  { %v6267_v20 = vpop.f32.mrb[99].mxu0 }
0x1198   :  { %v2900_v61 = vpop.f32.mrb[100].mxu0 }
0x1199   :  { %v2906_v21 = vpack.c.bf16 %v2900_v61, %v2900_v61  ;;  %v6286_v22 = vpop.f32.mrb[101].mxu0 }
0x119a   :  { %v2903_v23 = vpop.f32.mrb[102].mxu0 }
0x119b   :  { %v6287_v24 = vpop.f32.mrb[103].mxu0  ;;  %6297 = vmatmul.mubr.msk.bf16.vlgmr.msra.gmra.mrb[76].mxu1 %vm2750_vm4, %v2906_v21 }
0x119c   :  { %6321 = vmatpush3.bf16.msra.mxu1 %v7500_v49  ;;  %6324 = vmatprep.mubr.msk.bf16.mxu1 %vm6793_vm1, %v6792_v28 }
0x119d   :  { %6322 = vmatprep.subr.bf16.mxu1 %v6792_v28 }
0x11a0   :  { %6323 = vmatpush3.bf16.msra.mxu1 %v7504_v52  ;;  %v3023_v25 = vpop.f32.mrb[104].mxu0 }
0x11a1   :  { %v3029_v29 = vpack.c.bf16 %v3023_v25, %v3023_v25  ;;  %6328 = vmatprep.subr.bf16.mxu1 %v6792_v28  ;;  %v6306_v31 = vpop.f32.mrb[105].mxu0  ;;  %v5270_v25 = vld [vmem:[%s8228_s2 + $0x8] sm:$0x1] }
0x11a2   :  { %v3026_v32 = vpop.f32.mrb[106].mxu0 }
0x11a3   :  { %6317 = vmatmul.mubr.msk.bf16.vlgmr.msra.gmra.mrb[108].mxu0 %vm2750_vm4, %v3029_v29  ;;  %6325 = vmatmul.mubr.msk.bf16.vlgmr.msra.gmra.mrb[80].mxu1 %vm2614_vm3, %v5210_v26  ;;  %v6307_v33 = vpop.f32.mrb[107].mxu0  ;;  %v6572_v26 = vld [vmem:[%s8226_s7 + $0x100] sm:$0xff]   ;;  %v6574_v32 = vld [vmem:[%s8226_s7 + $0x110] sm:$0xff]  }
0x11a4   :  { %6341 = vmatpush3.bf16.msra.mxu0 %v7500_v49  ;;  %6344 = vmatprep.mubr.msk.bf16.mxu0 %vm6793_vm1, %v6792_v28  ;;  %v6575_v33 = vld [vmem:[%s8226_s7 + $0x118] sm:$0xff]  }
0x11a5   :  { %6342 = vmatprep.subr.bf16.mxu0 %v6792_v28  ;;  %6329 = vmatpush3.bf16.msra.mxu1 %v6556_v30 }
0x11a6   :  { %6330 = vmatprep.subr.bf16.mxu1 %v6792_v28  ;;  %6336 = vmatprep.mubr.msk.bf16.mxu1 %vm6793_vm1, %v6792_v28 }
0x11a8   :  { %6343 = vmatpush3.bf16.msra.mxu0 %v7504_v52 }
0x11a9   :  { %6331 = vmatpush3.bf16.msra.mxu1 %v6557_v34  ;;  %6348 = vmatprep.subr.bf16.mxu0 %v6792_v28  ;;  %v6576_v34 = vld [vmem:[%s8229_s9] ss:$16 sps:$4 sm:$0xff]  }
0x11aa   :  { %6332 = vmatprep.subr.bf16.mxu1 %v6792_v28 }
0x11ab   :  { %6345 = vmatmul.mubr.msk.bf16.vlgmr.msra.gmra.mrb[112].mxu0 %vm2614_vm3, %v5225_v36  ;;  %v6578_v36 = vld [vmem:[%s8229_s9 + $0x4] ss:$16 sps:$4 sm:$0xff]  }
0x11ac   :  { %6356 = vmatprep.mubr.msk.bf16.mxu0 %vm6793_vm1, %v6792_v28  ;;  %6349 = vmatpush3.bf16.msra.mxu0 %v6559_v38  ;;  %v6582_v38 = vld [vmem:[%s8229_s9 + $0x20] ss:$16 sps:$4 sm:$0xff]  }
0x11ad   :  { %6333 = vmatpush3.bf16.msra.mxu1 %v6558_v37  ;;  %6350 = vmatprep.subr.bf16.mxu0 %v6792_v28  ;;  %v6581_v37 = vld [vmem:[%s8229_s9 + $0xc] ss:$16 sps:$4 sm:$0xff]  }
0x11ae   :  { %6334 = vmatprep.subr.bf16.mxu1 %v6792_v28 }
0x11b0   :  { %6351 = vmatpush3.bf16.msra.mxu0 %v6561_v41 }
0x11b1   :  { %6335 = vmatpush3.bf16.msra.mxu1 %v6560_v40  ;;  %6352 = vmatprep.subr.bf16.mxu0 %v6792_v28 }
0x11b2   :  { %6360 = vmatprep.subr.bf16.mxu1 %v6792_v28 }
0x11b4   :  { %6353 = vmatpush3.bf16.msra.mxu0 %v6562_v42 }
0x11b5   :  { %6354 = vmatprep.subr.bf16.mxu0 %v6792_v28 }
0x11b8   :  { %6355 = vmatpush3.bf16.msra.mxu0 %v6563_v43 }
0x11b9   :  { %6380 = vmatprep.subr.bf16.mxu0 %v6792_v28 }
0x126e   :  { %v2977_v44 = vpop.f32.mrb[76].mxu1 }
0x126f   :  { %v2983_v45 = vadd.f32 %v2977_v44, %v2856_v39  ;;  %v6298_v46 = vpop.f32.mrb[77].mxu1 }
0x1270   :  { %v2980_v48 = vpop.f32.mrb[78].mxu1 }
0x1271   :  { %v6299_v50 = vpop.f32.mrb[79].mxu1  ;;  %v6579_v48 = vld [vmem:[%s8229_s9 + $0x8] ss:$16 sps:$4 sm:$0xff]  }
0x1276   :  { %v3100_v53 = vpop.f32.mrb[108].mxu0  ;;  %v3146_v54 = vpop.f32.mrb[80].mxu1 }
0x1277   :  { %v3106_v55 = vadd.f32 %v3100_v53, %v2983_v45  ;;  %v3152_v56 = vpack.c.bf16 %v3146_v54, %v3146_v54  ;;  %v6326_v57 = vpop.f32.mrb[81].mxu1  ;;  %v6318_v59 = vpop.f32.mrb[109].mxu0 }
0x1278   :  { %v3149_v60 = vpop.f32.mrb[82].mxu1  ;;  %v3103_v62 = vpop.f32.mrb[110].mxu0 }
0x1279   :  { %v6327_v63 = vpop.f32.mrb[83].mxu1  ;;  %6337 = vmatmul.mubr.msk.bf16.vlgmr.msra.gmra.mrb[84].mxu1 %vm2750_vm4, %v3152_v56  ;;  %v6319_v35 = vpop.f32.mrb[111].mxu0  ;;  %v6587_v56 = vld [vmem:[%s8229_s9 + $0x2c] ss:$16 sps:$4 sm:$0xff]  }
0x127a   :  { %6361 = vmatpush3.bf16.msra.mxu1 %v7500_v49  ;;  %6364 = vmatprep.mubr.msk.bf16.mxu1 %vm6793_vm1, %v6792_v28  ;;  %v6585_v63 = vld [vmem:[%s8229_s9 + $0x28] ss:$16 sps:$4 sm:$0xff]   ;;  %v6590_v35 = vld [vmem:[%s8229_s9 + $0x44] ss:$16 sps:$4 sm:$0xff]  }
0x127b   :  { %6362 = vmatprep.subr.bf16.mxu1 %v6792_v28 }
0x127e   :  { %6363 = vmatpush3.bf16.msra.mxu1 %v7504_v52  ;;  %v3269_v0 = vpop.f32.mrb[112].mxu0 }
0x127f   :  { %v3275_v2 = vpack.c.bf16 %v3269_v0, %v3269_v0  ;;  %6368 = vmatprep.subr.bf16.mxu1 %v6792_v28  ;;  %v6346_v4 = vpop.f32.mrb[113].mxu0  ;;  %v6593_v0 = vld [vmem:[%s8229_s9 + $0x4c] ss:$16 sps:$4 sm:$0xff]  }
0x1280   :  { %v3272_v6 = vpop.f32.mrb[114].mxu0  ;;  %v6599_v4 = vld [vmem:[%s8229_s9 + $0x6c] ss:$16 sps:$4 sm:$0xff]  }
0x1281   :  { %6357 = vmatmul.mubr.msk.bf16.vlgmr.msra.gmra.mrb[116].mxu0 %vm2750_vm4, %v3275_v2  ;;  %6365 = vmatmul.mubr.msk.bf16.vlgmr.msra.gmra.mrb[88].mxu1 %vm2614_vm3, %v5240_v1  ;;  %v6347_v7 = vpop.f32.mrb[115].mxu0  ;;  %v6588_v1 = vld [vmem:[%s8229_s9 + $0x40] ss:$16 sps:$4 sm:$0xff]   ;;  %v6591_v2 = vld [vmem:[%s8229_s9 + $0x48] ss:$16 sps:$4 sm:$0xff]  }
0x1282   :  { %6381 = vmatpush3.bf16.msra.mxu0 %v7500_v49  ;;  %6384 = vmatprep.mubr.msk.bf16.mxu0 %vm6793_vm1, %v6792_v28  ;;  %v6594_v6 = vld [vmem:[%s8229_s9 + $0x60] ss:$16 sps:$4 sm:$0xff]   ;;  %v6597_v7 = vld [vmem:[%s8229_s9 + $0x68] ss:$16 sps:$4 sm:$0xff]  }
0x1283   :  { %6382 = vmatprep.subr.bf16.mxu0 %v6792_v28  ;;  %6369 = vmatpush3.bf16.msra.mxu1 %v6564_v3  ;;  %v6596_v3 = vld [vmem:[%s8229_s9 + $0x64] ss:$16 sps:$4 sm:$0xff]  }
0x1284   :  { %6370 = vmatprep.subr.bf16.mxu1 %v6792_v28  ;;  %6376 = vmatprep.mubr.msk.bf16.mxu1 %vm6793_vm1, %v6792_v28 }
0x1286   :  { %6383 = vmatpush3.bf16.msra.mxu0 %v7504_v52 }
0x1287   :  { %6371 = vmatpush3.bf16.msra.mxu1 %v6565_v8  ;;  %6388 = vmatprep.subr.bf16.mxu0 %v6792_v28  ;;  %v6794_v8 = vmov 0  }
0x1288   :  { %6372 = vmatprep.subr.bf16.mxu1 %v6792_v28 }
0x1289   :  { %6385 = vmatmul.mubr.msk.bf16.vlgmr.msra.gmra.mrb[120].mxu0 %vm2614_vm3, %v5255_v9  ;;  %v6602_v9 = vld [vmem:[%s8230_s11 + $0x4] ss:$16 sps:$4 sm:$0xff]  }
0x128a   :  { %6396 = vmatprep.mubr.msk.bf16.mxu0 %vm6793_vm1, %v6792_v28  ;;  %6389 = vmatpush3.bf16.msra.mxu0 %v6567_v11 }
0x128b   :  { %6373 = vmatpush3.bf16.msra.mxu1 %v6566_v10  ;;  %6390 = vmatprep.subr.bf16.mxu0 %v6792_v28  ;;  %v6605_v10 = vld [vmem:[%s8230_s11 + $0xc] ss:$16 sps:$4 sm:$0xff]  }
0x128c   :  { %6374 = vmatprep.subr.bf16.mxu1 %v6792_v28 }
0x128e   :  { %6391 = vmatpush3.bf16.msra.mxu0 %v6569_v13 }
0x128f   :  { %6375 = vmatpush3.bf16.msra.mxu1 %v6568_v12  ;;  %6392 = vmatprep.subr.bf16.mxu0 %v6792_v28  ;;  %v5285_v12 = vld [vmem:[%s8231_s8] ss:$0 sm:$0xff] }
0x1290   :  { %6400 = vmatprep.subr.bf16.mxu1 %v6792_v28 }
0x1292   :  { %6393 = vmatpush3.bf16.msra.mxu0 %v6570_v14 }
0x1293   :  { %6394 = vmatprep.subr.bf16.mxu0 %v6792_v28 }
0x1296   :  { %6395 = vmatpush3.bf16.msra.mxu0 %v6571_v15 }
0x1297   :  { %3853 = vmatprep.subr.bf16.mxu0 %v6578_v36  ;;  %v6638_v36 = vld [vmem:[%s8230_s11 + $0xc4] ss:$16 sps:$4 sm:$0xff]  }
0x134c   :  { %v3223_v17 = vpop.f32.mrb[84].mxu1 }
0x134d   :  { %v3229_v18 = vadd.f32 %v3223_v17, %v3106_v55  ;;  %v6338_v47 = vpop.f32.mrb[85].mxu1 }
0x134e   :  { %v3226_v58 = vpop.f32.mrb[86].mxu1 }
0x134f   :  { %v6339_v5 = vpop.f32.mrb[87].mxu1  ;;  %v6600_v58 = vld [vmem:[%s8230_s11] ss:$16 sps:$4 sm:$0xff]  }
0x1350   :  { %v6603_v5 = vld [vmem:[%s8230_s11 + $0x8] ss:$16 sps:$4 sm:$0xff]  }
0x1354   :  { %v3346_v16 = vpop.f32.mrb[116].mxu0  ;;  %v3392_v27 = vpop.f32.mrb[88].mxu1 }
0x1355   :  { %v3352_v39 = vadd.f32 %v3346_v16, %v3229_v18  ;;  %v3398_v51 = vpack.c.bf16 %v3392_v27, %v3392_v27  ;;  %v6366_v19 = vpop.f32.mrb[89].mxu1  ;;  %v6358_v20 = vpop.f32.mrb[117].mxu0  ;;  %v6608_v27 = vld [vmem:[%s8230_s11 + $0x24] ss:$16 sps:$4 sm:$0xff]  }
0x1356   :  { %v3395_v61 = vpop.f32.mrb[90].mxu1  ;;  %v3349_v21 = vpop.f32.mrb[118].mxu0  ;;  %v6609_v19 = vld [vmem:[%s8230_s11 + $0x28] ss:$16 sps:$4 sm:$0xff]   ;;  %v6614_v20 = vld [vmem:[%s8230_s11 + $0x44] ss:$16 sps:$4 sm:$0xff]  }
0x1357   :  { %v6367_v22 = vpop.f32.mrb[91].mxu1  ;;  %6377 = vmatmul.mubr.msk.bf16.vlgmr.msra.gmra.mrb[92].mxu1 %vm2750_vm4, %v3398_v51  ;;  %v6359_v23 = vpop.f32.mrb[119].mxu0  ;;  %v6606_v51 = vld [vmem:[%s8230_s11 + $0x20] ss:$16 sps:$4 sm:$0xff]   ;;  %v6617_v61 = vld [vmem:[%s8230_s11 + $0x4c] ss:$16 sps:$4 sm:$0xff]  }
0x1358   :  { %6401 = vmatpush3.bf16.msra.mxu1 %v7500_v49  ;;  %6404 = vmatprep.mubr.msk.bf16.mxu1 %vm6793_vm1, %v6792_v28  ;;  %v6612_v21 = vld [vmem:[%s8230_s11 + $0x40] ss:$16 sps:$4 sm:$0xff]   ;;  %v6615_v22 = vld [vmem:[%s8230_s11 + $0x48] ss:$16 sps:$4 sm:$0xff]   ;;  %v6620_v23 = vld [vmem:[%s8230_s11 + $0x64] ss:$16 sps:$4 sm:$0xff]  }
0x1359   :  { %6402 = vmatprep.subr.bf16.mxu1 %v6792_v28 }
0x135c   :  { %6403 = vmatpush3.bf16.msra.mxu1 %v7504_v52  ;;  %v3515_v24 = vpop.f32.mrb[120].mxu0  ;;  %v6573_v52 = vld [vmem:[%s8226_s7 + $0x108] sm:$0xff]  }
0x135d   :  { %v3521_v29 = vpack.c.bf16 %v3515_v24, %v3515_v24  ;;  %6408 = vmatprep.subr.bf16.mxu1 %v6792_v28  ;;  %v6386_v49 = vpop.f32.mrb[121].mxu0  ;;  %v6623_v24 = vld [vmem:[%s8230_s11 + $0x6c] ss:$16 sps:$4 sm:$0xff]  }
0x135e   :  { %v3518_v30 = vpop.f32.mrb[122].mxu0  ;;  %v6629_v49 = vld [vmem:[%s8230_s11 + $0x8c] ss:$16 sps:$4 sm:$0xff]  }
0x135f   :  { %6397 = vmatmul.mubr.msk.bf16.vlgmr.msra.gmra.mrb[124].mxu0 %vm2750_vm4, %v3521_v29  ;;  %6405 = vmatmul.mubr.msk.bf16.vlgmr.msra.gmra.mrb[96].mxu1 %vm2614_vm3, %v5270_v25  ;;  %v6387_v31 = vpop.f32.mrb[123].mxu0  ;;  %v6618_v25 = vld [vmem:[%s8230_s11 + $0x60] ss:$16 sps:$4 sm:$0xff]   ;;  %v6626_v29 = vld [vmem:[%s8230_s11 + $0x84] ss:$16 sps:$4 sm:$0xff]  }
0x1360   :  { %6409 = vmatpush3.bf16.msra.mxu1 %v6572_v26  ;;  %6416 = vmatprep.mubr.msk.bf16.mxu1 %vm6793_vm1, %v6792_v28  ;;  %v6621_v26 = vld [vmem:[%s8230_s11 + $0x68] ss:$16 sps:$4 sm:$0xff]   ;;  %v6624_v30 = vld [vmem:[%s8230_s11 + $0x80] ss:$16 sps:$4 sm:$0xff]  }
0x1361   :  { %6410 = vmatprep.subr.bf16.mxu1 %v6792_v28  ;;  %3854 = vmatpush1.bf16.msra.mxu0 %v6576_v34  ;;  %v6627_v31 = vld [vmem:[%s8230_s11 + $0x88] ss:$16 sps:$4 sm:$0xff]  }
0x1362   :  { %3885 = vmatprep.mubr.bf16.mxu0 %v6794_v8  ;;  %v6633_v34 = vld [vmem:[%s8230_s11 + $0xa8] ss:$16 sps:$4 sm:$0xff]  }
0x1364   :  { %6411 = vmatpush3.bf16.msra.mxu1 %v6573_v52  ;;  %v6632_v52 = vld [vmem:[%s8230_s11 + $0xa4] ss:$16 sps:$4 sm:$0xff]  }
0x1365   :  { %6412 = vmatprep.subr.bf16.mxu1 %v6792_v28 }
0x1368   :  { %6413 = vmatpush3.bf16.msra.mxu1 %v6574_v32  ;;  %v6635_v32 = vld [vmem:[%s8230_s11 + $0xac] ss:$16 sps:$4 sm:$0xff]  }
0x1369   :  { %6414 = vmatprep.subr.bf16.mxu1 %v6792_v28  ;;  %v6584_v28 = vld [vmem:[%s8229_s9 + $0x24] ss:$16 sps:$4 sm:$0xff]  }
0x136a   :  { %3855 = vmatprep.subr.bf16.mxu0 %v6584_v28  ;;  %v6636_v28 = vld [vmem:[%s8230_s11 + $0xc0] ss:$16 sps:$4 sm:$0xff]  }
0x136b   :  { %3856 = vmatpush1.bf16.msra.mxu0 %v6582_v38  ;;  %v6639_v38 = vld [vmem:[%s8230_s11 + $0xc8] ss:$16 sps:$4 sm:$0xff]  }
0x136c   :  { %6415 = vmatpush3.bf16.msra.mxu1 %v6575_v33  ;;  %3857 = vmatprep.subr.bf16.mxu0 %v6590_v35  ;;  %v6630_v33 = vld [vmem:[%s8230_s11 + $0xa0] ss:$16 sps:$4 sm:$0xff]  }
0x136d   :  { %3894 = vmatprep.subr.bf16.mxu1 %v6581_v37  ;;  %v6641_v37 = vld [vmem:[%s8230_s11 + $0xcc] ss:$16 sps:$4 sm:$0xff]   ;;  %v6666_v35 = vld [vmem:[%s8230_s11 + $0x160] ss:$16 sps:$4 sm:$0xff]  }
0x136f   :  { %3858 = vmatpush1.bf16.msra.mxu0 %v6588_v1  ;;  %v6674_v1 = vld [vmem:[%s8230_s11 + $0x184] ss:$16 sps:$4 sm:$0xff]  }
0x1370   :  { %3859 = vmatprep.subr.bf16.mxu0 %v6596_v3  ;;  %v6672_v3 = vld [vmem:[%s8230_s11 + $0x180] ss:$16 sps:$4 sm:$0xff]  }
0x1373   :  { %3860 = vmatpush1.bf16.msra.mxu0 %v6594_v6  ;;  %v6680_v6 = vld [vmem:[%s8230_s11 + $0x1a4] ss:$16 sps:$4 sm:$0xff]  }
0x1374   :  { %4733 = vmatprep.subr.bf16.mxu0 %v6602_v9  ;;  %v6681_v9 = vld [vmem:[%s8230_s11 + $0x1a8] ss:$16 sps:$4 sm:$0xff]  }
0x142a   :  { %v3469_v40 = vpop.f32.mrb[92].mxu1 }
0x142b   :  { %v3475_v41 = vadd.f32 %v3469_v40, %v3352_v39  ;;  %v6378_v42 = vpop.f32.mrb[93].mxu1  ;;  %v6611_v39 = vld [vmem:[%s8230_s11 + $0x2c] ss:$16 sps:$4 sm:$0xff]   ;;  %v6644_v40 = vld [vmem:[%s8230_s11 + $0xe4] ss:$16 sps:$4 sm:$0xff]  }
0x142c   :  { %v3472_v43 = vpop.f32.mrb[94].mxu1  ;;  %v6642_v42 = vld [vmem:[%s8230_s11 + $0xe0] ss:$16 sps:$4 sm:$0xff]  }
0x142d   :  { %v6379_v44 = vpop.f32.mrb[95].mxu1  ;;  %v6645_v43 = vld [vmem:[%s8230_s11 + $0xe8] ss:$16 sps:$4 sm:$0xff]  }
0x142e   :  { %v6650_v44 = vld [vmem:[%s8230_s11 + $0x104] ss:$16 sps:$4 sm:$0xff]  }
0x1432   :  { %v3592_v45 = vpop.f32.mrb[124].mxu0  ;;  %v3638_v46 = vpop.f32.mrb[96].mxu1 }
0x1433   :  { %v3598_v50 = vadd.f32 %v3592_v45, %v3475_v41  ;;  %v3644_v53 = vpack.c.bf16 %v3638_v46, %v3638_v46  ;;  %v6406_v54 = vpop.f32.mrb[97].mxu1  ;;  %v6398_v55 = vpop.f32.mrb[125].mxu0  ;;  %v6647_v41 = vld [vmem:[%s8230_s11 + $0xec] ss:$16 sps:$4 sm:$0xff]   ;;  %v6648_v46 = vld [vmem:[%s8230_s11 + $0x100] ss:$16 sps:$4 sm:$0xff]  }
0x1434   :  { %v3641_v57 = vpop.f32.mrb[98].mxu1  ;;  %v3595_v59 = vpop.f32.mrb[126].mxu0  ;;  %v6653_v45 = vld [vmem:[%s8230_s11 + $0x10c] ss:$16 sps:$4 sm:$0xff]   ;;  %v6654_v54 = vld [vmem:[%s8230_s11 + $0x120] ss:$16 sps:$4 sm:$0xff]  }
0x1435   :  { %v6407_v60 = vpop.f32.mrb[99].mxu1  ;;  %6417 = vmatmul.mubr.msk.bf16.vlgmr.msra.gmra.mrb[100].mxu1 %vm2750_vm4, %v3644_v53  ;;  %v6399_v62 = vpop.f32.mrb[127].mxu0  ;;  %v6659_v53 = vld [vmem:[%s8230_s11 + $0x12c] ss:$16 sps:$4 sm:$0xff]   ;;  %v6657_v55 = vld [vmem:[%s8230_s11 + $0x128] ss:$16 sps:$4 sm:$0xff]  }
0x1436   :  { %3895 = vmatpush1.bf16.msra.mxu1 %v6579_v48  ;;  %3926 = vmatprep.mubr.bf16.mxu1 %v6794_v8  ;;  %v6651_v48 = vld [vmem:[%s8230_s11 + $0x108] ss:$16 sps:$4 sm:$0xff]   ;;  %v6665_v57 = vld [vmem:[%s8230_s11 + $0x14c] ss:$16 sps:$4 sm:$0xff]   ;;  %v6660_v59 = vld [vmem:[%s8230_s11 + $0x140] ss:$16 sps:$4 sm:$0xff]  }
0x1437   :  { %3896 = vmatprep.subr.bf16.mxu1 %v6587_v56  ;;  %v6662_v56 = vld [vmem:[%s8230_s11 + $0x144] ss:$16 sps:$4 sm:$0xff]   ;;  %v6663_v60 = vld [vmem:[%s8230_s11 + $0x148] ss:$16 sps:$4 sm:$0xff]   ;;  %v6678_v8 = vld [vmem:[%s8230_s11 + $0x1a0] ss:$16 sps:$4 sm:$0xff]  }
0x1438   :  { %v6668_v62 = vld [vmem:[%s8230_s11 + $0x164] ss:$16 sps:$4 sm:$0xff]  }
0x143a   :  { %3897 = vmatpush1.bf16.msra.mxu1 %v6585_v63  ;;  %v6671_v63 = vld [vmem:[%s8230_s11 + $0x16c] ss:$16 sps:$4 sm:$0xff]  }
0x143b   :  { %3898 = vmatprep.subr.bf16.mxu1 %v6593_v0  ;;  %v6669_v0 = vld [vmem:[%s8230_s11 + $0x168] ss:$16 sps:$4 sm:$0xff]  }
0x143e   :  { %3899 = vmatpush1.bf16.msra.mxu1 %v6591_v2  ;;  %v6677_v2 = vld [vmem:[%s8230_s11 + $0x18c] ss:$16 sps:$4 sm:$0xff]  }
0x143f   :  { %3900 = vmatprep.subr.bf16.mxu1 %v6599_v4  ;;  %v6675_v4 = vld [vmem:[%s8230_s11 + $0x188] ss:$16 sps:$4 sm:$0xff]  }
0x1442   :  { %3901 = vmatpush1.bf16.msra.mxu1 %v6597_v7  ;;  %v6683_v7 = vld [vmem:[%s8230_s11 + $0x1ac] ss:$16 sps:$4 sm:$0xff]  }
0x1443   :  { %4815 = vmatprep.subr.bf16.mxu1 %v6605_v10  ;;  %v6686_v10 = vld [vmem:[%s8230_s11 + $0x1c4] ss:$16 sps:$4 sm:$0xff]  }
0x1508   :  { %v3715_v11 = vpop.f32.mrb[100].mxu1 }
0x1509   :  { %v3721_v13 = vadd.f32 %v3715_v11, %v3598_v50  ;;  %v6418_v14 = vpop.f32.mrb[101].mxu1  ;;  %v6656_v50 = vld [vmem:[%s8230_s11 + $0x124] ss:$16 sps:$4 sm:$0xff]   ;;  %v6689_v11 = vld [vmem:[%s8230_s11 + $0x1cc] ss:$16 sps:$4 sm:$0xff]  }
0x150a   :  { %v3718_v15 = vpop.f32.mrb[102].mxu1  ;;  %v6692_v14 = vld [vmem:[%s8230_s11 + $0x1e4] ss:$16 sps:$4 sm:$0xff]  }
0x150b   :  { %v3729_v17 = vadd.f32 %v5285_v12, %v3721_v13  ;;  %v6419_v18 = vpop.f32.mrb[103].mxu1  ;;  %v6684_v12 = vld [vmem:[%s8230_s11 + $0x1c0] ss:$16 sps:$4 sm:$0xff]   ;;  %v6687_v13 = vld [vmem:[%s8230_s11 + $0x1c8] ss:$16 sps:$4 sm:$0xff]  }
0x150c   :  { %v6695_v15 = vld [vmem:[%s8230_s11 + $0x1ec] ss:$16 sps:$4 sm:$0xff]   ;;  %v6693_v18 = vld [vmem:[%s8230_s11 + $0x1e8] ss:$16 sps:$4 sm:$0xff]  }
0x150d   :  { %v3730_v47 = vmax.f32 %v3729_v17, 0.0  ;;  %v6690_v17 = vld [vmem:[%s8230_s11 + $0x1e0] ss:$16 sps:$4 sm:$0xff]  }
0x150f   :  { %v3731_v16 = vpack.c.bf16 %v3730_v47, %v3730_v47  ;;  %v6698_v47 = vld [vmem:[%s8230_s11 + $0x204] ss:$16 sps:$4 sm:$0xff]  }
0x1511   :  { %5302 = vmatmul.mubr.msk.bf16.vlgmr.msra.gmra.mrb[128].mxu0 %vm2750_vm4, %v3731_v16  ;;  %5303 = vmatmul.mubr.msk.bf16.vlgmr.msra.gmra.mrb[104].mxu1 %vm2750_vm4, %v3731_v16 }
0x1512   :  { %4734 = vmatpush1.bf16.msra.mxu0 %v6600_v58  ;;  %4816 = vmatpush1.bf16.msra.mxu1 %v6603_v5  ;;  %v6701_v58 = vld [vmem:[%s8230_s11 + $0x20c] ss:$16 sps:$4 sm:$0xff]   ;;  %v3750_v5 = vlaneseq }
0x1513   :  { %4735 = vmatprep.subr.bf16.mxu0 %v6608_v27  ;;  %4817 = vmatprep.subr.bf16.mxu1 %v6611_v39  ;;  %v8004_v39 = vld [vmem:[%s8232_s10] sm:$0xf] }
0x1514   :  { %v7998_v16 = vshrl.u32 %v3750_v5, 7  ;;  %v6758_v5 = vld [vmem:[%s8230_s11 + $0x344] ss:$16 sps:$4 sm:$0xff]  }
0x1516   :  { %4736 = vmatpush1.bf16.msra.mxu0 %v6606_v51  ;;  %4818 = vmatpush1.bf16.msra.mxu1 %v6609_v19  ;;  %v3752_v27 = vsub.s32 0, %v7998_v16  ;;  %v3756_v51 = vsub.s32 1, %v7998_v16  ;;  %v3764_v19 = vsub.s32 3, %v7998_v16 }
0x1517   :  { %4737 = vmatprep.subr.bf16.mxu0 %v6614_v20  ;;  %4819 = vmatprep.subr.bf16.mxu1 %v6617_v61 }
0x1518   :  { %v3753_v20 = vrot.slane %v8004_v39, %v3752_v27  ;;  %v3757_v61 = vrot.slane %v8004_v39, %v3756_v51 }
0x151a   :  { %4738 = vmatpush1.bf16.msra.mxu0 %v6612_v21  ;;  %4820 = vmatpush1.bf16.msra.mxu1 %v6615_v22  ;;  %v3765_v21 = vrot.slane %v8004_v39, %v3764_v19 }
0x151b   :  { %4739 = vmatprep.subr.bf16.mxu0 %v6620_v23  ;;  %4821 = vmatprep.subr.bf16.mxu1 %v6623_v24 }
0x151e   :  { %4740 = vmatpush1.bf16.msra.mxu0 %v6618_v25  ;;  %4822 = vmatpush1.bf16.msra.mxu1 %v6621_v26 }
0x151f   :  { %4741 = vmatprep.subr.bf16.mxu0 %v6626_v29  ;;  %4823 = vmatprep.subr.bf16.mxu1 %v6629_v49 }
0x1522   :  { %4742 = vmatpush1.bf16.msra.mxu0 %v6624_v30  ;;  %4824 = vmatpush1.bf16.msra.mxu1 %v6627_v31 }
0x1523   :  { %4743 = vmatprep.subr.bf16.mxu0 %v6632_v52  ;;  %4825 = vmatprep.subr.bf16.mxu1 %v6635_v32 }
0x1526   :  { %4744 = vmatpush1.bf16.msra.mxu0 %v6630_v33  ;;  %4826 = vmatpush1.bf16.msra.mxu1 %v6633_v34 }
0x1527   :  { %4745 = vmatprep.subr.bf16.mxu0 %v6638_v36  ;;  %4827 = vmatprep.subr.bf16.mxu1 %v6641_v37 }
0x152a   :  { %4746 = vmatpush1.bf16.msra.mxu0 %v6636_v28  ;;  %4828 = vmatpush1.bf16.msra.mxu1 %v6639_v38  ;;  %v6696_v28 = vld [vmem:[%s8230_s11 + $0x200] ss:$16 sps:$4 sm:$0xff]   ;;  %v6699_v38 = vld [vmem:[%s8230_s11 + $0x208] ss:$16 sps:$4 sm:$0xff]  }
0x152b   :  { %4747 = vmatprep.subr.bf16.mxu0 %v6644_v40  ;;  %4829 = vmatprep.subr.bf16.mxu1 %v6647_v41  ;;  %v6704_v41 = vld [vmem:[%s8230_s11 + $0x224] ss:$16 sps:$4 sm:$0xff]  }
0x152e   :  { %4748 = vmatpush1.bf16.msra.mxu0 %v6642_v42  ;;  %4830 = vmatpush1.bf16.msra.mxu1 %v6645_v43  ;;  %v6707_v42 = vld [vmem:[%s8230_s11 + $0x22c] ss:$16 sps:$4 sm:$0xff]  }
0x152f   :  { %4749 = vmatprep.subr.bf16.mxu0 %v6650_v44  ;;  %4831 = vmatprep.subr.bf16.mxu1 %v6653_v45  ;;  %v6702_v44 = vld [vmem:[%s8230_s11 + $0x220] ss:$16 sps:$4 sm:$0xff]   ;;  %v6705_v45 = vld [vmem:[%s8230_s11 + $0x228] ss:$16 sps:$4 sm:$0xff]  }
0x1532   :  { %4750 = vmatpush1.bf16.msra.mxu0 %v6648_v46  ;;  %4832 = vmatpush1.bf16.msra.mxu1 %v6651_v48  ;;  %v6710_v46 = vld [vmem:[%s8230_s11 + $0x244] ss:$16 sps:$4 sm:$0xff]   ;;  %v6713_v48 = vld [vmem:[%s8230_s11 + $0x24c] ss:$16 sps:$4 sm:$0xff]  }
0x1533   :  { %4751 = vmatprep.subr.bf16.mxu0 %v6656_v50  ;;  %4833 = vmatprep.subr.bf16.mxu1 %v6659_v53  ;;  %v6708_v50 = vld [vmem:[%s8230_s11 + $0x240] ss:$16 sps:$4 sm:$0xff]   ;;  %v6711_v53 = vld [vmem:[%s8230_s11 + $0x248] ss:$16 sps:$4 sm:$0xff]  }
0x1536   :  { %4752 = vmatpush1.bf16.msra.mxu0 %v6654_v54  ;;  %4834 = vmatpush1.bf16.msra.mxu1 %v6657_v55  ;;  %v6716_v54 = vld [vmem:[%s8230_s11 + $0x264] ss:$16 sps:$4 sm:$0xff]   ;;  %v6719_v55 = vld [vmem:[%s8230_s11 + $0x26c] ss:$16 sps:$4 sm:$0xff]  }
0x1537   :  { %4753 = vmatprep.subr.bf16.mxu0 %v6662_v56  ;;  %4835 = vmatprep.subr.bf16.mxu1 %v6665_v57  ;;  %v6714_v56 = vld [vmem:[%s8230_s11 + $0x260] ss:$16 sps:$4 sm:$0xff]   ;;  %v6717_v57 = vld [vmem:[%s8230_s11 + $0x268] ss:$16 sps:$4 sm:$0xff]  }
0x153a   :  { %4754 = vmatpush1.bf16.msra.mxu0 %v6660_v59  ;;  %4836 = vmatpush1.bf16.msra.mxu1 %v6663_v60  ;;  %v6722_v59 = vld [vmem:[%s8230_s11 + $0x284] ss:$16 sps:$4 sm:$0xff]   ;;  %v6725_v60 = vld [vmem:[%s8230_s11 + $0x28c] ss:$16 sps:$4 sm:$0xff]  }
0x153b   :  { %4755 = vmatprep.subr.bf16.mxu0 %v6668_v62  ;;  %4837 = vmatprep.subr.bf16.mxu1 %v6671_v63  ;;  %v6720_v62 = vld [vmem:[%s8230_s11 + $0x280] ss:$16 sps:$4 sm:$0xff]   ;;  %v6723_v63 = vld [vmem:[%s8230_s11 + $0x288] ss:$16 sps:$4 sm:$0xff]  }
0x153e   :  { %4756 = vmatpush1.bf16.msra.mxu0 %v6666_v35  ;;  %4838 = vmatpush1.bf16.msra.mxu1 %v6669_v0  ;;  %v6728_v35 = vld [vmem:[%s8230_s11 + $0x2a4] ss:$16 sps:$4 sm:$0xff]   ;;  %v6731_v0 = vld [vmem:[%s8230_s11 + $0x2ac] ss:$16 sps:$4 sm:$0xff]  }
0x153f   :  { %4757 = vmatprep.subr.bf16.mxu0 %v6674_v1  ;;  %4839 = vmatprep.subr.bf16.mxu1 %v6677_v2  ;;  %v6726_v1 = vld [vmem:[%s8230_s11 + $0x2a0] ss:$16 sps:$4 sm:$0xff]   ;;  %v6729_v2 = vld [vmem:[%s8230_s11 + $0x2a8] ss:$16 sps:$4 sm:$0xff]  }
0x1542   :  { %4758 = vmatpush1.bf16.msra.mxu0 %v6672_v3  ;;  %4840 = vmatpush1.bf16.msra.mxu1 %v6675_v4  ;;  %v6734_v3 = vld [vmem:[%s8230_s11 + $0x2c4] ss:$16 sps:$4 sm:$0xff]   ;;  %v6737_v4 = vld [vmem:[%s8230_s11 + $0x2cc] ss:$16 sps:$4 sm:$0xff]  }
0x1543   :  { %4759 = vmatprep.subr.bf16.mxu0 %v6680_v6  ;;  %4841 = vmatprep.subr.bf16.mxu1 %v6683_v7  ;;  %v6732_v6 = vld [vmem:[%s8230_s11 + $0x2c0] ss:$16 sps:$4 sm:$0xff]   ;;  %v6735_v7 = vld [vmem:[%s8230_s11 + $0x2c8] ss:$16 sps:$4 sm:$0xff]  }
0x1546   :  { %4760 = vmatpush1.bf16.msra.mxu0 %v6678_v8  ;;  %4842 = vmatpush1.bf16.msra.mxu1 %v6681_v9  ;;  %v6740_v8 = vld [vmem:[%s8230_s11 + $0x2e4] ss:$16 sps:$4 sm:$0xff]   ;;  %v6743_v9 = vld [vmem:[%s8230_s11 + $0x2ec] ss:$16 sps:$4 sm:$0xff]  }
0x1547   :  { %4761 = vmatprep.subr.bf16.mxu0 %v6686_v10  ;;  %4843 = vmatprep.subr.bf16.mxu1 %v6689_v11  ;;  %v6738_v10 = vld [vmem:[%s8230_s11 + $0x2e0] ss:$16 sps:$4 sm:$0xff]   ;;  %v6741_v11 = vld [vmem:[%s8230_s11 + $0x2e8] ss:$16 sps:$4 sm:$0xff]  }
0x154a   :  { %4762 = vmatpush1.bf16.msra.mxu0 %v6684_v12  ;;  %4844 = vmatpush1.bf16.msra.mxu1 %v6687_v13  ;;  %v6746_v12 = vld [vmem:[%s8230_s11 + $0x304] ss:$16 sps:$4 sm:$0xff]   ;;  %v6749_v13 = vld [vmem:[%s8230_s11 + $0x30c] ss:$16 sps:$4 sm:$0xff]  }
0x154b   :  { %4763 = vmatprep.subr.bf16.mxu0 %v6692_v14  ;;  %4845 = vmatprep.subr.bf16.mxu1 %v6695_v15  ;;  %v6744_v14 = vld [vmem:[%s8230_s11 + $0x300] ss:$16 sps:$4 sm:$0xff]   ;;  %v6747_v15 = vld [vmem:[%s8230_s11 + $0x308] ss:$16 sps:$4 sm:$0xff]  }
0x154e   :  { %4764 = vmatpush1.bf16.msra.mxu0 %v6690_v17  ;;  %4846 = vmatpush1.bf16.msra.mxu1 %v6693_v18  ;;  %v6752_v17 = vld [vmem:[%s8230_s11 + $0x324] ss:$16 sps:$4 sm:$0xff]   ;;  %v6755_v18 = vld [vmem:[%s8230_s11 + $0x32c] ss:$16 sps:$4 sm:$0xff]  }
0x154f   :  { %4774 = vmatprep.subr.bf16.mxu0 %v6698_v47  ;;  %4856 = vmatprep.subr.bf16.mxu1 %v6701_v58  ;;  %v6750_v47 = vld [vmem:[%s8230_s11 + $0x320] ss:$16 sps:$4 sm:$0xff]   ;;  %v6753_v58 = vld [vmem:[%s8230_s11 + $0x328] ss:$16 sps:$4 sm:$0xff]  }
0x15e4   :  { %v3887_v22 = vpop.f32.mrb[128].mxu0  ;;  %v8017_v23 = vpop.f32.mrb[104].mxu1 }
0x15e5   :  { %v3888_v24 = vadd.f32 %v3887_v22, %v3753_v20  ;;  %v3889_v25 = vpop.f32.mrb[129].mxu0  ;;  %v3930_v26 = vpop.f32.mrb[105].mxu1  ;;  %v6761_v20 = vld [vmem:[%s8230_s11 + $0x34c] ss:$16 sps:$4 sm:$0xff]   ;;  %v6764_v22 = vld [vmem:[%s8230_s11 + $0x364] ss:$16 sps:$4 sm:$0xff]  }
0x15e6   :  { %v3890_v29 = vadd.f32 %v3889_v25, %v3757_v61  ;;  %v3931_v49 = vadd.f32 %v3930_v26, %v3765_v21  ;;  %v3891_v30 = vpop.f32.mrb[130].mxu0  ;;  %v3932_v31 = vpop.f32.mrb[106].mxu1  ;;  %v6756_v61 = vld [vmem:[%s8230_s11 + $0x340] ss:$16 sps:$4 sm:$0xff]   ;;  %v6759_v21 = vld [vmem:[%s8230_s11 + $0x348] ss:$16 sps:$4 sm:$0xff]  }
0x15e7   :  { %v3935_v52 = vmax.f32 %v3888_v24, 0.0  ;;  %v3892_v32 = vpop.f32.mrb[131].mxu0  ;;  %v3933_v33 = vpop.f32.mrb[107].mxu1  ;;  %v6767_v24 = vld [vmem:[%s8230_s11 + $0x36c] ss:$16 sps:$4 sm:$0xff]  }
0x15e8   :  { %v3936_v34 = vmax.f32 %v3890_v29, 0.0  ;;  %v3938_v36 = vmax.f32 %v3931_v49, 0.0  ;;  %v6762_v25 = vld [vmem:[%s8230_s11 + $0x360] ss:$16 sps:$4 sm:$0xff]   ;;  %v6765_v26 = vld [vmem:[%s8230_s11 + $0x368] ss:$16 sps:$4 sm:$0xff]  }
0x15e9   :  { %v3939_v40 = vpack.c.bf16 %v3935_v52, %v3935_v52  ;;  %v6770_v29 = vld [vmem:[%s8230_s11 + $0x384] ss:$16 sps:$4 sm:$0xff]   ;;  %v6773_v49 = vld [vmem:[%s8230_s11 + $0x38c] ss:$16 sps:$4 sm:$0xff]   ;;  %v6768_v30 = vld [vmem:[%s8230_s11 + $0x380] ss:$16 sps:$4 sm:$0xff]  }
0x15ea   :  { %v3940_v37 = vpack.c.bf16 %v3936_v34, %v3936_v34  ;;  %v3942_v43 = vpack.c.bf16 %v3938_v36, %v3938_v36  ;;  %v6771_v31 = vld [vmem:[%s8230_s11 + $0x388] ss:$16 sps:$4 sm:$0xff]   ;;  %v3760_v52 = vsub.s32 2, %v7998_v16  ;;  %v6776_v32 = vld [vmem:[%s8230_s11 + $0x3a4] ss:$16 sps:$4 sm:$0xff]  }
0x15eb   :  { %v6779_v33 = vld [vmem:[%s8230_s11 + $0x3ac] ss:$16 sps:$4 sm:$0xff]   ;;  %v6774_v34 = vld [vmem:[%s8230_s11 + $0x3a0] ss:$16 sps:$4 sm:$0xff]   ;;  %v6777_v36 = vld [vmem:[%s8230_s11 + $0x3a8] ss:$16 sps:$4 sm:$0xff]  }
0x15ec   :  { %4765 = vmatprep.mubr.bf16.mxu0 %v3940_v37  ;;  %4847 = vmatprep.mubr.bf16.mxu1 %v3940_v37  ;;  %v3761_v37 = vrot.slane %v8004_v39, %v3760_v52  ;;  %v6783_v39 = vld [vmem:[%s8230_s11 + $0x3c8] ss:$16 sps:$4 sm:$0xff]  }
0x15ed   :  { %4766 = vmatmul.mubr.bf16.vlgmr.msra.gmra.mrb[132].mxu0 %v3939_v40  ;;  %4848 = vmatmul.mubr.bf16.vlgmr.msra.gmra.mrb[108].mxu1 %v3939_v40  ;;  %v6780_v40 = vld [vmem:[%s8230_s11 + $0x3c0] ss:$16 sps:$4 sm:$0xff]  }
0x15ee   :  { %4775 = vmatpush1.bf16.msra.mxu0 %v6696_v28  ;;  %4857 = vmatpush1.bf16.msra.mxu1 %v6699_v38  ;;  %v6782_v28 = vld [vmem:[%s8230_s11 + $0x3c4] ss:$16 sps:$4 sm:$0xff]   ;;  %v6785_v38 = vld [vmem:[%s8230_s11 + $0x3cc] ss:$16 sps:$4 sm:$0xff]  }
0x15ef   :  { %4806 = vmatprep.mubr.bf16.mxu0 %v3942_v43  ;;  %4888 = vmatprep.mubr.bf16.mxu1 %v3942_v43  ;;  %v6791_v43 = vld [vmem:[%s8230_s11 + $0x3ec] ss:$16 sps:$4 sm:$0xff]  }
0x15f0   :  { %4776 = vmatprep.subr.bf16.mxu0 %v6704_v41  ;;  %4858 = vmatprep.subr.bf16.mxu1 %v6707_v42  ;;  %v3929_v41 = vadd.f32 %v8017_v23, %v3761_v37  ;;  %v6788_v42 = vld [vmem:[%s8230_s11 + $0x3e4] ss:$16 sps:$4 sm:$0xff]   ;;  %v6789_v23 = vld [vmem:[%s8230_s11 + $0x3e8] ss:$16 sps:$4 sm:$0xff]  }
0x15f2   :  { %4777 = vmatpush1.bf16.msra.mxu0 %v6702_v44  ;;  %4859 = vmatpush1.bf16.msra.mxu1 %v6705_v45  ;;  %v6786_v44 = vld [vmem:[%s8230_s11 + $0x3e0] ss:$16 sps:$4 sm:$0xff]   ;;  %v3937_v45 = vmax.f32 %v3929_v41, 0.0 }
0x15f3   :  { %4778 = vmatprep.subr.bf16.mxu0 %v6710_v46  ;;  %4860 = vmatprep.subr.bf16.mxu1 %v6713_v48  ;;  %v4071_v48 = vld [vmem:[%s8233_s12] sm:$0xf] }
0x15f4   :  { %v3941_v46 = vpack.c.bf16 %v3937_v45, %v3937_v45 }
0x15f6   :  { %4779 = vmatpush1.bf16.msra.mxu0 %v6708_v50  ;;  %4861 = vmatpush1.bf16.msra.mxu1 %v6711_v53  ;;  %v6795_v50 = vmov 1983009808  }
0x15f7   :  { %4780 = vmatprep.subr.bf16.mxu0 %v6716_v54  ;;  %4862 = vmatprep.subr.bf16.mxu1 %v6719_v55  ;;  %v4904_v53 = vunpack.c.l.s4 %v6795_v50  ;;  %v4076_v54 = vrot.slane %v4071_v48, %v3752_v27  ;;  %v4084_v55 = vrot.slane %v4071_v48, %v3760_v52 }
0x15fa   :  { %4781 = vmatpush1.bf16.msra.mxu0 %v6714_v56  ;;  %4863 = vmatpush1.bf16.msra.mxu1 %v6717_v57  ;;  %v4080_v56 = vrot.slane %v4071_v48, %v3756_v51  ;;  %v4905_v57 = vunpack.c.0.s8 %v4904_v53 }
0x15fb   :  { %4782 = vmatprep.subr.bf16.mxu0 %v6722_v59  ;;  %4864 = vmatprep.subr.bf16.mxu1 %v6725_v60  ;;  %v4088_v59 = vrot.slane %v4071_v48, %v3764_v19 }
0x15fe   :  { %4783 = vmatpush1.bf16.msra.mxu0 %v6720_v62  ;;  %4865 = vmatpush1.bf16.msra.mxu1 %v6723_v63 }
0x15ff   :  { %4784 = vmatprep.subr.bf16.mxu0 %v6728_v35  ;;  %4866 = vmatprep.subr.bf16.mxu1 %v6731_v0 }
0x1602   :  { %4785 = vmatpush1.bf16.msra.mxu0 %v6726_v1  ;;  %4867 = vmatpush1.bf16.msra.mxu1 %v6729_v2 }
0x1603   :  { %4786 = vmatprep.subr.bf16.mxu0 %v6734_v3  ;;  %4868 = vmatprep.subr.bf16.mxu1 %v6737_v4  ;;  %v4908_v3 = vsub.s32 %v4905_v57, %v7998_v16 }
0x1606   :  { %4787 = vmatpush1.bf16.msra.mxu0 %v6732_v6  ;;  %4869 = vmatpush1.bf16.msra.mxu1 %v6735_v7 }
0x1607   :  { %4788 = vmatprep.subr.bf16.mxu0 %v6740_v8  ;;  %4870 = vmatprep.subr.bf16.mxu1 %v6743_v9 }
0x160a   :  { %4789 = vmatpush1.bf16.msra.mxu0 %v6738_v10  ;;  %4871 = vmatpush1.bf16.msra.mxu1 %v6741_v11 }
0x160b   :  { %4790 = vmatprep.subr.bf16.mxu0 %v6746_v12  ;;  %4872 = vmatprep.subr.bf16.mxu1 %v6749_v13 }
0x160e   :  { %4791 = vmatpush1.bf16.msra.mxu0 %v6744_v14  ;;  %4873 = vmatpush1.bf16.msra.mxu1 %v6747_v15 }
0x160f   :  { %4792 = vmatprep.subr.bf16.mxu0 %v6752_v17  ;;  %4874 = vmatprep.subr.bf16.mxu1 %v6755_v18 }
0x1612   :  { %4793 = vmatpush1.bf16.msra.mxu0 %v6750_v47  ;;  %4875 = vmatpush1.bf16.msra.mxu1 %v6753_v58 }
0x1613   :  { %4794 = vmatprep.subr.bf16.mxu0 %v6758_v5  ;;  %4876 = vmatprep.subr.bf16.mxu1 %v6761_v20 }
0x1616   :  { %4795 = vmatpush1.bf16.msra.mxu0 %v6756_v61  ;;  %4877 = vmatpush1.bf16.msra.mxu1 %v6759_v21 }
0x1617   :  { %4796 = vmatprep.subr.bf16.mxu0 %v6764_v22  ;;  %4878 = vmatprep.subr.bf16.mxu1 %v6767_v24 }
0x161a   :  { %4797 = vmatpush1.bf16.msra.mxu0 %v6762_v25  ;;  %4879 = vmatpush1.bf16.msra.mxu1 %v6765_v26 }
0x161b   :  { %4798 = vmatprep.subr.bf16.mxu0 %v6770_v29  ;;  %4880 = vmatprep.subr.bf16.mxu1 %v6773_v49 }
0x161e   :  { %4799 = vmatpush1.bf16.msra.mxu0 %v6768_v30  ;;  %4881 = vmatpush1.bf16.msra.mxu1 %v6771_v31 }
0x161f   :  { %4800 = vmatprep.subr.bf16.mxu0 %v6776_v32  ;;  %4882 = vmatprep.subr.bf16.mxu1 %v6779_v33 }
0x1622   :  { %4801 = vmatpush1.bf16.msra.mxu0 %v6774_v34  ;;  %4883 = vmatpush1.bf16.msra.mxu1 %v6777_v36 }
0x1623   :  { %4802 = vmatprep.subr.bf16.mxu0 %v6782_v28  ;;  %4884 = vmatprep.subr.bf16.mxu1 %v6785_v38 }
0x1626   :  { %4803 = vmatpush1.bf16.msra.mxu0 %v6780_v40  ;;  %4885 = vmatpush1.bf16.msra.mxu1 %v6783_v39 }
0x1627   :  { %4804 = vmatprep.subr.bf16.mxu0 %v6788_v42  ;;  %4886 = vmatprep.subr.bf16.mxu1 %v6791_v43 }
0x162a   :  { %4805 = vmatpush1.bf16.msra.mxu0 %v6786_v44  ;;  %4887 = vmatpush1.bf16.msra.mxu1 %v6789_v23 }
0x162d   :  { %4807 = vmatmul.mubr.bf16.vlgmr.msra.gmra.mrb[132].mxu0 %v3941_v46  ;;  %4889 = vmatmul.mubr.bf16.vlgmr.msra.gmra.mrb[108].mxu1 %v3941_v46 }
0x1700   :  { %v4808_v60 = vpop.f32.mrb[132].mxu0  ;;  %v4890_v62 = vpop.f32.mrb[108].mxu1 }
0x1701   :  { %v6420_v63 = vadd.f32 %v4808_v60, %v4076_v54  ;;  %v6422_v35 = vadd.f32 %v4890_v62, %v4084_v55  ;;  %v4810_v0 = vpop.f32.mrb[133].mxu0  ;;  %v4892_v1 = vpop.f32.mrb[109].mxu1 }
0x1702   :  { %v6421_v2 = vadd.f32 %v4810_v0, %v4080_v56  ;;  %v6423_v4 = vadd.f32 %v4892_v1, %v4088_v59  ;;  %v4812_v6 = vpop.f32.mrb[134].mxu0  ;;  %v4894_v27 = vpop.f32.mrb[110].mxu1 }
0x1703   :  { %v4813_v7 = vpop.f32.mrb[135].mxu0  ;;  %v4895_v8 = vpop.f32.mrb[111].mxu1 }
0x1704   :  { %v4901_v9 = vcombine.low %v6420_v63, %v6421_v2  ;;  %v4902_v51 = vcombine.low %v6422_v35, %v6423_v4 }
0x1706   :  { %v4909_v10 = vrot.slane %v4901_v9, %v4908_v3  ;;  %v4916_v11 = vrot.slane %v4902_v51, %v4908_v3 }
0x1708   :  { %v4917_v12 = vcombine.low %v4909_v10, %v4916_v11 }
0x170a   :  { %4919 = vst [vmem:[%s8234_s13] sm:$0xff] %v4917_v12 }

</bundles_post_ra>
